<compile_context>
chip_gen: v7x
topology: tpu7x:2x2x1
jax: 0.10.0
libtpu: 0.0.40
codegen_flags: <defaults>
</compile_context>

<pallas_src>
import functools
import math

import jax
import jax.numpy as jnp
from jax import lax
from jax.experimental import pallas as pl
from jax.experimental.pallas import tpu as pltpu


_CPARAMS = pltpu.CompilerParams(
    dimension_semantics=("parallel",),     # shard the 1-D grid across TensorCores
    vmem_limit_bytes=48 * 1024 * 1024,     # explicit budget with headroom
)
_MAX_ROWS = 512                            # row tile for [M, H] activation slabs


def _row_tile(m):
    return m if m <= _MAX_ROWS else _MAX_ROWS


# --------------------------------------------------------------------------
# Kernel math (shared by self / cross attention kernels)
# --------------------------------------------------------------------------

def _mha_math(x, kv, bias, wqkv_ref, bqkv_ref, wo_ref, bo_ref, g_ref, b_ref,
              n_heads, inv_scale):
    """x:[Lq,H] f32, kv:[Lk,H] f32, bias:[1,Lb,Lk] f32 additive mask.
    Returns (post-LN output [Lq,H] f32, attention probs [nH,Lq,Lk] f32)."""
    H = x.shape[-1]
    Dh = H // n_heads

    w = wqkv_ref[...]                               # [H, 3H] bf16 (resident weight)
    bqkv = bqkv_ref[...]                            # [1, 3H]  f32
    xb = x.astype(jnp.bfloat16)
    kvb = kv.astype(jnp.bfloat16)

    # fused QKV projection (bf16 operands, f32 accumulation on the MXU)
    q = jnp.dot(xb, w[:, :H], preferred_element_type=jnp.float32) + bqkv[:, :H]      # [Lq, H]
    kvp = jnp.dot(kvb, w[:, H:], preferred_element_type=jnp.float32) + bqkv[:, H:]   # [Lk, 2H]
    k = kvp[:, :H]
    v = kvp[:, H:]

    # split heads with static lane slices (PyTorch layout: head h = columns [h*Dh:(h+1)*Dh])
    qh = jnp.stack([q[:, h * Dh:(h + 1) * Dh] for h in range(n_heads)], axis=0)  # [nH, Lq, Dh]
    kh = jnp.stack([k[:, h * Dh:(h + 1) * Dh] for h in range(n_heads)], axis=0)  # [nH, Lk, Dh]
    vh = jnp.stack([v[:, h * Dh:(h + 1) * Dh] for h in range(n_heads)], axis=0)  # [nH, Lk, Dh]

    # scores for all heads in one batched dot_general (contract on Dh; no explicit k.T)
    s = lax.dot_general(qh.astype(jnp.bfloat16), kh.astype(jnp.bfloat16),
                        (((2,), (2,)), ((0,), (0,))),
                        preferred_element_type=jnp.float32) * inv_scale           # [nH, Lq, Lk]
    s = s + bias               # additive mask bias (0 / -1e10), broadcast over heads (and rows)

    # numerically stable softmax (f32); reciprocal of the row sum goes to the EUP
    s_max = jnp.max(s, axis=-1, keepdims=True)
    e = jnp.exp(s - s_max)
    p = e * pl.reciprocal(jnp.sum(e, axis=-1, keepdims=True), approx=True)         # [nH, Lq, Lk]

    # P @ V for all heads, then merge heads back to a lane-dense [Lq, H] slab
    ctx = lax.dot_general(p.astype(jnp.bfloat16), vh.astype(jnp.bfloat16),
                          (((2,), (1,)), ((0,), (0,))),
                          preferred_element_type=jnp.float32)                      # [nH, Lq, Dh]
    ctx2d = jnp.concatenate([ctx[h] for h in range(n_heads)], axis=-1)             # [Lq, H]

    # output projection + residual add + LayerNorm fused epilogue (dropout == identity)
    o = jnp.dot(ctx2d.astype(jnp.bfloat16), wo_ref[...],
                preferred_element_type=jnp.float32) + bo_ref[...]
    y = x + o
    mu = jnp.mean(y, axis=-1, keepdims=True)
    var = jnp.mean((y - mu) * (y - mu), axis=-1, keepdims=True)
    y = (y - mu) * lax.rsqrt(var + 1e-5) * g_ref[...] + b_ref[...]
    return y, p


def _self_mha_kernel(x_ref, bias_ref, wqkv_ref, bqkv_ref, wo_ref, bo_ref,
                     g_ref, b_ref, o_ref, *, n_heads, inv_scale):
    x = x_ref[0]                                    # K/V read from the same VMEM slab (one DMA)
    y, _ = _mha_math(x, x, bias_ref[...], wqkv_ref, bqkv_ref, wo_ref, bo_ref,
                     g_ref, b_ref, n_heads, inv_scale)
    o_ref[0] = y


def _cross_mha_kernel(x_ref, kv_ref, bias_ref, wqkv_ref, bqkv_ref, wo_ref, bo_ref,
                      g_ref, b_ref, o_ref, *, n_heads, inv_scale):
    y, _ = _mha_math(x_ref[0], kv_ref[0], bias_ref[...], wqkv_ref, bqkv_ref, wo_ref, bo_ref,
                     g_ref, b_ref, n_heads, inv_scale)
    o_ref[0] = y


def _cross_mha_kernel_with_attn(x_ref, kv_ref, bias_ref, wqkv_ref, bqkv_ref, wo_ref, bo_ref,
                                g_ref, b_ref, o_ref, attn_ref, *, n_heads, inv_scale):
    y, p = _mha_math(x_ref[0], kv_ref[0], bias_ref[...], wqkv_ref, bqkv_ref, wo_ref, bo_ref,
                     g_ref, b_ref, n_heads, inv_scale)
    o_ref[0] = y
    attn_ref[0] = p


def _ffn_ln_kernel(x_ref, w1_ref, b1_ref, w2_ref, b2_ref, g_ref, b_ref, o_ref):
    # relu(x@W1+b1)@W2+b2, then residual add + LayerNorm (fused epilogue)
    x = x_ref[...]                                                          # [tm, H] f32
    h = jnp.dot(x.astype(jnp.bfloat16), w1_ref[...],
                preferred_element_type=jnp.float32) + b1_ref[...]
    h = jnp.maximum(h, 0.0)
    y = jnp.dot(h.astype(jnp.bfloat16), w2_ref[...],
                preferred_element_type=jnp.float32) + b2_ref[...]
    y = x + y
    mu = jnp.mean(y, axis=-1, keepdims=True)
    var = jnp.mean((y - mu) * (y - mu), axis=-1, keepdims=True)
    o_ref[...] = (y - mu) * lax.rsqrt(var + 1e-5) * g_ref[...] + b_ref[...]


def _linear_kernel(x_ref, w_ref, b_ref, o_ref):
    o_ref[...] = jnp.dot(x_ref[...].astype(jnp.bfloat16), w_ref[...],
                         preferred_element_type=jnp.float32) + b_ref[...]


def _embed_combine_kernel(t_ref, p_ref, o_ref, *, scale):
    # tok_emb * sqrt(hidden) + pos_emb (pos broadcast over batch in-kernel, no HBM copy)
    o_ref[0] = t_ref[0] * scale + p_ref[...]


# --------------------------------------------------------------------------
# pallas_call wrappers
# --------------------------------------------------------------------------

def pallas_self_attn_block(ap, g, b, x, bias, n_heads):
    """Fused masked self-attention block (query == key == value). Returns post-LN output."""
    B, Lq, H = x.shape
    Lk = Lq
    inv_scale = 1.0 / math.sqrt(H // n_heads)
    kernel = functools.partial(_self_mha_kernel, n_heads=n_heads, inv_scale=inv_scale)
    return pl.pallas_call(
        kernel,
        out_shape=jax.ShapeDtypeStruct((B, Lq, H), jnp.float32),
        grid=(B,),
        in_specs=[
            pl.BlockSpec((1, Lq, H), lambda i: (i, 0, 0)),         # query/kv slab (single DMA)
            pl.BlockSpec((1, Lq, Lk), lambda i: (i, 0, 0)),        # additive causal mask bias
            pl.BlockSpec((H, 3 * H), lambda i: (0, 0)),            # fused QKV weight (resident)
            pl.BlockSpec((1, 3 * H), lambda i: (0, 0)),
            pl.BlockSpec((H, H), lambda i: (0, 0)),                # output projection (resident)
            pl.BlockSpec((1, H), lambda i: (0, 0)),
            pl.BlockSpec((1, H), lambda i: (0, 0)),                # LN gamma
            pl.BlockSpec((1, H), lambda i: (0, 0)),                # LN beta
        ],
        out_specs=pl.BlockSpec((1, Lq, H), lambda i: (i, 0, 0)),
        compiler_params=_CPARAMS,
    )(x, bias, ap["wqkv"], ap["bqkv"], ap["wo"], ap["bo"], g, b)


def pallas_cross_attn_block(ap, g, b, query, kv, bias, n_heads, emit_attn):
    """Fused encoder-decoder attention block. Returns (post-LN output, attention or None)."""
    B, Lq, H = query.shape
    Lk = kv.shape[1]
    Lb = bias.shape[1]                    # 1 for the source padding mask (broadcast in-kernel)
    inv_scale = 1.0 / math.sqrt(H // n_heads)

    in_specs = [
        pl.BlockSpec((1, Lq, H), lambda i: (i, 0, 0)),             # query slab of this batch
        pl.BlockSpec((1, Lk, H), lambda i: (i, 0, 0)),             # key/value slab (enc_src)
        pl.BlockSpec((1, Lb, Lk), lambda i: (i, 0, 0)),            # additive mask bias
        pl.BlockSpec((H, 3 * H), lambda i: (0, 0)),                # fused QKV weight (resident)
        pl.BlockSpec((1, 3 * H), lambda i: (0, 0)),
        pl.BlockSpec((H, H), lambda i: (0, 0)),                    # output projection (resident)
        pl.BlockSpec((1, H), lambda i: (0, 0)),
        pl.BlockSpec((1, H), lambda i: (0, 0)),                    # LN gamma
        pl.BlockSpec((1, H), lambda i: (0, 0)),                    # LN beta
    ]
    out_spec_x = pl.BlockSpec((1, Lq, H), lambda i: (i, 0, 0))

    if emit_attn:
        kernel = functools.partial(_cross_mha_kernel_with_attn, n_heads=n_heads, inv_scale=inv_scale)
        out_shape = (jax.ShapeDtypeStruct((B, Lq, H), jnp.float32),
                     jax.ShapeDtypeStruct((B, n_heads, Lq, Lk), jnp.float32))
        out_specs = (out_spec_x,
                     pl.BlockSpec((1, n_heads, Lq, Lk), lambda i: (i, 0, 0, 0)))
    else:
        kernel = functools.partial(_cross_mha_kernel, n_heads=n_heads, inv_scale=inv_scale)
        out_shape = jax.ShapeDtypeStruct((B, Lq, H), jnp.float32)
        out_specs = out_spec_x

    res = pl.pallas_call(
        kernel, out_shape=out_shape, grid=(B,),
        in_specs=in_specs, out_specs=out_specs,
        compiler_params=_CPARAMS,
    )(query, kv, bias, ap["wqkv"], ap["bqkv"], ap["wo"], ap["bo"], g, b)

    if emit_attn:
        return res[0], res[1]
    return res, None


def pallas_ffn_block(x2d, w1, b1, w2, b2, g, b):
    M, H = x2d.shape
    P = w1.shape[1]
    tm = _row_tile(M)
    return pl.pallas_call(
        _ffn_ln_kernel,
        out_shape=jax.ShapeDtypeStruct((M, H), jnp.float32),
        grid=(pl.cdiv(M, tm),),
        in_specs=[pl.BlockSpec((tm, H), lambda i: (i, 0)),
                  pl.BlockSpec((H, P), lambda i: (0, 0)),          # W1 resident
                  pl.BlockSpec((1, P), lambda i: (0, 0)),
                  pl.BlockSpec((P, H), lambda i: (0, 0)),          # W2 resident
                  pl.BlockSpec((1, H), lambda i: (0, 0)),
                  pl.BlockSpec((1, H), lambda i: (0, 0)),
                  pl.BlockSpec((1, H), lambda i: (0, 0))],
        out_specs=pl.BlockSpec((tm, H), lambda i: (i, 0)),
        compiler_params=_CPARAMS,
    )(x2d, w1, b1, w2, b2, g, b)


def pallas_out_projection(x2d, w_pad, b_pad):
    # lane-dense: weight/bias columns padded to a multiple of 128 (pad cols are zero)
    M, H = x2d.shape
    Np = w_pad.shape[1]
    tm = _row_tile(M)
    return pl.pallas_call(
        _linear_kernel,
        out_shape=jax.ShapeDtypeStruct((M, Np), jnp.float32),
        grid=(pl.cdiv(M, tm),),
        in_specs=[pl.BlockSpec((tm, H), lambda i: (i, 0)),
                  pl.BlockSpec((H, Np), lambda i: (0, 0)),
                  pl.BlockSpec((1, Np), lambda i: (0, 0))],
        out_specs=pl.BlockSpec((tm, Np), lambda i: (i, 0)),
        compiler_params=_CPARAMS,
    )(x2d, w_pad, b_pad)


def pallas_embed_combine(tok, pos, scale):
    B, Lt, H = tok.shape
    kernel = functools.partial(_embed_combine_kernel, scale=scale)
    return pl.pallas_call(
        kernel,
        out_shape=jax.ShapeDtypeStruct((B, Lt, H), jnp.float32),
        grid=(B,),
        in_specs=[pl.BlockSpec((1, Lt, H), lambda i: (i, 0, 0)),
                  pl.BlockSpec((Lt, H), lambda i: (0, 0))],        # pos table resident
        out_specs=pl.BlockSpec((1, Lt, H), lambda i: (i, 0, 0)),
        compiler_params=_CPARAMS,
    )(tok, pos)


# --------------------------------------------------------------------------
# Forward-pass composition
# --------------------------------------------------------------------------

def decoder_layer(lp, trg, enc_src, trg_bias, src_bias, n_heads, want_attn):
    B, Lt, H = trg.shape

    # masked self-attention + out-proj + residual + LN (attention probs never written)
    trg = pallas_self_attn_block(lp["self_attn"], lp["ln1_g"], lp["ln1_b"],
                                 trg, trg_bias, n_heads)

    # encoder-decoder attention; probs emitted only for the last layer (the returned value)
    trg, attention = pallas_cross_attn_block(lp["enc_attn"], lp["ln2_g"], lp["ln2_b"],
                                             trg, enc_src, src_bias, n_heads,
                                             emit_attn=want_attn)

    # position-wise feed-forward + residual + LN (fused)
    trg = pallas_ffn_block(trg.reshape(B * Lt, H), lp["w1"], lp["b1"],
                           lp["w2"], lp["b2"], lp["ln3_g"], lp["ln3_b"]).reshape(B, Lt, H)
    return trg, attention


@functools.partial(jax.jit, static_argnames=("n_heads", "output_dim"))
def decoder_forward(params, trg_tokens, enc_src, trg_mask, src_mask, *, n_heads, output_dim):
    B, Lt = trg_tokens.shape
    H = params["tok_emb"].shape[1]

    # TODO(synk): embedding gathers are indexing glue, done in plain JAX (no Pallas gather kernel)
    tok = jnp.take(params["tok_emb"], trg_tokens, axis=0)               # [B, Lt, H]
    pos = params["pos_emb"][:Lt]                                        # [Lt, H]
    x = pallas_embed_combine(tok, pos, math.sqrt(H))                    # [B, Lt, H]
    # TODO(synk): dropout layers are identity (inference mode)

    # masks -> additive biases once per forward; no per-head / per-layer HBM broadcast
    trg_bias = jnp.where(trg_mask == 0, -1e10, 0.0).astype(jnp.float32)[:, 0]   # [B, Lt, Lt]
    src_bias = jnp.where(src_mask == 0, -1e10, 0.0).astype(jnp.float32)[:, 0]   # [B, 1, Ls]

    attention = None
    n_layers = len(params["layers"])
    for li, lp in enumerate(params["layers"]):
        x, attn = decoder_layer(lp, x, enc_src, trg_bias, src_bias, n_heads,
                                want_attn=(li == n_layers - 1))
        if attn is not None:
            attention = attn

    out = pallas_out_projection(x.reshape(B * Lt, H), params["wo_out"], params["bo_out"])
    out = out[:, :output_dim].reshape(B, Lt, output_dim)
    return out, attention


# --------------------------------------------------------------------------
# Deterministic parameter initialization (matches module __init__ shapes)
# --------------------------------------------------------------------------

def _init_linear(key, in_dim, out_dim):
    k1, k2 = jax.random.split(key)
    bound = 1.0 / math.sqrt(in_dim)
    w = jax.random.uniform(k1, (in_dim, out_dim), jnp.float32, -bound, bound)
    b = jax.random.uniform(k2, (out_dim,), jnp.float32, -bound, bound)
    return w, b


def _init_mha(keys, hidden_dim):
    wq, bq = _init_linear(keys[0], hidden_dim, hidden_dim)
    wk, bk = _init_linear(keys[1], hidden_dim, hidden_dim)
    wv, bv = _init_linear(keys[2], hidden_dim, hidden_dim)
    wo, bo = _init_linear(keys[3], hidden_dim, hidden_dim)
    return {
        # matmul weights stored bf16 (pre-cast once; kernels accumulate in f32)
        "wqkv": jnp.concatenate([wq, wk, wv], axis=1).astype(jnp.bfloat16),    # fused [H, 3H]
        "bqkv": jnp.concatenate([bq, bk, bv]).reshape(1, 3 * hidden_dim),
        "wo": wo.astype(jnp.bfloat16),
        "bo": bo.reshape(1, hidden_dim),
    }


def init_params(key, output_dim, hidden_dim, n_layers, pf_dim, max_length=256):
    keys = jax.random.split(key, 4 + n_layers)
    params = {
        "tok_emb": jax.random.normal(keys[0], (output_dim, hidden_dim), jnp.float32),
        "pos_emb": jax.random.normal(keys[1], (max_length, hidden_dim), jnp.float32),
        "layers": [],
    }
    # final projection padded to a lane-dense multiple of 128 (zero pad columns, sliced back later)
    v_pad = ((output_dim + 127) // 128) * 128
    wo, bo = _init_linear(keys[2], hidden_dim, output_dim)
    params["wo_out"] = (jnp.zeros((hidden_dim, v_pad), jnp.float32)
                        .at[:, :output_dim].set(wo).astype(jnp.bfloat16))
    params["bo_out"] = jnp.zeros((1, v_pad), jnp.float32).at[0, :output_dim].set(bo)

    for li in range(n_layers):
        lk = jax.random.split(keys[4 + li], 12)
        lp = {
            "self_attn": _init_mha(lk[0:4], hidden_dim),
            "enc_attn": _init_mha(lk[4:8], hidden_dim),
        }
        w1, b1 = _init_linear(lk[8], hidden_dim, pf_dim)
        w2, b2 = _init_linear(lk[9], pf_dim, hidden_dim)
        lp["w1"], lp["b1"] = w1.astype(jnp.bfloat16), b1.reshape(1, pf_dim)
        lp["w2"], lp["b2"] = w2.astype(jnp.bfloat16), b2.reshape(1, hidden_dim)
        for name in ("ln1", "ln2", "ln3"):
            lp[name + "_g"] = jnp.ones((1, hidden_dim), jnp.float32)
            lp[name + "_b"] = jnp.zeros((1, hidden_dim), jnp.float32)
        params["layers"].append(lp)
    return params


# --------------------------------------------------------------------------
# Main
# --------------------------------------------------------------------------

if __name__ == "__main__":
    B, Lt, Ls = 2, 8, 16
    hidden_dim, n_heads, pf_dim, n_layers = 32, 4, 64, 2
    output_dim = 50

    root = jax.random.PRNGKey(0)
    kp, kt, ke = jax.random.split(root, 3)

    params = init_params(kp, output_dim, hidden_dim, n_layers, pf_dim)

    trg_tokens = jax.random.randint(kt, (B, Lt), 0, output_dim, dtype=jnp.int32)
    enc_src = jax.random.normal(ke, (B, Ls, hidden_dim), jnp.float32)

    # causal target mask [B, 1, Lt, Lt]; source padding mask [B, 1, 1, Ls]
    trg_mask = jnp.tril(jnp.ones((Lt, Lt), jnp.float32))[None, None, :, :]
    trg_mask = jnp.broadcast_to(trg_mask, (B, 1, Lt, Lt))
    src_valid = jnp.stack([jnp.ones((Ls,), jnp.float32),
                           (jnp.arange(Ls) < 12).astype(jnp.float32)])
    src_mask = src_valid[:, None, None, :]                      # [B, 1, 1, Ls]

    out, attention = decoder_forward(params, trg_tokens, enc_src, trg_mask, src_mask,
                                     n_heads=n_heads, output_dim=output_dim)
    jax.block_until_ready((out, attention))

    assert out.shape == (B, Lt, output_dim)
    assert attention.shape == (B, n_heads, Lt, Ls)
    print("KERNEL_OK")
</pallas_src>

<mosaic_0001>
module attributes {stable_mosaic.version = 11 : i64} {
  func.func @_embed_combine_kernel(%arg0: i32, %arg1: memref<1x8x32xf32, #tpu.memory_space<vmem>>, %arg2: memref<8x32xf32, #tpu.memory_space<vmem>>, %arg3: memref<1x8x32xf32, #tpu.memory_space<vmem>>) attributes {dimension_semantics = [#tpu.dimension_semantics<parallel>], iteration_bounds = array<i64: 2>, scalar_prefetch = 0 : i64, scratch_operands = 0 : i64, tpu.core_type = #tpu.core_type<tc>, window_params = [{transform_indices = @transform_0, window_bounds = array<i64: 1, 8, 32>}, {pipeline_mode = #tpu.pipeline_mode<synchronous>, transform_indices = @transform_1, window_bounds = array<i64: 8, 32>}, {transform_indices = @transform_2, window_bounds = array<i64: 1, 8, 32>}]} {
    %c0 = arith.constant 0 : index
    %c0_0 = arith.constant 0 : index
    %c0_1 = arith.constant 0 : index
    %0 = vector.load %arg1[%c0, %c0_0, %c0_1] : memref<1x8x32xf32, #tpu.memory_space<vmem>>, vector<1x8x32xf32>
    %1 = vector.shape_cast %0 : vector<1x8x32xf32> to vector<8x32xf32>
    %cst = arith.constant 5.65685415 : f32
    %2 = vector.broadcast %cst : f32 to vector<8x32xf32>
    %3 = arith.mulf %1, %2 : vector<8x32xf32>
    %c0_2 = arith.constant 0 : index
    %c0_3 = arith.constant 0 : index
    %4 = vector.load %arg2[%c0_2, %c0_3] : memref<8x32xf32, #tpu.memory_space<vmem>>, vector<8x32xf32>
    %5 = arith.addf %3, %4 : vector<8x32xf32>
    %c0_4 = arith.constant 0 : index
    %c0_5 = arith.constant 0 : index
    %c0_6 = arith.constant 0 : index
    %6 = vector.load %arg3[%c0_4, %c0_5, %c0_6] : memref<1x8x32xf32, #tpu.memory_space<vmem>>, vector<1x8x32xf32>
    %7 = vector.shape_cast %6 : vector<1x8x32xf32> to vector<8x32xf32>
    %8 = vector.shape_cast %5 : vector<8x32xf32> to vector<1x8x32xf32>
    tpu.vector_store %arg3[%c0_4, %c0_5, %c0_6], %8 {strides = array<i32>} : memref<1x8x32xf32, #tpu.memory_space<vmem>>, vector<1x8x32xf32>,
    return
  }
  func.func @transform_0(%arg0: i32) -> (i32, i32, i32) {
    %c0_i32 = arith.constant 0 : i32
    %c0_i32_0 = arith.constant 0 : i32
    %c0_i32_1 = arith.constant 0 : i32
    return %arg0, %c0_i32, %c0_i32_0 : i32, i32, i32
  }
  func.func @transform_1(%arg0: i32) -> (i32, i32) {
    %c0_i32 = arith.constant 0 : i32
    %c0_i32_0 = arith.constant 0 : i32
    %c0_i32_1 = arith.constant 0 : i32
    return %c0_i32, %c0_i32_0 : i32, i32
  }
  func.func @transform_2(%arg0: i32) -> (i32, i32, i32) {
    %c0_i32 = arith.constant 0 : i32
    %c0_i32_0 = arith.constant 0 : i32
    %c0_i32_1 = arith.constant 0 : i32
    return %arg0, %c0_i32, %c0_i32_0 : i32, i32, i32
  }
}

module attributes {stable_mosaic.version = 11 : i64} {
  func.func @_cross_mha_kernel(%arg0: i32, %arg1: memref<1x8x32xf32, #tpu.memory_space<vmem>>, %arg2: memref<1x16x32xf32, #tpu.memory_space<vmem>>, %arg3: memref<1x1x16xf32, #tpu.memory_space<vmem>>, %arg4: memref<32x96xbf16, #tpu.memory_space<vmem>>, %arg5: memref<1x96xf32, #tpu.memory_space<vmem>>, %arg6: memref<32x32xbf16, #tpu.memory_space<vmem>>, %arg7: memref<1x32xf32, #tpu.memory_space<vmem>>, %arg8: memref<1x32xf32, #tpu.memory_space<vmem>>, %arg9: memref<1x32xf32, #tpu.memory_space<vmem>>, %arg10: memref<1x8x32xf32, #tpu.memory_space<vmem>>) attributes {dimension_semantics = [#tpu.dimension_semantics<parallel>], iteration_bounds = array<i64: 2>, scalar_prefetch = 0 : i64, scratch_operands = 0 : i64, tpu.core_type = #tpu.core_type<tc>, window_params = [{transform_indices = @transform_0, window_bounds = array<i64: 1, 8, 32>}, {transform_indices = @transform_1, window_bounds = array<i64: 1, 16, 32>}, {transform_indices = @transform_2, window_bounds = array<i64: 1, 1, 16>}, {pipeline_mode = #tpu.pipeline_mode<synchronous>, transform_indices = @transform_3, window_bounds = array<i64: 32, 96>}, {pipeline_mode = #tpu.pipeline_mode<synchronous>, transform_indices = @transform_4, window_bounds = array<i64: 1, 96>}, {pipeline_mode = #tpu.pipeline_mode<synchronous>, transform_indices = @transform_5, window_bounds = array<i64: 32, 32>}, {pipeline_mode = #tpu.pipeline_mode<synchronous>, transform_indices = @transform_6, window_bounds = array<i64: 1, 32>}, {pipeline_mode = #tpu.pipeline_mode<synchronous>, transform_indices = @transform_7, window_bounds = array<i64: 1, 32>}, {pipeline_mode = #tpu.pipeline_mode<synchronous>, transform_indices = @transform_8, window_bounds = array<i64: 1, 32>}, {transform_indices = @transform_9, window_bounds = array<i64: 1, 8, 32>}]} {
    %c0 = arith.constant 0 : index
    %c0_0 = arith.constant 0 : index
    %c0_1 = arith.constant 0 : index
    %0 = vector.load %arg1[%c0, %c0_0, %c0_1] : memref<1x8x32xf32, #tpu.memory_space<vmem>>, vector<1x8x32xf32>
    %1 = vector.shape_cast %0 : vector<1x8x32xf32> to vector<8x32xf32>
    %c0_2 = arith.constant 0 : index
    %c0_3 = arith.constant 0 : index
    %c0_4 = arith.constant 0 : index
    %2 = vector.load %arg2[%c0_2, %c0_3, %c0_4] : memref<1x16x32xf32, #tpu.memory_space<vmem>>, vector<1x16x32xf32>
    %3 = vector.shape_cast %2 : vector<1x16x32xf32> to vector<16x32xf32>
    %c0_5 = arith.constant 0 : index
    %c0_6 = arith.constant 0 : index
    %c0_7 = arith.constant 0 : index
    %4 = vector.load %arg3[%c0_5, %c0_6, %c0_7] : memref<1x1x16xf32, #tpu.memory_space<vmem>>, vector<1x1x16xf32>
    %c0_8 = arith.constant 0 : index
    %c0_9 = arith.constant 0 : index
    %5 = vector.load %arg4[%c0_8, %c0_9] : memref<32x96xbf16, #tpu.memory_space<vmem>>, vector<32x96xbf16>
    %c0_10 = arith.constant 0 : index
    %c0_11 = arith.constant 0 : index
    %6 = vector.load %arg5[%c0_10, %c0_11] : memref<1x96xf32, #tpu.memory_space<vmem>>, vector<1x96xf32>
    %7 = arith.truncf %1 : vector<8x32xf32> to vector<8x32xbf16>
    %8 = arith.truncf %3 : vector<16x32xf32> to vector<16x32xbf16>
    %9 = vector.extract_strided_slice %5 {offsets = [0, 0], sizes = [32, 32], strides = [1, 1]} : vector<32x96xbf16> to vector<32x32xbf16>
    %cst = arith.constant dense<0.000000e+00> : vector<8x32xf32>
    %10 = tpu.matmul %7, %9, %cst {dimension_numbers = #tpu.dot_dimension_numbers<[1], [0], [0], [1], [0, 0, 1, 1], [], []>} : vector<8x32xbf16>, vector<32x32xbf16>, vector<8x32xf32> -> vector<8x32xf32>
    %11 = vector.extract_strided_slice %6 {offsets = [0, 0], sizes = [1, 32], strides = [1, 1]} : vector<1x96xf32> to vector<1x32xf32>
    %12 = vector.broadcast %11 : vector<1x32xf32> to vector<8x32xf32>
    %13 = arith.addf %10, %12 : vector<8x32xf32>
    %14 = vector.extract_strided_slice %5 {offsets = [0, 32], sizes = [32, 64], strides = [1, 1]} : vector<32x96xbf16> to vector<32x64xbf16>
    %cst_12 = arith.constant dense<0.000000e+00> : vector<16x64xf32>
    %15 = tpu.matmul %8, %14, %cst_12 {dimension_numbers = #tpu.dot_dimension_numbers<[1], [0], [0], [1], [0, 0, 1, 1], [], []>} : vector<16x32xbf16>, vector<32x64xbf16>, vector<16x64xf32> -> vector<16x64xf32>
    %16 = vector.extract_strided_slice %6 {offsets = [0, 32], sizes = [1, 64], strides = [1, 1]} : vector<1x96xf32> to vector<1x64xf32>
    %17 = vector.broadcast %16 : vector<1x64xf32> to vector<16x64xf32>
    %18 = arith.addf %15, %17 : vector<16x64xf32>
    %19 = vector.extract_strided_slice %18 {offsets = [0, 0], sizes = [16, 32], strides = [1, 1]} : vector<16x64xf32> to vector<16x32xf32>
    %20 = vector.extract_strided_slice %18 {offsets = [0, 32], sizes = [16, 32], strides = [1, 1]} : vector<16x64xf32> to vector<16x32xf32>
    %21 = vector.extract_strided_slice %13 {offsets = [0, 0], sizes = [8, 8], strides = [1, 1]} : vector<8x32xf32> to vector<8x8xf32>
    %22 = vector.extract_strided_slice %13 {offsets = [0, 8], sizes = [8, 8], strides = [1, 1]} : vector<8x32xf32> to vector<8x8xf32>
    %23 = vector.extract_strided_slice %13 {offsets = [0, 16], sizes = [8, 8], strides = [1, 1]} : vector<8x32xf32> to vector<8x8xf32>
    %24 = vector.extract_strided_slice %13 {offsets = [0, 24], sizes = [8, 8], strides = [1, 1]} : vector<8x32xf32> to vector<8x8xf32>
    %25 = vector.shape_cast %21 : vector<8x8xf32> to vector<1x8x8xf32>
    %26 = vector.shape_cast %22 : vector<8x8xf32> to vector<1x8x8xf32>
    %27 = vector.shape_cast %23 : vector<8x8xf32> to vector<1x8x8xf32>
    %28 = vector.shape_cast %24 : vector<8x8xf32> to vector<1x8x8xf32>
    %29 = tpu.concatenate %25, %26, %27, %28 in 0 : vector<1x8x8xf32>, vector<1x8x8xf32>, vector<1x8x8xf32>, vector<1x8x8xf32> -> vector<4x8x8xf32>
    %30 = vector.extract_strided_slice %19 {offsets = [0, 0], sizes = [16, 8], strides = [1, 1]} : vector<16x32xf32> to vector<16x8xf32>
    %31 = vector.extract_strided_slice %19 {offsets = [0, 8], sizes = [16, 8], strides = [1, 1]} : vector<16x32xf32> to vector<16x8xf32>
    %32 = vector.extract_strided_slice %19 {offsets = [0, 16], sizes = [16, 8], strides = [1, 1]} : vector<16x32xf32> to vector<16x8xf32>
    %33 = vector.extract_strided_slice %19 {offsets = [0, 24], sizes = [16, 8], strides = [1, 1]} : vector<16x32xf32> to vector<16x8xf32>
    %34 = vector.shape_cast %30 : vector<16x8xf32> to vector<1x16x8xf32>
    %35 = vector.shape_cast %31 : vector<16x8xf32> to vector<1x16x8xf32>
    %36 = vector.shape_cast %32 : vector<16x8xf32> to vector<1x16x8xf32>
    %37 = vector.shape_cast %33 : vector<16x8xf32> to vector<1x16x8xf32>
    %38 = tpu.concatenate %34, %35, %36, %37 in 0 : vector<1x16x8xf32>, vector<1x16x8xf32>, vector<1x16x8xf32>, vector<1x16x8xf32> -> vector<4x16x8xf32>
    %39 = vector.extract_strided_slice %20 {offsets = [0, 0], sizes = [16, 8], strides = [1, 1]} : vector<16x32xf32> to vector<16x8xf32>
    %40 = vector.extract_strided_slice %20 {offsets = [0, 8], sizes = [16, 8], strides = [1, 1]} : vector<16x32xf32> to vector<16x8xf32>
    %41 = vector.extract_strided_slice %20 {offsets = [0, 16], sizes = [16, 8], strides = [1, 1]} : vector<16x32xf32> to vector<16x8xf32>
    %42 = vector.extract_strided_slice %20 {offsets = [0, 24], sizes = [16, 8], strides = [1, 1]} : vector<16x32xf32> to vector<16x8xf32>
    %43 = vector.shape_cast %39 : vector<16x8xf32> to vector<1x16x8xf32>
    %44 = vector.shape_cast %40 : vector<16x8xf32> to vector<1x16x8xf32>
    %45 = vector.shape_cast %41 : vector<16x8xf32> to vector<1x16x8xf32>
    %46 = vector.shape_cast %42 : vector<16x8xf32> to vector<1x16x8xf32>
    %47 = tpu.concatenate %43, %44, %45, %46 in 0 : vector<1x16x8xf32>, vector<1x16x8xf32>, vector<1x16x8xf32>, vector<1x16x8xf32> -> vector<4x16x8xf32>
    %48 = arith.truncf %29 : vector<4x8x8xf32> to vector<4x8x8xbf16>
    %49 = arith.truncf %38 : vector<4x16x8xf32> to vector<4x16x8xbf16>
    %cst_13 = arith.constant dense<0.000000e+00> : vector<4x8x16xf32>
    %50 = tpu.matmul %48, %49, %cst_13 {dimension_numbers = #tpu.dot_dimension_numbers<[2], [2], [1], [1], [0, 0, 0, 1, 1, 1], [0], [0]>} : vector<4x8x8xbf16>, vector<4x16x8xbf16>, vector<4x8x16xf32> -> vector<4x8x16xf32>
    %cst_14 = arith.constant 0.353553385 : f32
    %51 = vector.broadcast %cst_14 : f32 to vector<4x8x16xf32>
    %52 = arith.mulf %50, %51 : vector<4x8x16xf32>
    %53 = vector.broadcast %4 : vector<1x1x16xf32> to vector<4x8x16xf32>
    %54 = arith.addf %52, %53 : vector<4x8x16xf32>
    %cst_15 = arith.constant dense<0xFF800000> : vector<4x8xf32>
    %55 = vector.multi_reduction <maximumf>, %54, %cst_15 [2] : vector<4x8x16xf32> to vector<4x8xf32>
    %56 = vector.shape_cast %55 : vector<4x8xf32> to vector<4x8x1xf32>
    %57 = vector.broadcast %56 : vector<4x8x1xf32> to vector<4x8x16xf32>
    %58 = arith.subf %54, %57 : vector<4x8x16xf32>
    %59 = math.exp %58 : vector<4x8x16xf32>
    %cst_16 = arith.constant dense<0.000000e+00> : vector<4x8xf32>
    %60 = vector.multi_reduction <add>, %59, %cst_16 [2] : vector<4x8x16xf32> to vector<4x8xf32>
    %61 = vector.shape_cast %60 : vector<4x8xf32> to vector<4x8x1xf32>
    %62 = tpu.reciprocal %61 {approx = true} : vector<4x8x1xf32> -> vector<4x8x1xf32>
    %63 = vector.broadcast %62 : vector<4x8x1xf32> to vector<4x8x16xf32>
    %64 = arith.mulf %59, %63 : vector<4x8x16xf32>
    %65 = arith.truncf %64 : vector<4x8x16xf32> to vector<4x8x16xbf16>
    %66 = arith.truncf %47 : vector<4x16x8xf32> to vector<4x16x8xbf16>
    %cst_17 = arith.constant dense<0.000000e+00> : vector<4x8x8xf32>
    %67 = tpu.matmul %65, %66, %cst_17 {dimension_numbers = #tpu.dot_dimension_numbers<[2], [1], [1], [2], [0, 0, 0, 1, 1, 2], [0], [0]>} : vector<4x8x16xbf16>, vector<4x16x8xbf16>, vector<4x8x8xf32> -> vector<4x8x8xf32>
    %68 = vector.extract_strided_slice %67 {offsets = [0, 0, 0], sizes = [1, 8, 8], strides = [1, 1, 1]} : vector<4x8x8xf32> to vector<1x8x8xf32>
    %69 = vector.shape_cast %68 : vector<1x8x8xf32> to vector<8x8xf32>
    %70 = vector.extract_strided_slice %67 {offsets = [1, 0, 0], sizes = [1, 8, 8], strides = [1, 1, 1]} : vector<4x8x8xf32> to vector<1x8x8xf32>
    %71 = vector.shape_cast %70 : vector<1x8x8xf32> to vector<8x8xf32>
    %72 = vector.extract_strided_slice %67 {offsets = [2, 0, 0], sizes = [1, 8, 8], strides = [1, 1, 1]} : vector<4x8x8xf32> to vector<1x8x8xf32>
    %73 = vector.shape_cast %72 : vector<1x8x8xf32> to vector<8x8xf32>
    %74 = vector.extract_strided_slice %67 {offsets = [3, 0, 0], sizes = [1, 8, 8], strides = [1, 1, 1]} : vector<4x8x8xf32> to vector<1x8x8xf32>
    %75 = vector.shape_cast %74 : vector<1x8x8xf32> to vector<8x8xf32>
    %76 = tpu.concatenate %69, %71, %73, %75 in 1 : vector<8x8xf32>, vector<8x8xf32>, vector<8x8xf32>, vector<8x8xf32> -> vector<8x32xf32>
    %77 = arith.truncf %76 : vector<8x32xf32> to vector<8x32xbf16>
    %c0_18 = arith.constant 0 : index
    %c0_19 = arith.constant 0 : index
    %78 = vector.load %arg6[%c0_18, %c0_19] : memref<32x32xbf16, #tpu.memory_space<vmem>>, vector<32x32xbf16>
    %cst_20 = arith.constant dense<0.000000e+00> : vector<8x32xf32>
    %79 = tpu.matmul %77, %78, %cst_20 {dimension_numbers = #tpu.dot_dimension_numbers<[1], [0], [0], [1], [0, 0, 1, 1], [], []>} : vector<8x32xbf16>, vector<32x32xbf16>, vector<8x32xf32> -> vector<8x32xf32>
    %c0_21 = arith.constant 0 : index
    %c0_22 = arith.constant 0 : index
    %80 = vector.load %arg7[%c0_21, %c0_22] : memref<1x32xf32, #tpu.memory_space<vmem>>, vector<1x32xf32>
    %81 = vector.broadcast %80 : vector<1x32xf32> to vector<8x32xf32>
    %82 = arith.addf %79, %81 : vector<8x32xf32>
    %83 = arith.addf %1, %82 : vector<8x32xf32>
    %cst_23 = arith.constant dense<0.000000e+00> : vector<8xf32>
    %84 = vector.multi_reduction <add>, %83, %cst_23 [1] : vector<8x32xf32> to vector<8xf32>
    %85 = vector.shape_cast %84 : vector<8xf32> to vector<8x1xf32>
    %cst_24 = arith.constant 3.200000e+01 : f32
    %86 = vector.broadcast %cst_24 : f32 to vector<8x1xf32>
    %87 = arith.divf %85, %86 : vector<8x1xf32>
    %88 = vector.broadcast %87 : vector<8x1xf32> to vector<8x32xf32>
    %89 = arith.subf %83, %88 : vector<8x32xf32>
    %90 = vector.broadcast %87 : vector<8x1xf32> to vector<8x32xf32>
    %91 = arith.subf %83, %90 : vector<8x32xf32>
    %92 = arith.mulf %89, %91 : vector<8x32xf32>
    %cst_25 = arith.constant dense<0.000000e+00> : vector<8xf32>
    %93 = vector.multi_reduction <add>, %92, %cst_25 [1] : vector<8x32xf32> to vector<8xf32>
    %94 = vector.shape_cast %93 : vector<8xf32> to vector<8x1xf32>
    %cst_26 = arith.constant 3.200000e+01 : f32
    %95 = vector.broadcast %cst_26 : f32 to vector<8x1xf32>
    %96 = arith.divf %94, %95 : vector<8x1xf32>
    %97 = vector.broadcast %87 : vector<8x1xf32> to vector<8x32xf32>
    %98 = arith.subf %83, %97 : vector<8x32xf32>
    %cst_27 = arith.constant 9.99999974E-6 : f32
    %99 = vector.broadcast %cst_27 : f32 to vector<8x1xf32>
    %100 = arith.addf %96, %99 : vector<8x1xf32>
    %101 = math.rsqrt %100 : vector<8x1xf32>
    %102 = vector.broadcast %101 : vector<8x1xf32> to vector<8x32xf32>
    %103 = arith.mulf %98, %102 : vector<8x32xf32>
    %c0_28 = arith.constant 0 : index
    %c0_29 = arith.constant 0 : index
    %104 = vector.load %arg8[%c0_28, %c0_29] : memref<1x32xf32, #tpu.memory_space<vmem>>, vector<1x32xf32>
    %105 = vector.broadcast %104 : vector<1x32xf32> to vector<8x32xf32>
    %106 = arith.mulf %103, %105 : vector<8x32xf32>
    %c0_30 = arith.constant 0 : index
    %c0_31 = arith.constant 0 : index
    %107 = vector.load %arg9[%c0_30, %c0_31] : memref<1x32xf32, #tpu.memory_space<vmem>>, vector<1x32xf32>
    %108 = vector.broadcast %107 : vector<1x32xf32> to vector<8x32xf32>
    %109 = arith.addf %106, %108 : vector<8x32xf32>
    %c0_32 = arith.constant 0 : index
    %c0_33 = arith.constant 0 : index
    %c0_34 = arith.constant 0 : index
    %110 = vector.load %arg10[%c0_32, %c0_33, %c0_34] : memref<1x8x32xf32, #tpu.memory_space<vmem>>, vector<1x8x32xf32>
    %111 = vector.shape_cast %110 : vector<1x8x32xf32> to vector<8x32xf32>
    %112 = vector.shape_cast %109 : vector<8x32xf32> to vector<1x8x32xf32>
    tpu.vector_store %arg10[%c0_32, %c0_33, %c0_34], %112 {strides = array<i32>} : memref<1x8x32xf32, #tpu.memory_space<vmem>>, vector<1x8x32xf32>,
    return
  }
  func.func @transform_0(%arg0: i32) -> (i32, i32, i32) {
    %c0_i32 = arith.constant 0 : i32
    %c0_i32_0 = arith.constant 0 : i32
    %c0_i32_1 = arith.constant 0 : i32
    return %arg0, %c0_i32, %c0_i32_0 : i32, i32, i32
  }
  func.func @transform_1(%arg0: i32) -> (i32, i32, i32) {
    %c0_i32 = arith.constant 0 : i32
    %c0_i32_0 = arith.constant 0 : i32
    %c0_i32_1 = arith.constant 0 : i32
    return %arg0, %c0_i32, %c0_i32_0 : i32, i32, i32
  }
  func.func @transform_2(%arg0: i32) -> (i32, i32, i32) {
    %c0_i32 = arith.constant 0 : i32
    %c0_i32_0 = arith.constant 0 : i32
    %c0_i32_1 = arith.constant 0 : i32
    return %arg0, %c0_i32, %c0_i32_0 : i32, i32, i32
  }
  func.func @transform_3(%arg0: i32) -> (i32, i32) {
    %c0_i32 = arith.constant 0 : i32
    %c0_i32_0 = arith.constant 0 : i32
    %c0_i32_1 = arith.constant 0 : i32
    return %c0_i32, %c0_i32_0 : i32, i32
  }
  func.func @transform_4(%arg0: i32) -> (i32, i32) {
    %c0_i32 = arith.constant 0 : i32
    %c0_i32_0 = arith.constant 0 : i32
    %c0_i32_1 = arith.constant 0 : i32
    return %c0_i32, %c0_i32_0 : i32, i32
  }
  func.func @transform_5(%arg0: i32) -> (i32, i32) {
    %c0_i32 = arith.constant 0 : i32
    %c0_i32_0 = arith.constant 0 : i32
    %c0_i32_1 = arith.constant 0 : i32
    return %c0_i32, %c0_i32_0 : i32, i32
  }
  func.func @transform_6(%arg0: i32) -> (i32, i32) {
    %c0_i32 = arith.constant 0 : i32
    %c0_i32_0 = arith.constant 0 : i32
    %c0_i32_1 = arith.constant 0 : i32
    return %c0_i32, %c0_i32_0 : i32, i32
  }
  func.func @transform_7(%arg0: i32) -> (i32, i32) {
    %c0_i32 = arith.constant 0 : i32
    %c0_i32_0 = arith.constant 0 : i32
    %c0_i32_1 = arith.constant 0 : i32
    return %c0_i32, %c0_i32_0 : i32, i32
  }
  func.func @transform_8(%arg0: i32) -> (i32, i32) {
    %c0_i32 = arith.constant 0 : i32
    %c0_i32_0 = arith.constant 0 : i32
    %c0_i32_1 = arith.constant 0 : i32
    return %c0_i32, %c0_i32_0 : i32, i32
  }
  func.func @transform_9(%arg0: i32) -> (i32, i32, i32) {
    %c0_i32 = arith.constant 0 : i32
    %c0_i32_0 = arith.constant 0 : i32
    %c0_i32_1 = arith.constant 0 : i32
    return %arg0, %c0_i32, %c0_i32_0 : i32, i32, i32
  }
}

module attributes {stable_mosaic.version = 11 : i64} {
  func.func @_self_mha_kernel(%arg0: i32, %arg1: memref<1x8x32xf32, #tpu.memory_space<vmem>>, %arg2: memref<1x8x8xf32, #tpu.memory_space<vmem>>, %arg3: memref<32x96xbf16, #tpu.memory_space<vmem>>, %arg4: memref<1x96xf32, #tpu.memory_space<vmem>>, %arg5: memref<32x32xbf16, #tpu.memory_space<vmem>>, %arg6: memref<1x32xf32, #tpu.memory_space<vmem>>, %arg7: memref<1x32xf32, #tpu.memory_space<vmem>>, %arg8: memref<1x32xf32, #tpu.memory_space<vmem>>, %arg9: memref<1x8x32xf32, #tpu.memory_space<vmem>>) attributes {dimension_semantics = [#tpu.dimension_semantics<parallel>], iteration_bounds = array<i64: 2>, scalar_prefetch = 0 : i64, scratch_operands = 0 : i64, tpu.core_type = #tpu.core_type<tc>, window_params = [{transform_indices = @transform_0, window_bounds = array<i64: 1, 8, 32>}, {transform_indices = @transform_1, window_bounds = array<i64: 1, 8, 8>}, {pipeline_mode = #tpu.pipeline_mode<synchronous>, transform_indices = @transform_2, window_bounds = array<i64: 32, 96>}, {pipeline_mode = #tpu.pipeline_mode<synchronous>, transform_indices = @transform_3, window_bounds = array<i64: 1, 96>}, {pipeline_mode = #tpu.pipeline_mode<synchronous>, transform_indices = @transform_4, window_bounds = array<i64: 32, 32>}, {pipeline_mode = #tpu.pipeline_mode<synchronous>, transform_indices = @transform_5, window_bounds = array<i64: 1, 32>}, {pipeline_mode = #tpu.pipeline_mode<synchronous>, transform_indices = @transform_6, window_bounds = array<i64: 1, 32>}, {pipeline_mode = #tpu.pipeline_mode<synchronous>, transform_indices = @transform_7, window_bounds = array<i64: 1, 32>}, {transform_indices = @transform_8, window_bounds = array<i64: 1, 8, 32>}]} {
    %c0 = arith.constant 0 : index
    %c0_0 = arith.constant 0 : index
    %c0_1 = arith.constant 0 : index
    %0 = vector.load %arg1[%c0, %c0_0, %c0_1] : memref<1x8x32xf32, #tpu.memory_space<vmem>>, vector<1x8x32xf32>
    %1 = vector.shape_cast %0 : vector<1x8x32xf32> to vector<8x32xf32>
    %c0_2 = arith.constant 0 : index
    %c0_3 = arith.constant 0 : index
    %c0_4 = arith.constant 0 : index
    %2 = vector.load %arg2[%c0_2, %c0_3, %c0_4] : memref<1x8x8xf32, #tpu.memory_space<vmem>>, vector<1x8x8xf32>
    %c0_5 = arith.constant 0 : index
    %c0_6 = arith.constant 0 : index
    %3 = vector.load %arg3[%c0_5, %c0_6] : memref<32x96xbf16, #tpu.memory_space<vmem>>, vector<32x96xbf16>
    %c0_7 = arith.constant 0 : index
    %c0_8 = arith.constant 0 : index
    %4 = vector.load %arg4[%c0_7, %c0_8] : memref<1x96xf32, #tpu.memory_space<vmem>>, vector<1x96xf32>
    %5 = arith.truncf %1 : vector<8x32xf32> to vector<8x32xbf16>
    %6 = arith.truncf %1 : vector<8x32xf32> to vector<8x32xbf16>
    %7 = vector.extract_strided_slice %3 {offsets = [0, 0], sizes = [32, 32], strides = [1, 1]} : vector<32x96xbf16> to vector<32x32xbf16>
    %cst = arith.constant dense<0.000000e+00> : vector<8x32xf32>
    %8 = tpu.matmul %5, %7, %cst {dimension_numbers = #tpu.dot_dimension_numbers<[1], [0], [0], [1], [0, 0, 1, 1], [], []>} : vector<8x32xbf16>, vector<32x32xbf16>, vector<8x32xf32> -> vector<8x32xf32>
    %9 = vector.extract_strided_slice %4 {offsets = [0, 0], sizes = [1, 32], strides = [1, 1]} : vector<1x96xf32> to vector<1x32xf32>
    %10 = vector.broadcast %9 : vector<1x32xf32> to vector<8x32xf32>
    %11 = arith.addf %8, %10 : vector<8x32xf32>
    %12 = vector.extract_strided_slice %3 {offsets = [0, 32], sizes = [32, 64], strides = [1, 1]} : vector<32x96xbf16> to vector<32x64xbf16>
    %cst_9 = arith.constant dense<0.000000e+00> : vector<8x64xf32>
    %13 = tpu.matmul %6, %12, %cst_9 {dimension_numbers = #tpu.dot_dimension_numbers<[1], [0], [0], [1], [0, 0, 1, 1], [], []>} : vector<8x32xbf16>, vector<32x64xbf16>, vector<8x64xf32> -> vector<8x64xf32>
    %14 = vector.extract_strided_slice %4 {offsets = [0, 32], sizes = [1, 64], strides = [1, 1]} : vector<1x96xf32> to vector<1x64xf32>
    %15 = vector.broadcast %14 : vector<1x64xf32> to vector<8x64xf32>
    %16 = arith.addf %13, %15 : vector<8x64xf32>
    %17 = vector.extract_strided_slice %16 {offsets = [0, 0], sizes = [8, 32], strides = [1, 1]} : vector<8x64xf32> to vector<8x32xf32>
    %18 = vector.extract_strided_slice %16 {offsets = [0, 32], sizes = [8, 32], strides = [1, 1]} : vector<8x64xf32> to vector<8x32xf32>
    %19 = vector.extract_strided_slice %11 {offsets = [0, 0], sizes = [8, 8], strides = [1, 1]} : vector<8x32xf32> to vector<8x8xf32>
    %20 = vector.extract_strided_slice %11 {offsets = [0, 8], sizes = [8, 8], strides = [1, 1]} : vector<8x32xf32> to vector<8x8xf32>
    %21 = vector.extract_strided_slice %11 {offsets = [0, 16], sizes = [8, 8], strides = [1, 1]} : vector<8x32xf32> to vector<8x8xf32>
    %22 = vector.extract_strided_slice %11 {offsets = [0, 24], sizes = [8, 8], strides = [1, 1]} : vector<8x32xf32> to vector<8x8xf32>
    %23 = vector.shape_cast %19 : vector<8x8xf32> to vector<1x8x8xf32>
    %24 = vector.shape_cast %20 : vector<8x8xf32> to vector<1x8x8xf32>
    %25 = vector.shape_cast %21 : vector<8x8xf32> to vector<1x8x8xf32>
    %26 = vector.shape_cast %22 : vector<8x8xf32> to vector<1x8x8xf32>
    %27 = tpu.concatenate %23, %24, %25, %26 in 0 : vector<1x8x8xf32>, vector<1x8x8xf32>, vector<1x8x8xf32>, vector<1x8x8xf32> -> vector<4x8x8xf32>
    %28 = vector.extract_strided_slice %17 {offsets = [0, 0], sizes = [8, 8], strides = [1, 1]} : vector<8x32xf32> to vector<8x8xf32>
    %29 = vector.extract_strided_slice %17 {offsets = [0, 8], sizes = [8, 8], strides = [1, 1]} : vector<8x32xf32> to vector<8x8xf32>
    %30 = vector.extract_strided_slice %17 {offsets = [0, 16], sizes = [8, 8], strides = [1, 1]} : vector<8x32xf32> to vector<8x8xf32>
    %31 = vector.extract_strided_slice %17 {offsets = [0, 24], sizes = [8, 8], strides = [1, 1]} : vector<8x32xf32> to vector<8x8xf32>
    %32 = vector.shape_cast %28 : vector<8x8xf32> to vector<1x8x8xf32>
    %33 = vector.shape_cast %29 : vector<8x8xf32> to vector<1x8x8xf32>
    %34 = vector.shape_cast %30 : vector<8x8xf32> to vector<1x8x8xf32>
    %35 = vector.shape_cast %31 : vector<8x8xf32> to vector<1x8x8xf32>
    %36 = tpu.concatenate %32, %33, %34, %35 in 0 : vector<1x8x8xf32>, vector<1x8x8xf32>, vector<1x8x8xf32>, vector<1x8x8xf32> -> vector<4x8x8xf32>
    %37 = vector.extract_strided_slice %18 {offsets = [0, 0], sizes = [8, 8], strides = [1, 1]} : vector<8x32xf32> to vector<8x8xf32>
    %38 = vector.extract_strided_slice %18 {offsets = [0, 8], sizes = [8, 8], strides = [1, 1]} : vector<8x32xf32> to vector<8x8xf32>
    %39 = vector.extract_strided_slice %18 {offsets = [0, 16], sizes = [8, 8], strides = [1, 1]} : vector<8x32xf32> to vector<8x8xf32>
    %40 = vector.extract_strided_slice %18 {offsets = [0, 24], sizes = [8, 8], strides = [1, 1]} : vector<8x32xf32> to vector<8x8xf32>
    %41 = vector.shape_cast %37 : vector<8x8xf32> to vector<1x8x8xf32>
    %42 = vector.shape_cast %38 : vector<8x8xf32> to vector<1x8x8xf32>
    %43 = vector.shape_cast %39 : vector<8x8xf32> to vector<1x8x8xf32>
    %44 = vector.shape_cast %40 : vector<8x8xf32> to vector<1x8x8xf32>
    %45 = tpu.concatenate %41, %42, %43, %44 in 0 : vector<1x8x8xf32>, vector<1x8x8xf32>, vector<1x8x8xf32>, vector<1x8x8xf32> -> vector<4x8x8xf32>
    %46 = arith.truncf %27 : vector<4x8x8xf32> to vector<4x8x8xbf16>
    %47 = arith.truncf %36 : vector<4x8x8xf32> to vector<4x8x8xbf16>
    %cst_10 = arith.constant dense<0.000000e+00> : vector<4x8x8xf32>
    %48 = tpu.matmul %46, %47, %cst_10 {dimension_numbers = #tpu.dot_dimension_numbers<[2], [2], [1], [1], [0, 0, 0, 1, 1, 1], [0], [0]>} : vector<4x8x8xbf16>, vector<4x8x8xbf16>, vector<4x8x8xf32> -> vector<4x8x8xf32>
    %cst_11 = arith.constant 0.353553385 : f32
    %49 = vector.broadcast %cst_11 : f32 to vector<4x8x8xf32>
    %50 = arith.mulf %48, %49 : vector<4x8x8xf32>
    %51 = vector.broadcast %2 : vector<1x8x8xf32> to vector<4x8x8xf32>
    %52 = arith.addf %50, %51 : vector<4x8x8xf32>
    %cst_12 = arith.constant dense<0xFF800000> : vector<4x8xf32>
    %53 = vector.multi_reduction <maximumf>, %52, %cst_12 [2] : vector<4x8x8xf32> to vector<4x8xf32>
    %54 = vector.shape_cast %53 : vector<4x8xf32> to vector<4x8x1xf32>
    %55 = vector.broadcast %54 : vector<4x8x1xf32> to vector<4x8x8xf32>
    %56 = arith.subf %52, %55 : vector<4x8x8xf32>
    %57 = math.exp %56 : vector<4x8x8xf32>
    %cst_13 = arith.constant dense<0.000000e+00> : vector<4x8xf32>
    %58 = vector.multi_reduction <add>, %57, %cst_13 [2] : vector<4x8x8xf32> to vector<4x8xf32>
    %59 = vector.shape_cast %58 : vector<4x8xf32> to vector<4x8x1xf32>
    %60 = tpu.reciprocal %59 {approx = true} : vector<4x8x1xf32> -> vector<4x8x1xf32>
    %61 = vector.broadcast %60 : vector<4x8x1xf32> to vector<4x8x8xf32>
    %62 = arith.mulf %57, %61 : vector<4x8x8xf32>
    %63 = arith.truncf %62 : vector<4x8x8xf32> to vector<4x8x8xbf16>
    %64 = arith.truncf %45 : vector<4x8x8xf32> to vector<4x8x8xbf16>
    %cst_14 = arith.constant dense<0.000000e+00> : vector<4x8x8xf32>
    %65 = tpu.matmul %63, %64, %cst_14 {dimension_numbers = #tpu.dot_dimension_numbers<[2], [1], [1], [2], [0, 0, 0, 1, 1, 2], [0], [0]>} : vector<4x8x8xbf16>, vector<4x8x8xbf16>, vector<4x8x8xf32> -> vector<4x8x8xf32>
    %66 = vector.extract_strided_slice %65 {offsets = [0, 0, 0], sizes = [1, 8, 8], strides = [1, 1, 1]} : vector<4x8x8xf32> to vector<1x8x8xf32>
    %67 = vector.shape_cast %66 : vector<1x8x8xf32> to vector<8x8xf32>
    %68 = vector.extract_strided_slice %65 {offsets = [1, 0, 0], sizes = [1, 8, 8], strides = [1, 1, 1]} : vector<4x8x8xf32> to vector<1x8x8xf32>
    %69 = vector.shape_cast %68 : vector<1x8x8xf32> to vector<8x8xf32>
    %70 = vector.extract_strided_slice %65 {offsets = [2, 0, 0], sizes = [1, 8, 8], strides = [1, 1, 1]} : vector<4x8x8xf32> to vector<1x8x8xf32>
    %71 = vector.shape_cast %70 : vector<1x8x8xf32> to vector<8x8xf32>
    %72 = vector.extract_strided_slice %65 {offsets = [3, 0, 0], sizes = [1, 8, 8], strides = [1, 1, 1]} : vector<4x8x8xf32> to vector<1x8x8xf32>
    %73 = vector.shape_cast %72 : vector<1x8x8xf32> to vector<8x8xf32>
    %74 = tpu.concatenate %67, %69, %71, %73 in 1 : vector<8x8xf32>, vector<8x8xf32>, vector<8x8xf32>, vector<8x8xf32> -> vector<8x32xf32>
    %75 = arith.truncf %74 : vector<8x32xf32> to vector<8x32xbf16>
    %c0_15 = arith.constant 0 : index
    %c0_16 = arith.constant 0 : index
    %76 = vector.load %arg5[%c0_15, %c0_16] : memref<32x32xbf16, #tpu.memory_space<vmem>>, vector<32x32xbf16>
    %cst_17 = arith.constant dense<0.000000e+00> : vector<8x32xf32>
    %77 = tpu.matmul %75, %76, %cst_17 {dimension_numbers = #tpu.dot_dimension_numbers<[1], [0], [0], [1], [0, 0, 1, 1], [], []>} : vector<8x32xbf16>, vector<32x32xbf16>, vector<8x32xf32> -> vector<8x32xf32>
    %c0_18 = arith.constant 0 : index
    %c0_19 = arith.constant 0 : index
    %78 = vector.load %arg6[%c0_18, %c0_19] : memref<1x32xf32, #tpu.memory_space<vmem>>, vector<1x32xf32>
    %79 = vector.broadcast %78 : vector<1x32xf32> to vector<8x32xf32>
    %80 = arith.addf %77, %79 : vector<8x32xf32>
    %81 = arith.addf %1, %80 : vector<8x32xf32>
    %cst_20 = arith.constant dense<0.000000e+00> : vector<8xf32>
    %82 = vector.multi_reduction <add>, %81, %cst_20 [1] : vector<8x32xf32> to vector<8xf32>
    %83 = vector.shape_cast %82 : vector<8xf32> to vector<8x1xf32>
    %cst_21 = arith.constant 3.200000e+01 : f32
    %84 = vector.broadcast %cst_21 : f32 to vector<8x1xf32>
    %85 = arith.divf %83, %84 : vector<8x1xf32>
    %86 = vector.broadcast %85 : vector<8x1xf32> to vector<8x32xf32>
    %87 = arith.subf %81, %86 : vector<8x32xf32>
    %88 = vector.broadcast %85 : vector<8x1xf32> to vector<8x32xf32>
    %89 = arith.subf %81, %88 : vector<8x32xf32>
    %90 = arith.mulf %87, %89 : vector<8x32xf32>
    %cst_22 = arith.constant dense<0.000000e+00> : vector<8xf32>
    %91 = vector.multi_reduction <add>, %90, %cst_22 [1] : vector<8x32xf32> to vector<8xf32>
    %92 = vector.shape_cast %91 : vector<8xf32> to vector<8x1xf32>
    %cst_23 = arith.constant 3.200000e+01 : f32
    %93 = vector.broadcast %cst_23 : f32 to vector<8x1xf32>
    %94 = arith.divf %92, %93 : vector<8x1xf32>
    %95 = vector.broadcast %85 : vector<8x1xf32> to vector<8x32xf32>
    %96 = arith.subf %81, %95 : vector<8x32xf32>
    %cst_24 = arith.constant 9.99999974E-6 : f32
    %97 = vector.broadcast %cst_24 : f32 to vector<8x1xf32>
    %98 = arith.addf %94, %97 : vector<8x1xf32>
    %99 = math.rsqrt %98 : vector<8x1xf32>
    %100 = vector.broadcast %99 : vector<8x1xf32> to vector<8x32xf32>
    %101 = arith.mulf %96, %100 : vector<8x32xf32>
    %c0_25 = arith.constant 0 : index
    %c0_26 = arith.constant 0 : index
    %102 = vector.load %arg7[%c0_25, %c0_26] : memref<1x32xf32, #tpu.memory_space<vmem>>, vector<1x32xf32>
    %103 = vector.broadcast %102 : vector<1x32xf32> to vector<8x32xf32>
    %104 = arith.mulf %101, %103 : vector<8x32xf32>
    %c0_27 = arith.constant 0 : index
    %c0_28 = arith.constant 0 : index
    %105 = vector.load %arg8[%c0_27, %c0_28] : memref<1x32xf32, #tpu.memory_space<vmem>>, vector<1x32xf32>
    %106 = vector.broadcast %105 : vector<1x32xf32> to vector<8x32xf32>
    %107 = arith.addf %104, %106 : vector<8x32xf32>
    %c0_29 = arith.constant 0 : index
    %c0_30 = arith.constant 0 : index
    %c0_31 = arith.constant 0 : index
    %108 = vector.load %arg9[%c0_29, %c0_30, %c0_31] : memref<1x8x32xf32, #tpu.memory_space<vmem>>, vector<1x8x32xf32>
    %109 = vector.shape_cast %108 : vector<1x8x32xf32> to vector<8x32xf32>
    %110 = vector.shape_cast %107 : vector<8x32xf32> to vector<1x8x32xf32>
    tpu.vector_store %arg9[%c0_29, %c0_30, %c0_31], %110 {strides = array<i32>} : memref<1x8x32xf32, #tpu.memory_space<vmem>>, vector<1x8x32xf32>,
    return
  }
  func.func @transform_0(%arg0: i32) -> (i32, i32, i32) {
    %c0_i32 = arith.constant 0 : i32
    %c0_i32_0 = arith.constant 0 : i32
    %c0_i32_1 = arith.constant 0 : i32
    return %arg0, %c0_i32, %c0_i32_0 : i32, i32, i32
  }
  func.func @transform_1(%arg0: i32) -> (i32, i32, i32) {
    %c0_i32 = arith.constant 0 : i32
    %c0_i32_0 = arith.constant 0 : i32
    %c0_i32_1 = arith.constant 0 : i32
    return %arg0, %c0_i32, %c0_i32_0 : i32, i32, i32
  }
  func.func @transform_2(%arg0: i32) -> (i32, i32) {
    %c0_i32 = arith.constant 0 : i32
    %c0_i32_0 = arith.constant 0 : i32
    %c0_i32_1 = arith.constant 0 : i32
    return %c0_i32, %c0_i32_0 : i32, i32
  }
  func.func @transform_3(%arg0: i32) -> (i32, i32) {
    %c0_i32 = arith.constant 0 : i32
    %c0_i32_0 = arith.constant 0 : i32
    %c0_i32_1 = arith.constant 0 : i32
    return %c0_i32, %c0_i32_0 : i32, i32
  }
  func.func @transform_4(%arg0: i32) -> (i32, i32) {
    %c0_i32 = arith.constant 0 : i32
    %c0_i32_0 = arith.constant 0 : i32
    %c0_i32_1 = arith.constant 0 : i32
    return %c0_i32, %c0_i32_0 : i32, i32
  }
  func.func @transform_5(%arg0: i32) -> (i32, i32) {
    %c0_i32 = arith.constant 0 : i32
    %c0_i32_0 = arith.constant 0 : i32
    %c0_i32_1 = arith.constant 0 : i32
    return %c0_i32, %c0_i32_0 : i32, i32
  }
  func.func @transform_6(%arg0: i32) -> (i32, i32) {
    %c0_i32 = arith.constant 0 : i32
    %c0_i32_0 = arith.constant 0 : i32
    %c0_i32_1 = arith.constant 0 : i32
    return %c0_i32, %c0_i32_0 : i32, i32
  }
  func.func @transform_7(%arg0: i32) -> (i32, i32) {
    %c0_i32 = arith.constant 0 : i32
    %c0_i32_0 = arith.constant 0 : i32
    %c0_i32_1 = arith.constant 0 : i32
    return %c0_i32, %c0_i32_0 : i32, i32
  }
  func.func @transform_8(%arg0: i32) -> (i32, i32, i32) {
    %c0_i32 = arith.constant 0 : i32
    %c0_i32_0 = arith.constant 0 : i32
    %c0_i32_1 = arith.constant 0 : i32
    return %arg0, %c0_i32, %c0_i32_0 : i32, i32, i32
  }
}

module attributes {stable_mosaic.version = 11 : i64} {
  func.func @_ffn_ln_kernel(%arg0: i32, %arg1: memref<16x32xf32, #tpu.memory_space<vmem>>, %arg2: memref<32x64xbf16, #tpu.memory_space<vmem>>, %arg3: memref<1x64xf32, #tpu.memory_space<vmem>>, %arg4: memref<64x32xbf16, #tpu.memory_space<vmem>>, %arg5: memref<1x32xf32, #tpu.memory_space<vmem>>, %arg6: memref<1x32xf32, #tpu.memory_space<vmem>>, %arg7: memref<1x32xf32, #tpu.memory_space<vmem>>, %arg8: memref<16x32xf32, #tpu.memory_space<vmem>>) attributes {dimension_semantics = [#tpu.dimension_semantics<parallel>], iteration_bounds = array<i64: 1>, scalar_prefetch = 0 : i64, scratch_operands = 0 : i64, tpu.core_type = #tpu.core_type<tc>, window_params = [{transform_indices = @transform_0, window_bounds = array<i64: 16, 32>}, {pipeline_mode = #tpu.pipeline_mode<synchronous>, transform_indices = @transform_1, window_bounds = array<i64: 32, 64>}, {pipeline_mode = #tpu.pipeline_mode<synchronous>, transform_indices = @transform_2, window_bounds = array<i64: 1, 64>}, {pipeline_mode = #tpu.pipeline_mode<synchronous>, transform_indices = @transform_3, window_bounds = array<i64: 64, 32>}, {pipeline_mode = #tpu.pipeline_mode<synchronous>, transform_indices = @transform_4, window_bounds = array<i64: 1, 32>}, {pipeline_mode = #tpu.pipeline_mode<synchronous>, transform_indices = @transform_5, window_bounds = array<i64: 1, 32>}, {pipeline_mode = #tpu.pipeline_mode<synchronous>, transform_indices = @transform_6, window_bounds = array<i64: 1, 32>}, {transform_indices = @transform_7, window_bounds = array<i64: 16, 32>}]} {
    %c0 = arith.constant 0 : index
    %c0_0 = arith.constant 0 : index
    %0 = vector.load %arg1[%c0, %c0_0] : memref<16x32xf32, #tpu.memory_space<vmem>>, vector<16x32xf32>
    %1 = arith.truncf %0 : vector<16x32xf32> to vector<16x32xbf16>
    %c0_1 = arith.constant 0 : index
    %c0_2 = arith.constant 0 : index
    %2 = vector.load %arg2[%c0_1, %c0_2] : memref<32x64xbf16, #tpu.memory_space<vmem>>, vector<32x64xbf16>
    %cst = arith.constant dense<0.000000e+00> : vector<16x64xf32>
    %3 = tpu.matmul %1, %2, %cst {dimension_numbers = #tpu.dot_dimension_numbers<[1], [0], [0], [1], [0, 0, 1, 1], [], []>} : vector<16x32xbf16>, vector<32x64xbf16>, vector<16x64xf32> -> vector<16x64xf32>
    %c0_3 = arith.constant 0 : index
    %c0_4 = arith.constant 0 : index
    %4 = vector.load %arg3[%c0_3, %c0_4] : memref<1x64xf32, #tpu.memory_space<vmem>>, vector<1x64xf32>
    %5 = vector.broadcast %4 : vector<1x64xf32> to vector<16x64xf32>
    %6 = arith.addf %3, %5 : vector<16x64xf32>
    %cst_5 = arith.constant 0.000000e+00 : f32
    %7 = vector.broadcast %cst_5 : f32 to vector<16x64xf32>
    %8 = arith.maximumf %6, %7 : vector<16x64xf32>
    %9 = arith.truncf %8 : vector<16x64xf32> to vector<16x64xbf16>
    %c0_6 = arith.constant 0 : index
    %c0_7 = arith.constant 0 : index
    %10 = vector.load %arg4[%c0_6, %c0_7] : memref<64x32xbf16, #tpu.memory_space<vmem>>, vector<64x32xbf16>
    %cst_8 = arith.constant dense<0.000000e+00> : vector<16x32xf32>
    %11 = tpu.matmul %9, %10, %cst_8 {dimension_numbers = #tpu.dot_dimension_numbers<[1], [0], [0], [1], [0, 0, 1, 1], [], []>} : vector<16x64xbf16>, vector<64x32xbf16>, vector<16x32xf32> -> vector<16x32xf32>
    %c0_9 = arith.constant 0 : index
    %c0_10 = arith.constant 0 : index
    %12 = vector.load %arg5[%c0_9, %c0_10] : memref<1x32xf32, #tpu.memory_space<vmem>>, vector<1x32xf32>
    %13 = vector.broadcast %12 : vector<1x32xf32> to vector<16x32xf32>
    %14 = arith.addf %11, %13 : vector<16x32xf32>
    %15 = arith.addf %0, %14 : vector<16x32xf32>
    %cst_11 = arith.constant dense<0.000000e+00> : vector<16xf32>
    %16 = vector.multi_reduction <add>, %15, %cst_11 [1] : vector<16x32xf32> to vector<16xf32>
    %17 = vector.shape_cast %16 : vector<16xf32> to vector<16x1xf32>
    %cst_12 = arith.constant 3.200000e+01 : f32
    %18 = vector.broadcast %cst_12 : f32 to vector<16x1xf32>
    %19 = arith.divf %17, %18 : vector<16x1xf32>
    %20 = vector.broadcast %19 : vector<16x1xf32> to vector<16x32xf32>
    %21 = arith.subf %15, %20 : vector<16x32xf32>
    %22 = vector.broadcast %19 : vector<16x1xf32> to vector<16x32xf32>
    %23 = arith.subf %15, %22 : vector<16x32xf32>
    %24 = arith.mulf %21, %23 : vector<16x32xf32>
    %cst_13 = arith.constant dense<0.000000e+00> : vector<16xf32>
    %25 = vector.multi_reduction <add>, %24, %cst_13 [1] : vector<16x32xf32> to vector<16xf32>
    %26 = vector.shape_cast %25 : vector<16xf32> to vector<16x1xf32>
    %cst_14 = arith.constant 3.200000e+01 : f32
    %27 = vector.broadcast %cst_14 : f32 to vector<16x1xf32>
    %28 = arith.divf %26, %27 : vector<16x1xf32>
    %29 = vector.broadcast %19 : vector<16x1xf32> to vector<16x32xf32>
    %30 = arith.subf %15, %29 : vector<16x32xf32>
    %cst_15 = arith.constant 9.99999974E-6 : f32
    %31 = vector.broadcast %cst_15 : f32 to vector<16x1xf32>
    %32 = arith.addf %28, %31 : vector<16x1xf32>
    %33 = math.rsqrt %32 : vector<16x1xf32>
    %34 = vector.broadcast %33 : vector<16x1xf32> to vector<16x32xf32>
    %35 = arith.mulf %30, %34 : vector<16x32xf32>
    %c0_16 = arith.constant 0 : index
    %c0_17 = arith.constant 0 : index
    %36 = vector.load %arg6[%c0_16, %c0_17] : memref<1x32xf32, #tpu.memory_space<vmem>>, vector<1x32xf32>
    %37 = vector.broadcast %36 : vector<1x32xf32> to vector<16x32xf32>
    %38 = arith.mulf %35, %37 : vector<16x32xf32>
    %c0_18 = arith.constant 0 : index
    %c0_19 = arith.constant 0 : index
    %39 = vector.load %arg7[%c0_18, %c0_19] : memref<1x32xf32, #tpu.memory_space<vmem>>, vector<1x32xf32>
    %40 = vector.broadcast %39 : vector<1x32xf32> to vector<16x32xf32>
    %41 = arith.addf %38, %40 : vector<16x32xf32>
    %c0_20 = arith.constant 0 : index
    %c0_21 = arith.constant 0 : index
    %42 = vector.load %arg8[%c0_20, %c0_21] : memref<16x32xf32, #tpu.memory_space<vmem>>, vector<16x32xf32>
    tpu.vector_store %arg8[%c0_20, %c0_21], %41 {strides = array<i32>} : memref<16x32xf32, #tpu.memory_space<vmem>>, vector<16x32xf32>,
    return
  }
  func.func @transform_0(%arg0: i32) -> (i32, i32) {
    %c0_i32 = arith.constant 0 : i32
    %c0_i32_0 = arith.constant 0 : i32
    return %arg0, %c0_i32 : i32, i32
  }
  func.func @transform_1(%arg0: i32) -> (i32, i32) {
    %c0_i32 = arith.constant 0 : i32
    %c0_i32_0 = arith.constant 0 : i32
    %c0_i32_1 = arith.constant 0 : i32
    return %c0_i32, %c0_i32_0 : i32, i32
  }
  func.func @transform_2(%arg0: i32) -> (i32, i32) {
    %c0_i32 = arith.constant 0 : i32
    %c0_i32_0 = arith.constant 0 : i32
    %c0_i32_1 = arith.constant 0 : i32
    return %c0_i32, %c0_i32_0 : i32, i32
  }
  func.func @transform_3(%arg0: i32) -> (i32, i32) {
    %c0_i32 = arith.constant 0 : i32
    %c0_i32_0 = arith.constant 0 : i32
    %c0_i32_1 = arith.constant 0 : i32
    return %c0_i32, %c0_i32_0 : i32, i32
  }
  func.func @transform_4(%arg0: i32) -> (i32, i32) {
    %c0_i32 = arith.constant 0 : i32
    %c0_i32_0 = arith.constant 0 : i32
    %c0_i32_1 = arith.constant 0 : i32
    return %c0_i32, %c0_i32_0 : i32, i32
  }
  func.func @transform_5(%arg0: i32) -> (i32, i32) {
    %c0_i32 = arith.constant 0 : i32
    %c0_i32_0 = arith.constant 0 : i32
    %c0_i32_1 = arith.constant 0 : i32
    return %c0_i32, %c0_i32_0 : i32, i32
  }
  func.func @transform_6(%arg0: i32) -> (i32, i32) {
    %c0_i32 = arith.constant 0 : i32
    %c0_i32_0 = arith.constant 0 : i32
    %c0_i32_1 = arith.constant 0 : i32
    return %c0_i32, %c0_i32_0 : i32, i32
  }
  func.func @transform_7(%arg0: i32) -> (i32, i32) {
    %c0_i32 = arith.constant 0 : i32
    %c0_i32_0 = arith.constant 0 : i32
    return %arg0, %c0_i32 : i32, i32
  }
}

module attributes {stable_mosaic.version = 11 : i64} {
  func.func @_cross_mha_kernel_with_attn(%arg0: i32, %arg1: memref<1x8x32xf32, #tpu.memory_space<vmem>>, %arg2: memref<1x16x32xf32, #tpu.memory_space<vmem>>, %arg3: memref<1x1x16xf32, #tpu.memory_space<vmem>>, %arg4: memref<32x96xbf16, #tpu.memory_space<vmem>>, %arg5: memref<1x96xf32, #tpu.memory_space<vmem>>, %arg6: memref<32x32xbf16, #tpu.memory_space<vmem>>, %arg7: memref<1x32xf32, #tpu.memory_space<vmem>>, %arg8: memref<1x32xf32, #tpu.memory_space<vmem>>, %arg9: memref<1x32xf32, #tpu.memory_space<vmem>>, %arg10: memref<1x8x32xf32, #tpu.memory_space<vmem>>, %arg11: memref<1x4x8x16xf32, #tpu.memory_space<vmem>>) attributes {dimension_semantics = [#tpu.dimension_semantics<parallel>], iteration_bounds = array<i64: 2>, scalar_prefetch = 0 : i64, scratch_operands = 0 : i64, tpu.core_type = #tpu.core_type<tc>, window_params = [{transform_indices = @transform_0, window_bounds = array<i64: 1, 8, 32>}, {transform_indices = @transform_1, window_bounds = array<i64: 1, 16, 32>}, {transform_indices = @transform_2, window_bounds = array<i64: 1, 1, 16>}, {pipeline_mode = #tpu.pipeline_mode<synchronous>, transform_indices = @transform_3, window_bounds = array<i64: 32, 96>}, {pipeline_mode = #tpu.pipeline_mode<synchronous>, transform_indices = @transform_4, window_bounds = array<i64: 1, 96>}, {pipeline_mode = #tpu.pipeline_mode<synchronous>, transform_indices = @transform_5, window_bounds = array<i64: 32, 32>}, {pipeline_mode = #tpu.pipeline_mode<synchronous>, transform_indices = @transform_6, window_bounds = array<i64: 1, 32>}, {pipeline_mode = #tpu.pipeline_mode<synchronous>, transform_indices = @transform_7, window_bounds = array<i64: 1, 32>}, {pipeline_mode = #tpu.pipeline_mode<synchronous>, transform_indices = @transform_8, window_bounds = array<i64: 1, 32>}, {transform_indices = @transform_9, window_bounds = array<i64: 1, 8, 32>}, {transform_indices = @transform_10, window_bounds = array<i64: 1, 4, 8, 16>}]} {
    %c0 = arith.constant 0 : index
    %c0_0 = arith.constant 0 : index
    %c0_1 = arith.constant 0 : index
    %0 = vector.load %arg1[%c0, %c0_0, %c0_1] : memref<1x8x32xf32, #tpu.memory_space<vmem>>, vector<1x8x32xf32>
    %1 = vector.shape_cast %0 : vector<1x8x32xf32> to vector<8x32xf32>
    %c0_2 = arith.constant 0 : index
    %c0_3 = arith.constant 0 : index
    %c0_4 = arith.constant 0 : index
    %2 = vector.load %arg2[%c0_2, %c0_3, %c0_4] : memref<1x16x32xf32, #tpu.memory_space<vmem>>, vector<1x16x32xf32>
    %3 = vector.shape_cast %2 : vector<1x16x32xf32> to vector<16x32xf32>
    %c0_5 = arith.constant 0 : index
    %c0_6 = arith.constant 0 : index
    %c0_7 = arith.constant 0 : index
    %4 = vector.load %arg3[%c0_5, %c0_6, %c0_7] : memref<1x1x16xf32, #tpu.memory_space<vmem>>, vector<1x1x16xf32>
    %c0_8 = arith.constant 0 : index
    %c0_9 = arith.constant 0 : index
    %5 = vector.load %arg4[%c0_8, %c0_9] : memref<32x96xbf16, #tpu.memory_space<vmem>>, vector<32x96xbf16>
    %c0_10 = arith.constant 0 : index
    %c0_11 = arith.constant 0 : index
    %6 = vector.load %arg5[%c0_10, %c0_11] : memref<1x96xf32, #tpu.memory_space<vmem>>, vector<1x96xf32>
    %7 = arith.truncf %1 : vector<8x32xf32> to vector<8x32xbf16>
    %8 = arith.truncf %3 : vector<16x32xf32> to vector<16x32xbf16>
    %9 = vector.extract_strided_slice %5 {offsets = [0, 0], sizes = [32, 32], strides = [1, 1]} : vector<32x96xbf16> to vector<32x32xbf16>
    %cst = arith.constant dense<0.000000e+00> : vector<8x32xf32>
    %10 = tpu.matmul %7, %9, %cst {dimension_numbers = #tpu.dot_dimension_numbers<[1], [0], [0], [1], [0, 0, 1, 1], [], []>} : vector<8x32xbf16>, vector<32x32xbf16>, vector<8x32xf32> -> vector<8x32xf32>
    %11 = vector.extract_strided_slice %6 {offsets = [0, 0], sizes = [1, 32], strides = [1, 1]} : vector<1x96xf32> to vector<1x32xf32>
    %12 = vector.broadcast %11 : vector<1x32xf32> to vector<8x32xf32>
    %13 = arith.addf %10, %12 : vector<8x32xf32>
    %14 = vector.extract_strided_slice %5 {offsets = [0, 32], sizes = [32, 64], strides = [1, 1]} : vector<32x96xbf16> to vector<32x64xbf16>
    %cst_12 = arith.constant dense<0.000000e+00> : vector<16x64xf32>
    %15 = tpu.matmul %8, %14, %cst_12 {dimension_numbers = #tpu.dot_dimension_numbers<[1], [0], [0], [1], [0, 0, 1, 1], [], []>} : vector<16x32xbf16>, vector<32x64xbf16>, vector<16x64xf32> -> vector<16x64xf32>
    %16 = vector.extract_strided_slice %6 {offsets = [0, 32], sizes = [1, 64], strides = [1, 1]} : vector<1x96xf32> to vector<1x64xf32>
    %17 = vector.broadcast %16 : vector<1x64xf32> to vector<16x64xf32>
    %18 = arith.addf %15, %17 : vector<16x64xf32>
    %19 = vector.extract_strided_slice %18 {offsets = [0, 0], sizes = [16, 32], strides = [1, 1]} : vector<16x64xf32> to vector<16x32xf32>
    %20 = vector.extract_strided_slice %18 {offsets = [0, 32], sizes = [16, 32], strides = [1, 1]} : vector<16x64xf32> to vector<16x32xf32>
    %21 = vector.extract_strided_slice %13 {offsets = [0, 0], sizes = [8, 8], strides = [1, 1]} : vector<8x32xf32> to vector<8x8xf32>
    %22 = vector.extract_strided_slice %13 {offsets = [0, 8], sizes = [8, 8], strides = [1, 1]} : vector<8x32xf32> to vector<8x8xf32>
    %23 = vector.extract_strided_slice %13 {offsets = [0, 16], sizes = [8, 8], strides = [1, 1]} : vector<8x32xf32> to vector<8x8xf32>
    %24 = vector.extract_strided_slice %13 {offsets = [0, 24], sizes = [8, 8], strides = [1, 1]} : vector<8x32xf32> to vector<8x8xf32>
    %25 = vector.shape_cast %21 : vector<8x8xf32> to vector<1x8x8xf32>
    %26 = vector.shape_cast %22 : vector<8x8xf32> to vector<1x8x8xf32>
    %27 = vector.shape_cast %23 : vector<8x8xf32> to vector<1x8x8xf32>
    %28 = vector.shape_cast %24 : vector<8x8xf32> to vector<1x8x8xf32>
    %29 = tpu.concatenate %25, %26, %27, %28 in 0 : vector<1x8x8xf32>, vector<1x8x8xf32>, vector<1x8x8xf32>, vector<1x8x8xf32> -> vector<4x8x8xf32>
    %30 = vector.extract_strided_slice %19 {offsets = [0, 0], sizes = [16, 8], strides = [1, 1]} : vector<16x32xf32> to vector<16x8xf32>
    %31 = vector.extract_strided_slice %19 {offsets = [0, 8], sizes = [16, 8], strides = [1, 1]} : vector<16x32xf32> to vector<16x8xf32>
    %32 = vector.extract_strided_slice %19 {offsets = [0, 16], sizes = [16, 8], strides = [1, 1]} : vector<16x32xf32> to vector<16x8xf32>
    %33 = vector.extract_strided_slice %19 {offsets = [0, 24], sizes = [16, 8], strides = [1, 1]} : vector<16x32xf32> to vector<16x8xf32>
    %34 = vector.shape_cast %30 : vector<16x8xf32> to vector<1x16x8xf32>
    %35 = vector.shape_cast %31 : vector<16x8xf32> to vector<1x16x8xf32>
    %36 = vector.shape_cast %32 : vector<16x8xf32> to vector<1x16x8xf32>
    %37 = vector.shape_cast %33 : vector<16x8xf32> to vector<1x16x8xf32>
    %38 = tpu.concatenate %34, %35, %36, %37 in 0 : vector<1x16x8xf32>, vector<1x16x8xf32>, vector<1x16x8xf32>, vector<1x16x8xf32> -> vector<4x16x8xf32>
    %39 = vector.extract_strided_slice %20 {offsets = [0, 0], sizes = [16, 8], strides = [1, 1]} : vector<16x32xf32> to vector<16x8xf32>
    %40 = vector.extract_strided_slice %20 {offsets = [0, 8], sizes = [16, 8], strides = [1, 1]} : vector<16x32xf32> to vector<16x8xf32>
    %41 = vector.extract_strided_slice %20 {offsets = [0, 16], sizes = [16, 8], strides = [1, 1]} : vector<16x32xf32> to vector<16x8xf32>
    %42 = vector.extract_strided_slice %20 {offsets = [0, 24], sizes = [16, 8], strides = [1, 1]} : vector<16x32xf32> to vector<16x8xf32>
    %43 = vector.shape_cast %39 : vector<16x8xf32> to vector<1x16x8xf32>
    %44 = vector.shape_cast %40 : vector<16x8xf32> to vector<1x16x8xf32>
    %45 = vector.shape_cast %41 : vector<16x8xf32> to vector<1x16x8xf32>
    %46 = vector.shape_cast %42 : vector<16x8xf32> to vector<1x16x8xf32>
    %47 = tpu.concatenate %43, %44, %45, %46 in 0 : vector<1x16x8xf32>, vector<1x16x8xf32>, vector<1x16x8xf32>, vector<1x16x8xf32> -> vector<4x16x8xf32>
    %48 = arith.truncf %29 : vector<4x8x8xf32> to vector<4x8x8xbf16>
    %49 = arith.truncf %38 : vector<4x16x8xf32> to vector<4x16x8xbf16>
    %cst_13 = arith.constant dense<0.000000e+00> : vector<4x8x16xf32>
    %50 = tpu.matmul %48, %49, %cst_13 {dimension_numbers = #tpu.dot_dimension_numbers<[2], [2], [1], [1], [0, 0, 0, 1, 1, 1], [0], [0]>} : vector<4x8x8xbf16>, vector<4x16x8xbf16>, vector<4x8x16xf32> -> vector<4x8x16xf32>
    %cst_14 = arith.constant 0.353553385 : f32
    %51 = vector.broadcast %cst_14 : f32 to vector<4x8x16xf32>
    %52 = arith.mulf %50, %51 : vector<4x8x16xf32>
    %53 = vector.broadcast %4 : vector<1x1x16xf32> to vector<4x8x16xf32>
    %54 = arith.addf %52, %53 : vector<4x8x16xf32>
    %cst_15 = arith.constant dense<0xFF800000> : vector<4x8xf32>
    %55 = vector.multi_reduction <maximumf>, %54, %cst_15 [2] : vector<4x8x16xf32> to vector<4x8xf32>
    %56 = vector.shape_cast %55 : vector<4x8xf32> to vector<4x8x1xf32>
    %57 = vector.broadcast %56 : vector<4x8x1xf32> to vector<4x8x16xf32>
    %58 = arith.subf %54, %57 : vector<4x8x16xf32>
    %59 = math.exp %58 : vector<4x8x16xf32>
    %cst_16 = arith.constant dense<0.000000e+00> : vector<4x8xf32>
    %60 = vector.multi_reduction <add>, %59, %cst_16 [2] : vector<4x8x16xf32> to vector<4x8xf32>
    %61 = vector.shape_cast %60 : vector<4x8xf32> to vector<4x8x1xf32>
    %62 = tpu.reciprocal %61 {approx = true} : vector<4x8x1xf32> -> vector<4x8x1xf32>
    %63 = vector.broadcast %62 : vector<4x8x1xf32> to vector<4x8x16xf32>
    %64 = arith.mulf %59, %63 : vector<4x8x16xf32>
    %65 = arith.truncf %64 : vector<4x8x16xf32> to vector<4x8x16xbf16>
    %66 = arith.truncf %47 : vector<4x16x8xf32> to vector<4x16x8xbf16>
    %cst_17 = arith.constant dense<0.000000e+00> : vector<4x8x8xf32>
    %67 = tpu.matmul %65, %66, %cst_17 {dimension_numbers = #tpu.dot_dimension_numbers<[2], [1], [1], [2], [0, 0, 0, 1, 1, 2], [0], [0]>} : vector<4x8x16xbf16>, vector<4x16x8xbf16>, vector<4x8x8xf32> -> vector<4x8x8xf32>
    %68 = vector.extract_strided_slice %67 {offsets = [0, 0, 0], sizes = [1, 8, 8], strides = [1, 1, 1]} : vector<4x8x8xf32> to vector<1x8x8xf32>
    %69 = vector.shape_cast %68 : vector<1x8x8xf32> to vector<8x8xf32>
    %70 = vector.extract_strided_slice %67 {offsets = [1, 0, 0], sizes = [1, 8, 8], strides = [1, 1, 1]} : vector<4x8x8xf32> to vector<1x8x8xf32>
    %71 = vector.shape_cast %70 : vector<1x8x8xf32> to vector<8x8xf32>
    %72 = vector.extract_strided_slice %67 {offsets = [2, 0, 0], sizes = [1, 8, 8], strides = [1, 1, 1]} : vector<4x8x8xf32> to vector<1x8x8xf32>
    %73 = vector.shape_cast %72 : vector<1x8x8xf32> to vector<8x8xf32>
    %74 = vector.extract_strided_slice %67 {offsets = [3, 0, 0], sizes = [1, 8, 8], strides = [1, 1, 1]} : vector<4x8x8xf32> to vector<1x8x8xf32>
    %75 = vector.shape_cast %74 : vector<1x8x8xf32> to vector<8x8xf32>
    %76 = tpu.concatenate %69, %71, %73, %75 in 1 : vector<8x8xf32>, vector<8x8xf32>, vector<8x8xf32>, vector<8x8xf32> -> vector<8x32xf32>
    %77 = arith.truncf %76 : vector<8x32xf32> to vector<8x32xbf16>
    %c0_18 = arith.constant 0 : index
    %c0_19 = arith.constant 0 : index
    %78 = vector.load %arg6[%c0_18, %c0_19] : memref<32x32xbf16, #tpu.memory_space<vmem>>, vector<32x32xbf16>
    %cst_20 = arith.constant dense<0.000000e+00> : vector<8x32xf32>
    %79 = tpu.matmul %77, %78, %cst_20 {dimension_numbers = #tpu.dot_dimension_numbers<[1], [0], [0], [1], [0, 0, 1, 1], [], []>} : vector<8x32xbf16>, vector<32x32xbf16>, vector<8x32xf32> -> vector<8x32xf32>
    %c0_21 = arith.constant 0 : index
    %c0_22 = arith.constant 0 : index
    %80 = vector.load %arg7[%c0_21, %c0_22] : memref<1x32xf32, #tpu.memory_space<vmem>>, vector<1x32xf32>
    %81 = vector.broadcast %80 : vector<1x32xf32> to vector<8x32xf32>
    %82 = arith.addf %79, %81 : vector<8x32xf32>
    %83 = arith.addf %1, %82 : vector<8x32xf32>
    %cst_23 = arith.constant dense<0.000000e+00> : vector<8xf32>
    %84 = vector.multi_reduction <add>, %83, %cst_23 [1] : vector<8x32xf32> to vector<8xf32>
    %85 = vector.shape_cast %84 : vector<8xf32> to vector<8x1xf32>
    %cst_24 = arith.constant 3.200000e+01 : f32
    %86 = vector.broadcast %cst_24 : f32 to vector<8x1xf32>
    %87 = arith.divf %85, %86 : vector<8x1xf32>
    %88 = vector.broadcast %87 : vector<8x1xf32> to vector<8x32xf32>
    %89 = arith.subf %83, %88 : vector<8x32xf32>
    %90 = vector.broadcast %87 : vector<8x1xf32> to vector<8x32xf32>
    %91 = arith.subf %83, %90 : vector<8x32xf32>
    %92 = arith.mulf %89, %91 : vector<8x32xf32>
    %cst_25 = arith.constant dense<0.000000e+00> : vector<8xf32>
    %93 = vector.multi_reduction <add>, %92, %cst_25 [1] : vector<8x32xf32> to vector<8xf32>
    %94 = vector.shape_cast %93 : vector<8xf32> to vector<8x1xf32>
    %cst_26 = arith.constant 3.200000e+01 : f32
    %95 = vector.broadcast %cst_26 : f32 to vector<8x1xf32>
    %96 = arith.divf %94, %95 : vector<8x1xf32>
    %97 = vector.broadcast %87 : vector<8x1xf32> to vector<8x32xf32>
    %98 = arith.subf %83, %97 : vector<8x32xf32>
    %cst_27 = arith.constant 9.99999974E-6 : f32
    %99 = vector.broadcast %cst_27 : f32 to vector<8x1xf32>
    %100 = arith.addf %96, %99 : vector<8x1xf32>
    %101 = math.rsqrt %100 : vector<8x1xf32>
    %102 = vector.broadcast %101 : vector<8x1xf32> to vector<8x32xf32>
    %103 = arith.mulf %98, %102 : vector<8x32xf32>
    %c0_28 = arith.constant 0 : index
    %c0_29 = arith.constant 0 : index
    %104 = vector.load %arg8[%c0_28, %c0_29] : memref<1x32xf32, #tpu.memory_space<vmem>>, vector<1x32xf32>
    %105 = vector.broadcast %104 : vector<1x32xf32> to vector<8x32xf32>
    %106 = arith.mulf %103, %105 : vector<8x32xf32>
    %c0_30 = arith.constant 0 : index
    %c0_31 = arith.constant 0 : index
    %107 = vector.load %arg9[%c0_30, %c0_31] : memref<1x32xf32, #tpu.memory_space<vmem>>, vector<1x32xf32>
    %108 = vector.broadcast %107 : vector<1x32xf32> to vector<8x32xf32>
    %109 = arith.addf %106, %108 : vector<8x32xf32>
    %c0_32 = arith.constant 0 : index
    %c0_33 = arith.constant 0 : index
    %c0_34 = arith.constant 0 : index
    %110 = vector.load %arg10[%c0_32, %c0_33, %c0_34] : memref<1x8x32xf32, #tpu.memory_space<vmem>>, vector<1x8x32xf32>
    %111 = vector.shape_cast %110 : vector<1x8x32xf32> to vector<8x32xf32>
    %112 = vector.shape_cast %109 : vector<8x32xf32> to vector<1x8x32xf32>
    tpu.vector_store %arg10[%c0_32, %c0_33, %c0_34], %112 {strides = array<i32>} : memref<1x8x32xf32, #tpu.memory_space<vmem>>, vector<1x8x32xf32>,
    %c0_35 = arith.constant 0 : index
    %c0_36 = arith.constant 0 : index
    %c0_37 = arith.constant 0 : index
    %c0_38 = arith.constant 0 : index
    %113 = vector.load %arg11[%c0_35, %c0_36, %c0_37, %c0_38] : memref<1x4x8x16xf32, #tpu.memory_space<vmem>>, vector<1x4x8x16xf32>
    %114 = vector.shape_cast %113 : vector<1x4x8x16xf32> to vector<4x8x16xf32>
    %115 = vector.shape_cast %64 : vector<4x8x16xf32> to vector<1x4x8x16xf32>
    tpu.vector_store %arg11[%c0_35, %c0_36, %c0_37, %c0_38], %115 {strides = array<i32>} : memref<1x4x8x16xf32, #tpu.memory_space<vmem>>, vector<1x4x8x16xf32>,
    return
  }
  func.func @transform_0(%arg0: i32) -> (i32, i32, i32) {
    %c0_i32 = arith.constant 0 : i32
    %c0_i32_0 = arith.constant 0 : i32
    %c0_i32_1 = arith.constant 0 : i32
    return %arg0, %c0_i32, %c0_i32_0 : i32, i32, i32
  }
  func.func @transform_1(%arg0: i32) -> (i32, i32, i32) {
    %c0_i32 = arith.constant 0 : i32
    %c0_i32_0 = arith.constant 0 : i32
    %c0_i32_1 = arith.constant 0 : i32
    return %arg0, %c0_i32, %c0_i32_0 : i32, i32, i32
  }
  func.func @transform_2(%arg0: i32) -> (i32, i32, i32) {
    %c0_i32 = arith.constant 0 : i32
    %c0_i32_0 = arith.constant 0 : i32
    %c0_i32_1 = arith.constant 0 : i32
    return %arg0, %c0_i32, %c0_i32_0 : i32, i32, i32
  }
  func.func @transform_3(%arg0: i32) -> (i32, i32) {
    %c0_i32 = arith.constant 0 : i32
    %c0_i32_0 = arith.constant 0 : i32
    %c0_i32_1 = arith.constant 0 : i32
    return %c0_i32, %c0_i32_0 : i32, i32
  }
  func.func @transform_4(%arg0: i32) -> (i32, i32) {
    %c0_i32 = arith.constant 0 : i32
    %c0_i32_0 = arith.constant 0 : i32
    %c0_i32_1 = arith.constant 0 : i32
    return %c0_i32, %c0_i32_0 : i32, i32
  }
  func.func @transform_5(%arg0: i32) -> (i32, i32) {
    %c0_i32 = arith.constant 0 : i32
    %c0_i32_0 = arith.constant 0 : i32
    %c0_i32_1 = arith.constant 0 : i32
    return %c0_i32, %c0_i32_0 : i32, i32
  }
  func.func @transform_6(%arg0: i32) -> (i32, i32) {
    %c0_i32 = arith.constant 0 : i32
    %c0_i32_0 = arith.constant 0 : i32
    %c0_i32_1 = arith.constant 0 : i32
    return %c0_i32, %c0_i32_0 : i32, i32
  }
  func.func @transform_7(%arg0: i32) -> (i32, i32) {
    %c0_i32 = arith.constant 0 : i32
    %c0_i32_0 = arith.constant 0 : i32
    %c0_i32_1 = arith.constant 0 : i32
    return %c0_i32, %c0_i32_0 : i32, i32
  }
  func.func @transform_8(%arg0: i32) -> (i32, i32) {
    %c0_i32 = arith.constant 0 : i32
    %c0_i32_0 = arith.constant 0 : i32
    %c0_i32_1 = arith.constant 0 : i32
    return %c0_i32, %c0_i32_0 : i32, i32
  }
  func.func @transform_9(%arg0: i32) -> (i32, i32, i32) {
    %c0_i32 = arith.constant 0 : i32
    %c0_i32_0 = arith.constant 0 : i32
    %c0_i32_1 = arith.constant 0 : i32
    return %arg0, %c0_i32, %c0_i32_0 : i32, i32, i32
  }
  func.func @transform_10(%arg0: i32) -> (i32, i32, i32, i32) {
    %c0_i32 = arith.constant 0 : i32
    %c0_i32_0 = arith.constant 0 : i32
    %c0_i32_1 = arith.constant 0 : i32
    %c0_i32_2 = arith.constant 0 : i32
    return %arg0, %c0_i32, %c0_i32_0, %c0_i32_1 : i32, i32, i32, i32
  }
}

module attributes {stable_mosaic.version = 11 : i64} {
  func.func @_linear_kernel(%arg0: i32, %arg1: memref<16x32xf32, #tpu.memory_space<vmem>>, %arg2: memref<32x128xbf16, #tpu.memory_space<vmem>>, %arg3: memref<1x128xf32, #tpu.memory_space<vmem>>, %arg4: memref<16x128xf32, #tpu.memory_space<vmem>>) attributes {dimension_semantics = [#tpu.dimension_semantics<parallel>], iteration_bounds = array<i64: 1>, scalar_prefetch = 0 : i64, scratch_operands = 0 : i64, tpu.core_type = #tpu.core_type<tc>, window_params = [{transform_indices = @transform_0, window_bounds = array<i64: 16, 32>}, {pipeline_mode = #tpu.pipeline_mode<synchronous>, transform_indices = @transform_1, window_bounds = array<i64: 32, 128>}, {pipeline_mode = #tpu.pipeline_mode<synchronous>, transform_indices = @transform_2, window_bounds = array<i64: 1, 128>}, {transform_indices = @transform_3, window_bounds = array<i64: 16, 128>}]} {
    %c0 = arith.constant 0 : index
    %c0_0 = arith.constant 0 : index
    %0 = vector.load %arg1[%c0, %c0_0] : memref<16x32xf32, #tpu.memory_space<vmem>>, vector<16x32xf32>
    %1 = arith.truncf %0 : vector<16x32xf32> to vector<16x32xbf16>
    %c0_1 = arith.constant 0 : index
    %c0_2 = arith.constant 0 : index
    %2 = vector.load %arg2[%c0_1, %c0_2] : memref<32x128xbf16, #tpu.memory_space<vmem>>, vector<32x128xbf16>
    %cst = arith.constant dense<0.000000e+00> : vector<16x128xf32>
    %3 = tpu.matmul %1, %2, %cst {dimension_numbers = #tpu.dot_dimension_numbers<[1], [0], [0], [1], [0, 0, 1, 1], [], []>} : vector<16x32xbf16>, vector<32x128xbf16>, vector<16x128xf32> -> vector<16x128xf32>
    %c0_3 = arith.constant 0 : index
    %c0_4 = arith.constant 0 : index
    %4 = vector.load %arg3[%c0_3, %c0_4] : memref<1x128xf32, #tpu.memory_space<vmem>>, vector<1x128xf32>
    %5 = vector.broadcast %4 : vector<1x128xf32> to vector<16x128xf32>
    %6 = arith.addf %3, %5 : vector<16x128xf32>
    %c0_5 = arith.constant 0 : index
    %c0_6 = arith.constant 0 : index
    %7 = vector.load %arg4[%c0_5, %c0_6] : memref<16x128xf32, #tpu.memory_space<vmem>>, vector<16x128xf32>
    tpu.vector_store %arg4[%c0_5, %c0_6], %6 {strides = array<i32>} : memref<16x128xf32, #tpu.memory_space<vmem>>, vector<16x128xf32>,
    return
  }
  func.func @transform_0(%arg0: i32) -> (i32, i32) {
    %c0_i32 = arith.constant 0 : i32
    %c0_i32_0 = arith.constant 0 : i32
    return %arg0, %c0_i32 : i32, i32
  }
  func.func @transform_1(%arg0: i32) -> (i32, i32) {
    %c0_i32 = arith.constant 0 : i32
    %c0_i32_0 = arith.constant 0 : i32
    %c0_i32_1 = arith.constant 0 : i32
    return %c0_i32, %c0_i32_0 : i32, i32
  }
  func.func @transform_2(%arg0: i32) -> (i32, i32) {
    %c0_i32 = arith.constant 0 : i32
    %c0_i32_0 = arith.constant 0 : i32
    %c0_i32_1 = arith.constant 0 : i32
    return %c0_i32, %c0_i32_0 : i32, i32
  }
  func.func @transform_3(%arg0: i32) -> (i32, i32) {
    %c0_i32 = arith.constant 0 : i32
    %c0_i32_0 = arith.constant 0 : i32
    return %arg0, %c0_i32 : i32, i32
  }
}

</mosaic_0001>

<bundles_post_ra>
// kernel: decoder_forward.8
= control target key start
LH: loop header
LB: loop body
LE: loop exit
PB: predicated region body
PF: predicated region fallthrough
CT: control target
= control target key end

     0   :  { %s219_s9 = smov 0   ;;  %s247_s0 = inlined_call_operand.vmem [shape: f32[2,8,32], index: 0, kind: input, shape index: {}]   ;;  %s248_s1 = inlined_call_operand.vmem [shape: f32[8,32], index: 1, kind: input, shape index: {}]   ;;  %s249_s2 = inlined_call_operand.vmem [shape: f32[2,8,32], index: 2, kind: output, shape index: {}]  }
   0x1 LB: > { %s198_s10 = sadd.s32 4294967295, %s221_s9   ;;  %p202_p0 = scmp.ge.s32.totalorder %s221_s9, 1  ;;  %s221_s9 = sphi %s219_s9, %s12_s9  }
   0x2   : > { %p111_p1 = scmp.lt.s32.totalorder %s221_s9, 3 }
   0x4   : > { %p112_p2 = pnand %p202_p0, %p111_p1 }
   0x5   : > { %p131_p3 = scmp.lt.s32.totalorder (!%p112_p2), %s198_s10, 1  ;;  %v141_v1 = vld [vmem:[%s248_s1] sm:$0xff] (!%p112_p2)  ;;  %vm143_vm0 = vcmask (!%p112_p2), 261120  }
   0x6   : > { %115 = sbr.rel (%p112_p2) target bundleno = 22 (0x16), region = 28 }
   0xd   : > { %s251_s10 = smov (!%p131_p3, %s198_s10), 1 }
   0xe   : > { %s203_s11 = sshll.u32 %s251_s10, 3 }
   0xf   : > { %s134_s14 = scalar_lea.vmem %s247_s0, %s203_s11  ;;  %s138_s19 = scalar_lea.vmem %s249_s2, %s203_s11 }
  0x10   : > { %v139_v0 = vld [vmem:[%s134_s14] sm:$0xff] }
  0x11   : > { %v140_v2 = vmul.f32 5.656854, %v139_v0 }
  0x13   : > { %v142_v3 = vadd.f32 %v141_v1, %v140_v2 }
  0x15   : > { %144 = vst.msk [vmem:[%s138_s19] sm:$0xff] %vm143_vm0, %v142_v3 }
  0x16 PF: > { %s12_s9 = sadd.s32 1, %s221_s9  }
  0x17   : > { %p9_p4 = scmp.ge.s32.totalorder %s12_s9, 4  }
  0x19   :  { %11 = sbr.rel (!%p9_p4) target bundleno = 1 (0x1), region = 58 }

// kernel: decoder_forward.11
= control target key start
LH: loop header
LB: loop body
LE: loop exit
PB: predicated region body
PF: predicated region fallthrough
CT: control target
= control target key end

     0   :  { %v290_v0 = vmov 0.0   ;;  %vm291_vm0 = vmmov 0   ;;  %vm53_vm1 = vcmask 261120   ;;  %vm140_vm2 = vcmask 523264   ;;  %s381_s1 = inlined_call_operand.vmem [shape: bf16[32,64], index: 1, kind: input, shape index: {}]   ;;  %s382_s0 = inlined_call_operand.vmem [shape: f32[16,32], index: 0, kind: input, shape index: {}]   ;;  %s383_s3 = inlined_call_operand.vmem [shape: bf16[64,32], index: 3, kind: input, shape index: {}]   ;;  %s384_s2 = inlined_call_operand.vmem [shape: f32[1,64], index: 2, kind: input, shape index: {}]   ;;  %s385_s4 = inlined_call_operand.vmem [shape: f32[1,32], index: 4, kind: input, shape index: {}]   ;;  %s386_s5 = inlined_call_operand.vmem [shape: f32[1,32], index: 5, kind: input, shape index: {}]   ;;  %s387_s6 = inlined_call_operand.vmem [shape: f32[1,32], index: 6, kind: input, shape index: {}]   ;;  %s388_s7 = inlined_call_operand.vmem [shape: f32[16,32], index: 7, kind: output, shape index: {}]  }
   0x1   :  { %258 = vmatprep.subr.bf16.mxu0 %v290_v0  ;;  %v280_v1 = vld [vmem:[%s381_s1] sm:$0xff]   ;;  %262 = vmatprep.mubr.msk.bf16.mxu0 %vm291_vm0, %v290_v0  ;;  %v281_v2 = vld [vmem:[%s381_s1 + $0x8] sm:$0xff]   ;;  %v284_v8 = vld [vmem:[%s383_s3 + $0x10] sm:$0xff]  }
   0x2   :  { %266 = vmatprep.subr.bf16.mxu1 %v290_v0  ;;  %274 = vmatprep.mubr.msk.bf16.mxu1 %vm291_vm0, %v290_v0  ;;  %v27_v3 = vld [vmem:[%s382_s0] sm:$0xff]  ;;  %v28_v4 = vld [vmem:[%s382_s0 + $0x8] sm:$0xff]  ;;  %v285_v9 = vld [vmem:[%s383_s3 + $0x18] sm:$0xff]  }
   0x3   :  { %259 = vmatpush3.bf16.msra.mxu0 %v280_v1  ;;  %v282_v5 = vld [vmem:[%s383_s3] sm:$0xff]   ;;  %v283_v6 = vld [vmem:[%s383_s3 + $0x8] sm:$0xff]   ;;  %v29_v7 = vpack.c.bf16 %v28_v4, %v27_v3 }
   0x4   :  { %260 = vmatprep.subr.bf16.mxu0 %v290_v0  ;;  %267 = vmatpush3.bf16.msra.mxu1 %v282_v5  ;;  %v238_v10 = vld [vmem:[%s384_s2] ss:$0 sm:$0xff] }
   0x5   :  { %268 = vmatprep.subr.bf16.mxu1 %v290_v0  ;;  %v242_v20 = vld [vmem:[%s385_s4] ss:$0 sm:$0xff] }
   0x6   :  { %v248_v48 = vld [vmem:[%s386_s5] ss:$0 sm:$0xff] }
   0x7   :  { %261 = vmatpush3.bf16.msra.mxu0 %v281_v2  ;;  %v249_v50 = vld [vmem:[%s387_s6] ss:$0 sm:$0xff] }
   0x8   :  { %269 = vmatpush3.bf16.msra.mxu1 %v283_v6 }
   0x9   :  { %270 = vmatprep.subr.bf16.mxu1 %v290_v0 }
   0xa   :  { %263 = vmatmul.mubr.msk.bf16.vlgmr.msra.gmra.mrb[0].mxu0 %vm53_vm1, %v29_v7 }
   0xc   :  { %271 = vmatpush3.bf16.msra.mxu1 %v284_v8 }
   0xd   :  { %272 = vmatprep.subr.bf16.mxu1 %v290_v0 }
  0x10   :  { %273 = vmatpush3.bf16.msra.mxu1 %v285_v9 }
  0xdd   :  { %v91_v11 = vpop.f32.mrb[0].mxu0 }
  0xde   :  { %v92_v12 = vadd.f32 %v238_v10, %v91_v11  ;;  %v264_v13 = vpop.f32.mrb[1].mxu0 }
  0xdf   :  { %v94_v14 = vpop.f32.mrb[2].mxu0 }
  0xe0   :  { %v95_v15 = vadd.f32 %v238_v10, %v94_v14  ;;  %v265_v16 = vpop.f32.mrb[3].mxu0  ;;  %v98_v17 = vmax.f32 %v92_v12, 0.0 }
  0xe2   :  { %v99_v18 = vmax.f32 %v95_v15, 0.0 }
  0xe4   :  { %v100_v19 = vpack.c.bf16 %v99_v18, %v98_v17 }
  0xe6   :  { %275 = vmatmul.mubr.msk.bf16.vlgmr.msra.gmra.mrb[0].mxu1 %vm140_vm2, %v100_v19 }
 0x1b9   :  { %v178_v21 = vpop.f32.mrb[0].mxu1 }
 0x1ba   :  { %v179_v22 = vadd.f32 %v242_v20, %v178_v21  ;;  %v276_v23 = vpop.f32.mrb[1].mxu1 }
 0x1bb   :  { %v181_v24 = vpop.f32.mrb[2].mxu1 }
 0x1bc   :  { %v182_v25 = vadd.f32 %v242_v20, %v181_v24  ;;  %v277_v26 = vpop.f32.mrb[3].mxu1  ;;  %v185_v27 = vadd.f32 %v179_v22, %v27_v3 }
 0x1be   :  { %v187_v28 = vsel %vm53_vm1, %v185_v27, 0.0  ;;  %v186_v29 = vadd.f32 %v182_v25, %v28_v4 }
 0x1bf   :  { %188 = vadd.xlane.f32.xlu0 %v187_v28 }
 0x1c0   :  { %v190_v30 = vsel %vm53_vm1, %v186_v29, 0.0 }
 0x1c3   :  { %191 = vadd.xlane.f32.xlu0 %v190_v30 }
 0x24c   :  { %v189_v31 = vpop.xlane.xlu0 %188 }
 0x24d   :  { %v194_v32 = vmul.f32 0.03125, %v189_v31 }
 0x24f   :  { %v196_v33 = vsub.f32 %v185_v27, %v194_v32 }
 0x250   :  { %v192_v34 = vpop.xlane.xlu0 %191 }
 0x251   :  { %v195_v35 = vmul.f32 0.03125, %v192_v34  ;;  %v198_v36 = vmul.f32 %v196_v33, %v196_v33 }
 0x253   :  { %v197_v37 = vsub.f32 %v186_v29, %v195_v35  ;;  %v200_v38 = vsel %vm53_vm1, %v198_v36, 0.0 }
 0x254   :  { %201 = vadd.xlane.f32.xlu1 %v200_v38 }
 0x255   :  { %v199_v39 = vmul.f32 %v197_v37, %v197_v37 }
 0x257   :  { %v203_v40 = vsel %vm53_vm1, %v199_v39, 0.0 }
 0x258   :  { %204 = vadd.xlane.f32.xlu1 %v203_v40 }
 0x2e1   :  { %v202_v41 = vpop.xlane.xlu1 %201 }
 0x2e2   :  { %v206_v42 = vmul.f32 0.03125, %v202_v41 }
 0x2e4   :  { %v208_v43 = vadd.f32 1e-05, %v206_v42 }
 0x2e5   :  { %v205_v44 = vpop.xlane.xlu1 %204 }
 0x2e6   :  { %286 = vrsqrt.f32 %v208_v43  ;;  %v207_v45 = vmul.f32 0.03125, %v205_v44 }
 0x2e8   :  { %v209_v46 = vadd.f32 1e-05, %v207_v45 }
 0x2ea   :  { %288 = vrsqrt.f32 %v209_v46 }
 0x2f0   :  { %v287_v47 = vpop.eup %286 }
 0x2f1   :  { %v212_v49 = vmul.f32 %v287_v47, %v196_v33 }
 0x2f3   :  { %v221_v51 = vmul.f32 %v248_v48, %v212_v49 }
 0x2f4   :  { %v289_v52 = vpop.eup %288 }
 0x2f5   :  { %v230_v53 = vadd.f32 %v249_v50, %v221_v51  ;;  %v213_v54 = vmul.f32 %v289_v52, %v197_v37 }
 0x2f7   :  { %232 = vst.msk [vmem:[%s388_s7] sm:$0xff] %vm53_vm1, %v230_v53  ;;  %v222_v55 = vmul.f32 %v248_v48, %v213_v54 }
 0x2f9   :  { %v231_v56 = vadd.f32 %v249_v50, %v222_v55 }
 0x2fb   :  { %233 = vst.msk [vmem:[%s388_s7 + $0x8] sm:$0xff] %vm53_vm1, %v231_v56 }

// kernel: decoder_forward.10
= control target key start
LH: loop header
LB: loop body
LE: loop exit
PB: predicated region body
PF: predicated region fallthrough
CT: control target
= control target key end

     0   :  { %s1402_s30 = smov 0   ;;  %s1546_s0 = inlined_call_operand.vmem [shape: f32[2,8,32], index: 0, kind: input, shape index: {}]   ;;  %s1547_s1 = inlined_call_operand.vmem [shape: f32[2,16,32], index: 1, kind: input, shape index: {}]   ;;  %s1548_s2 = inlined_call_operand.vmem [shape: f32[2,1,16], index: 2, kind: input, shape index: {}]   ;;  %s1549_s3 = inlined_call_operand.vmem [shape: bf16[32,96], index: 3, kind: input, shape index: {}]   ;;  %s1550_s4 = inlined_call_operand.vmem [shape: f32[1,96], index: 4, kind: input, shape index: {}]   ;;  %s1551_s5 = inlined_call_operand.vmem [shape: bf16[32,32], index: 5, kind: input, shape index: {}]   ;;  %s1552_s6 = inlined_call_operand.vmem [shape: f32[1,32], index: 6, kind: input, shape index: {}]   ;;  %s1553_s7 = inlined_call_operand.vmem [shape: f32[1,32], index: 7, kind: input, shape index: {}]   ;;  %s1554_s8 = inlined_call_operand.vmem [shape: f32[1,32], index: 8, kind: input, shape index: {}]   ;;  %s1555_s9 = inlined_call_operand.vmem [shape: f32[2,8,32], index: 9, kind: output, shape index: {}]  }
   0x1 LB: > { %s1152_s10 = sadd.s32 4294967295, %s1341_s30   ;;  %p1156_p0 = scmp.ge.s32.totalorder %s1341_s30, 1  ;;  %s1341_s30 = sphi %s1402_s30, %s19_s30  }
   0x2   : > { %p304_p1 = scmp.lt.s32.totalorder %s1341_s30, 3 }
   0x4   : > { %p305_p2 = pnand %p1156_p0, %p304_p1 }
   0x5   : > { %v1313_v0 = vld [vmem:[%s1549_s3] sm:$0xff] (!%p305_p2)   ;;  %s1343_s13 = smov (!%p305_p2), 96   ;;  %v1314_v1 = vld [vmem:[%s1549_s3 + $0x8] sm:$0xff] (!%p305_p2)   ;;  %v1344_v2 = vmov (!%p305_p2), 0.0   ;;  %p346_p3 = scmp.lt.s32.totalorder (!%p305_p2), %s1152_s10, 1  ;;  %vm1345_vm0 = vmmov (!%p305_p2), 0  }
   0x6   : > { %308 = sbr.rel (%p305_p2) target bundleno = 1873 (0x751), region = 56  ;;  %436 = vrot.lane.b32.xlu0 (!%p305_p2), %v1313_v0, %s1343_s13  ;;  %1217 = vmatprep.subr.bf16.mxu1 (!%p305_p2), %v1344_v2  ;;  %v1161_v3 = vld [vmem:[%s1550_s4] ss:$0 sm:$0xff] (!%p305_p2)  ;;  %vm392_vm1 = vcmask (!%p305_p2), 261120   ;;  %vm527_vm2 = vcmask (!%p305_p2), 64512   ;;  %s1346_s26 = smov (!%p305_p2), 112  }
   0x7   : > { %1221 = vmatprep.mubr.msk.bf16.mxu1 (!%p305_p2), %vm1345_vm0, %v1344_v2  ;;  %1209 = vmatprep.subr.bf16.mxu0 (!%p305_p2), %v1344_v2  ;;  %s1347_s27 = smov (!%p305_p2), 120   ;;  %s1348_s28 = smov (!%p305_p2), 104   ;;  %vm726_vm3 = vcmask (!%p305_p2), 130048   ;;  %vm977_vm4 = vcmask (!%p305_p2), 195584  }
   0x8   : > { %1210 = vmatpush3.bf16.msra.mxu0 (!%p305_p2), %v1313_v0  ;;  %1213 = vmatprep.mubr.msk.bf16.mxu0 (!%p305_p2), %vm1345_vm0, %v1344_v2  ;;  %s1349_s17 = smov (!%p305_p2), 8   ;;  %s1350_s19 = smov (!%p305_p2), 16  }
   0x9   : > { %1211 = vmatprep.subr.bf16.mxu0 (!%p305_p2), %v1344_v2  ;;  %442 = vrot.lane.b32.xlu1 (!%p305_p2), %v1161_v3, %s1343_s13  ;;  %s1351_s20 = smov (!%p305_p2), 24  }
   0xa   : > { %438 = vrot.lane.b32.xlu0 (!%p305_p2), %v1314_v1, %s1343_s13 }
   0xc   : > { %1212 = vmatpush3.bf16.msra.mxu0 (!%p305_p2), %v1314_v1 }
   0xd   : > { %s1557_s10 = smov (!%p346_p3, %s1152_s10), 1  ;;  %1225 = vmatprep.subr.bf16.mxu0 %v1344_v2 }
   0xe   : > { %s1157_s18 = sshll.u32 %s1557_s10, 3  ;;  %s1183_s22 = sshll.u32 %s1557_s10, 4 }
   0xf   : > { %s349_s21 = scalar_lea.vmem %s1546_s0, %s1157_s18  ;;  %s354_s25 = scalar_lea.vmem %s1547_s1, %s1183_s22 }
  0x10   : > { %v1437_v4 = vld [vmem:[%s349_s21] sm:$0xff]  ;;  %v365_v8 = vld [vmem:[%s354_s25 + $0x8] sm:$0xff]  ;;  %s357_s12 = scalar_lea.vmem %s1548_s2, %s1557_s10  ;;  %s361_s29 = scalar_lea.vmem %s1555_s9, %s1157_s18 }
  0x11   : > { %v372_v5 = vpack.c.bf16 %v1437_v4, %v1437_v4  ;;  %v364_v7 = vld [vmem:[%s354_s25] sm:$0xff] }
  0x12   : > { %v373_v10 = vpack.c.bf16 %v365_v8, %v364_v7  ;;  %v1170_v49 = vld [vmem:[%s357_s12] ss:$0 sm:$0xff] }
  0x13   : > { %1214 = vmatmul.mubr.msk.bf16.vlgmr.msra.gmra.mrb[0].mxu0 %vm392_vm1, %v372_v5 }
  0x14   : > { %1227 = vmatprep.mubr.msk.bf16.mxu0 %vm1345_vm0, %v1344_v2 }
  0x78   : > { %v437_v6 = vpop.permute.xlu0 %436 }
  0x79   : > { %1218 = vmatpush3.bf16.msra.mxu1 %v437_v6 }
  0x7a   : > { %1219 = vmatprep.subr.bf16.mxu1 %v1344_v2 }
  0x7b   : > { %v443_v15 = vpop.permute.xlu1 %442 }
  0x7c   : > { %v439_v9 = vpop.permute.xlu0 %438 }
  0x7d   : > { %1220 = vmatpush3.bf16.msra.mxu1 %v439_v9 }
  0x7e   : > { %1231 = vmatprep.subr.bf16.mxu1 %v1344_v2 }
  0x80   : > { %1222 = vmatmul.mubr.msk.bf16.vlgmr.msra.gmra.mrb[0].mxu1 %vm392_vm1, %v373_v10 }
  0x81   : > { %1233 = vmatprep.mubr.msk.bf16.mxu1 %vm1345_vm0, %v1344_v2 }
  0xe6   : > { %v430_v11 = vpop.f32.mrb[0].mxu0 }
  0xe7   : > { %v1215_v12 = vpop.f32.mrb[1].mxu0  ;;  %v431_v25 = vadd.f32 %v1161_v3, %v430_v11 }
  0xe8   : > { %v433_v13 = vpop.f32.mrb[2].mxu0 }
  0xe9   : > { %v1216_v14 = vpop.f32.mrb[3].mxu0  ;;  %v519_v26 = vpack.c.bf16 %v431_v25, %v431_v25 }
 0x153   : > { %v482_v16 = vpop.f32.mrb[0].mxu1 }
 0x154   : > { %v1223_v17 = vpop.f32.mrb[1].mxu1  ;;  %v483_v19 = vadd.f32 %v482_v16, %v443_v15 }
 0x155   : > { %v485_v18 = vpop.f32.mrb[2].mxu1 }
 0x156   : > { %v486_v20 = vadd.f32 %v485_v18, %v443_v15  ;;  %v1224_v21 = vpop.f32.mrb[3].mxu1 }
 0x158   : > { %v1303_v22 = vpack.i.bf16 %v486_v20, %v483_v19  ;;  %v1454_v23 = vpack.c.bf16 %v486_v20, %v483_v19 }
 0x15a   : > { %1304 = vrot.lane.b32.xlu0 %v1303_v22, %s1346_s26  ;;  %1299 = vrot.lane.b32.xlu1 %v1303_v22, %s1347_s27  ;;  %v532_v24 = vsel %vm527_vm2, %v1454_v23, 0 }
 0x15b   : > { %1226 = vmatpush3.bf16.xpose.msra.mxu0 %v532_v24 }
 0x15c   : > { %1237 = vmatprep.subr.bf16.mxu0 %v1344_v2 }
 0x15e   : > { %1309 = vrot.lane.b32.xlu0 %v1303_v22, %s1348_s28  ;;  %490 = vrot.lane.b32.xlu1 %v431_v25, %s1347_s27 }
 0x162   : > { %1228 = vmatmul.mubr.msk.bf16.vlgmr.msra.gmra.mrb[4].mxu0 %vm527_vm2, %v519_v26  ;;  %493 = vrot.lane.b32.xlu1 %v431_v25, %s1346_s26 }
 0x163   : > { %496 = vrot.lane.b32.xlu0 %v431_v25, %s1348_s28  ;;  %1239 = vmatprep.mubr.msk.bf16.mxu0 %vm1345_vm0, %v1344_v2 }
 0x1cc   : > { %v1305_v27 = vpop.permute.xlu0 %1304  ;;  %v1300_v28 = vpop.permute.xlu1 %1299 }
 0x1cd   : > { %v1307_v29 = vunpack.i.h.bf16 %v1305_v27  ;;  %v1306_v30 = vunpack.i.l.bf16 %v1305_v27  ;;  %v1302_v31 = vunpack.i.h.bf16 %v1300_v28  ;;  %v1301_v32 = vunpack.i.l.bf16 %v1300_v28 }
 0x1cf   : > { %v1462_v33 = vpack.c.bf16 %v1307_v29, %v1306_v30  ;;  %v524_v34 = vpack.c.bf16 %v1302_v31, %v1301_v32 }
 0x1d0   : > { %v1310_v35 = vpop.permute.xlu0 %1309  ;;  %v491_v36 = vpop.permute.xlu1 %490 }
 0x1d1   : > { %v1312_v37 = vunpack.i.h.bf16 %v1310_v35  ;;  %v1311_v38 = vunpack.i.l.bf16 %v1310_v35  ;;  %v578_v39 = vsel %vm527_vm2, %v524_v34, 0  ;;  %v624_v40 = vsel %vm527_vm2, %v1462_v33, 0 }
 0x1d2   : > { %1232 = vmatpush3.bf16.xpose.msra.mxu1 %v578_v39  ;;  %1238 = vmatpush3.bf16.xpose.msra.mxu0 %v624_v40  ;;  %v520_v43 = vpack.c.bf16 %v491_v36, %v491_v36 }
 0x1d3   : > { %1243 = vmatprep.subr.bf16.mxu1 %v1344_v2  ;;  %1249 = vmatprep.subr.bf16.mxu0 %v1344_v2  ;;  %v1469_v42 = vpack.c.bf16 %v1312_v37, %v1311_v38 }
 0x1d4   : > { %v494_v41 = vpop.permute.xlu1 %493 }
 0x1d5   : > { %v521_v44 = vpack.c.bf16 %v494_v41, %v494_v41  ;;  %v670_v45 = vsel %vm527_vm2, %v1469_v42, 0  ;;  %v497_v46 = vpop.permute.xlu0 %496 }
 0x1d6   : > { %v522_v47 = vpack.c.bf16 %v497_v46, %v497_v46 }
 0x1d9   : > { %1234 = vmatmul.mubr.msk.bf16.vlgmr.msra.gmra.mrb[4].mxu1 %vm527_vm2, %v520_v43  ;;  %1240 = vmatmul.mubr.msk.bf16.vlgmr.msra.gmra.mrb[8].mxu0 %vm527_vm2, %v521_v44 }
 0x1da   : > { %1244 = vmatpush3.bf16.xpose.msra.mxu1 %v670_v45  ;;  %1245 = vmatprep.mubr.msk.bf16.mxu1 %vm1345_vm0, %v1344_v2 }
 0x1db   : > { %1255 = vmatprep.subr.bf16.mxu1 %v1344_v2  ;;  %1251 = vmatprep.mubr.msk.bf16.mxu0 %vm1345_vm0, %v1344_v2 }
 0x1e1   : > { %1246 = vmatmul.mubr.msk.bf16.vlgmr.msra.gmra.mrb[8].mxu1 %vm527_vm2, %v522_v47 }
 0x1e2   : > { %1257 = vmatprep.mubr.msk.bf16.mxu1 %vm1345_vm0, %v1344_v2 }
 0x235   : > { %v568_v48 = vpop.f32.mrb[4].mxu0 }
 0x236   : > { %v712_v50 = vmul.f32 0.35355338, %v568_v48  ;;  %v1229_v51 = vpop.f32.mrb[5].mxu0 }
 0x237   : > { %v571_v52 = vpop.f32.mrb[6].mxu0 }
 0x238   : > { %v1230_v53 = vpop.f32.mrb[7].mxu0  ;;  %v722_v54 = vadd.f32 %v1170_v49, %v712_v50 }
 0x23a   : > { %v727_v55 = vsel %vm726_vm3, %v722_v54, -inf }
 0x23b   : > { %728 = vmax.xlane.f32.xlu1 %v727_v55 }
 0x2ac   : > { %v614_v56 = vpop.f32.mrb[4].mxu1  ;;  %v660_v58 = vpop.f32.mrb[8].mxu0 }
 0x2ad   : > { %v713_v57 = vmul.f32 0.35355338, %v614_v56  ;;  %v1235_v59 = vpop.f32.mrb[5].mxu1  ;;  %v714_v60 = vmul.f32 0.35355338, %v660_v58  ;;  %v1241_v61 = vpop.f32.mrb[9].mxu0 }
 0x2ae   : > { %v617_v62 = vpop.f32.mrb[6].mxu1  ;;  %v663_v63 = vpop.f32.mrb[10].mxu0  ;;  %v1315_v59 = vld [vmem:[%s1551_s5] sm:$0xff]  }
 0x2af   : > { %v1236_v0 = vpop.f32.mrb[7].mxu1  ;;  %v723_v1 = vadd.f32 %v1170_v49, %v713_v57  ;;  %v1242_v3 = vpop.f32.mrb[11].mxu0  ;;  %v724_v6 = vadd.f32 %v1170_v49, %v714_v60  ;;  %v1316_v60 = vld [vmem:[%s1551_s5 + $0x8] sm:$0xff]  }
 0x2b1   : > { %v730_v5 = vsel %vm726_vm3, %v723_v1, -inf  ;;  %v733_v10 = vsel %vm726_vm3, %v724_v6, -inf }
 0x2b2   : > { %731 = vmax.xlane.f32.xlu0 %v730_v5 }
 0x2b4   : > { %v706_v7 = vpop.f32.mrb[8].mxu1 }
 0x2b5   : > { %v715_v8 = vmul.f32 0.35355338, %v706_v7  ;;  %v1247_v9 = vpop.f32.mrb[9].mxu1 }
 0x2b6   : > { %v709_v11 = vpop.f32.mrb[10].mxu1  ;;  %734 = vmax.xlane.f32.xlu0 %v733_v10 }
 0x2b7   : > { %v1248_v12 = vpop.f32.mrb[11].mxu1  ;;  %v725_v13 = vadd.f32 %v1170_v49, %v715_v8 }
 0x2b9   : > { %v736_v14 = vsel %vm726_vm3, %v725_v13, -inf }
 0x2ba   : > { %737 = vmax.xlane.f32.xlu1 %v736_v14 }
 0x2c8   : > { %v729_v15 = vpop.xlane.xlu1 %728 }
 0x2c9   : > { %v739_v16 = vsub.f32 %v722_v54, %v729_v15 }
 0x2cb   : > { %823 = vrot.lane.b32.xlu1 %v524_v34, %s1343_s13  ;;  %v743_v17 = vmul.f32 1.442695, %v739_v16 }
 0x2cc   : > { %776 = vrot.lane.b32.xlu0 %v1454_v23, %s1343_s13 }
 0x2cd   : > { %1317 = vpow2.f32 %v743_v17  ;;  %v1175_v17 = vld [vmem:[%s1552_s6] ss:$0 sm:$0xff] }
 0x2d7   : > { %v1318_v18 = vpop.eup %1317 }
 0x2d8   : > { %v751_v19 = vsel %vm726_vm3, %v1318_v18, 0.0 }
 0x2eb   : > { %752 = vadd.xlane.f32.xlu0 %v751_v19 }
 0x33f   : > { %v732_v20 = vpop.xlane.xlu0 %731 }
 0x340   : > { %v740_v21 = vsub.f32 %v723_v1, %v732_v20 }
 0x342   : > { %v745_v22 = vmul.f32 1.442695, %v740_v21 }
 0x343   : > { %v735_v24 = vpop.xlane.xlu0 %734 }
 0x344   : > { %1319 = vpow2.f32 %v745_v22  ;;  %v741_v25 = vsub.f32 %v724_v6, %v735_v24 }
 0x346   : > { %v747_v26 = vmul.f32 1.442695, %v741_v25 }
 0x347   : > { %v738_v27 = vpop.xlane.xlu1 %737  ;;  %v777_v28 = vpop.permute.xlu0 %776 }
 0x348   : > { %1321 = vpow2.f32 %v747_v26  ;;  %v742_v29 = vsub.f32 %v725_v13, %v738_v27  ;;  %1250 = vmatpush3.bf16.msra.mxu0 %v777_v28 }
 0x349   : > { %1261 = vmatprep.subr.bf16.mxu0 %v1344_v2 }
 0x34a   : > { %v749_v23 = vmul.f32 1.442695, %v742_v29 }
 0x34b   : > { %v824_v30 = vpop.permute.xlu1 %823 }
 0x34c   : > { %1323 = vpow2.f32 %v749_v23  ;;  %1256 = vmatpush3.bf16.msra.mxu1 %v824_v30 }
 0x34d   : > { %1267 = vmatprep.subr.bf16.mxu1 %v1344_v2 }
 0x34e   : > { %v1320_v31 = vpop.eup %1319 }
 0x34f   : > { %v754_v32 = vsel %vm726_vm3, %v1320_v31, 0.0 }
 0x350   : > { %755 = vadd.xlane.f32.xlu1 %v754_v32 }
 0x352   : > { %v1322_v34 = vpop.eup %1321 }
 0x353   : > { %v757_v35 = vsel %vm726_vm3, %v1322_v34, 0.0 }
 0x354   : > { %758 = vadd.xlane.f32.xlu0 %v757_v35 }
 0x356   : > { %v1324_v36 = vpop.eup %1323 }
 0x357   : > { %v760_v37 = vsel %vm726_vm3, %v1324_v36, 0.0 }
 0x358   : > { %761 = vadd.xlane.f32.xlu1 %v760_v37 }
 0x369   : > { %870 = vrot.lane.b32.xlu1 %v1462_v33, %s1343_s13 }
 0x36a   : > { %917 = vrot.lane.b32.xlu0 %v1469_v42, %s1343_s13 }
 0x378   : > { %v753_v38 = vpop.xlane.xlu0 %752 }
 0x379   : > { %1325 = vrcp.f32 %v753_v38 }
 0x383   : > { %v1326_v39 = vpop.eup %1325 }
 0x384   : > { %v767_v40 = vmul.f32 %v1326_v39, %v1318_v18 }
 0x386   : > { %v771_v41 = vpack.c.bf16 %v767_v40, %v767_v40 }
 0x388   : > { %1252 = vmatmul.mubr.msk.bf16.vlgmr.msra.gmra.mrb[12].mxu0 %vm726_vm3, %v771_v41 }
 0x389   : > { %1263 = vmatprep.mubr.msk.bf16.mxu0 %vm1345_vm0, %v1344_v2 }
 0x3dd   : > { %v756_v43 = vpop.xlane.xlu1 %755 }
 0x3de   : > { %1327 = vrcp.f32 %v756_v43 }
 0x3e1   : > { %v759_v44 = vpop.xlane.xlu0 %758 }
 0x3e2   : > { %1329 = vrcp.f32 %v759_v44 }
 0x3e5   : > { %v762_v45 = vpop.xlane.xlu1 %761  ;;  %v918_v50 = vpop.permute.xlu0 %917 }
 0x3e6   : > { %1331 = vrcp.f32 %v762_v45 }
 0x3e8   : > { %v1328_v33 = vpop.eup %1327 }
 0x3e9   : > { %v768_v46 = vmul.f32 %v1328_v33, %v1320_v31  ;;  %v871_v47 = vpop.permute.xlu1 %870 }
 0x3ea   : > { %1262 = vmatpush3.bf16.msra.mxu0 %v871_v47 }
 0x3eb   : > { %v772_v42 = vpack.c.bf16 %v768_v46, %v768_v46  ;;  %1273 = vmatprep.subr.bf16.mxu0 %v1344_v2 }
 0x3ec   : > { %v1330_v48 = vpop.eup %1329 }
 0x3ed   : > { %v769_v49 = vmul.f32 %v1330_v48, %v1322_v34  ;;  %1258 = vmatmul.mubr.msk.bf16.vlgmr.msra.gmra.mrb[12].mxu1 %vm726_vm3, %v772_v42 }
 0x3ee   : > { %1268 = vmatpush3.bf16.msra.mxu1 %v918_v50  ;;  %1269 = vmatprep.mubr.msk.bf16.mxu1 %vm1345_vm0, %v1344_v2 }
 0x3ef   : > { %v773_v51 = vpack.c.bf16 %v769_v49, %v769_v49 }
 0x3f0   : > { %v1332_v52 = vpop.eup %1331 }
 0x3f1   : > { %v770_v53 = vmul.f32 %v1332_v52, %v1324_v36  ;;  %1264 = vmatmul.mubr.msk.bf16.vlgmr.msra.gmra.mrb[16].mxu0 %vm726_vm3, %v773_v51  ;;  %v1180_v36 = vld [vmem:[%s1554_s8] ss:$0 sm:$0xff] }
 0x3f2   : > { %1277 = vmatprep.mubr.msk.bf16.mxu0 %vm1345_vm0, %v1344_v2  ;;  %1274 = vmatpush3.bf16.msra.mxu0 %v1315_v59 }
 0x3f3   : > { %v774_v54 = vpack.c.bf16 %v770_v53, %v770_v53  ;;  %1275 = vmatprep.subr.bf16.mxu0 %v1344_v2 }
 0x3f5   : > { %1270 = vmatmul.mubr.msk.bf16.vlgmr.msra.gmra.mrb[16].mxu1 %vm726_vm3, %v774_v54 }
 0x3f6   : > { %1276 = vmatpush3.bf16.msra.mxu0 %v1316_v60 }
 0x45b   : > { %v816_v55 = vpop.f32.mrb[12].mxu0 }
 0x45c   : > { %v1253_v56 = vpop.f32.mrb[13].mxu0 }
 0x45d   : > { %v819_v57 = vpop.f32.mrb[14].mxu0 }
 0x45e   : > { %v1254_v58 = vpop.f32.mrb[15].mxu0 }
 0x4c0   : > { %v863_v61 = vpop.f32.mrb[12].mxu1 }
 0x4c1   : > { %964 = vrot.lane.b32.xlu1 %v863_v61, %s1349_s17  ;;  %v1259_v62 = vpop.f32.mrb[13].mxu1 }
 0x4c2   : > { %v866_v63 = vpop.f32.mrb[14].mxu1 }
 0x4c3   : > { %v1260_v0 = vpop.f32.mrb[15].mxu1 }
 0x4c4   : > { %v910_v1 = vpop.f32.mrb[16].mxu0 }
 0x4c5   : > { %968 = vrot.lane.b32.xlu0 %v910_v1, %s1350_s19  ;;  %v1265_v3 = vpop.f32.mrb[17].mxu0 }
 0x4c6   : > { %v913_v5 = vpop.f32.mrb[18].mxu0 }
 0x4c7   : > { %v1266_v6 = vpop.f32.mrb[19].mxu0 }
 0x4c8   : > { %v957_v7 = vpop.f32.mrb[16].mxu1 }
 0x4c9   : > { %972 = vrot.lane.b32.xlu1 %v957_v7, %s1351_s20  ;;  %v1271_v2 = vpop.f32.mrb[17].mxu1 }
 0x4ca   : > { %v960_v8 = vpop.f32.mrb[18].mxu1 }
 0x4cb   : > { %v1272_v9 = vpop.f32.mrb[19].mxu1 }
 0x533   : > { %v965_v10 = vpop.permute.xlu1 %964 }
 0x534   : > { %v975_v12 = vsel %vm527_vm2, %v816_v55, %v965_v10 }
 0x537   : > { %v969_v11 = vpop.permute.xlu0 %968 }
 0x538   : > { %v976_v13 = vsel %vm726_vm3, %v975_v12, %v969_v11 }
 0x53b   : > { %v973_v14 = vpop.permute.xlu1 %972 }
 0x53c   : > { %v978_v15 = vsel %vm977_vm4, %v976_v13, %v973_v14 }
 0x53d   : > { %v979_v16 = vpack.c.bf16 %v978_v15, %v978_v15 }
 0x53f   : > { %1278 = vmatmul.mubr.msk.bf16.vlgmr.msra.gmra.mrb[20].mxu0 %vm392_vm1, %v979_v16 }
 0x612   : > { %v1040_v18 = vpop.f32.mrb[20].mxu0 }
 0x613   : > { %v1041_v19 = vadd.f32 %v1175_v17, %v1040_v18  ;;  %v1279_v20 = vpop.f32.mrb[21].mxu0 }
 0x614   : > { %v1043_v21 = vpop.f32.mrb[22].mxu0 }
 0x615   : > { %v1280_v22 = vpop.f32.mrb[23].mxu0  ;;  %v1046_v24 = vadd.f32 %v1041_v19, %v1437_v4  ;;  %v1179_v4 = vld [vmem:[%s1553_s7] ss:$0 sm:$0xff] }
 0x617   : > { %v1047_v25 = vsel %vm392_vm1, %v1046_v24, 0.0 }
 0x618   : > { %1048 = vadd.xlane.f32.xlu0 %v1047_v25 }
 0x6a5   : > { %v1049_v26 = vpop.xlane.xlu0 %1048 }
 0x6a6   : > { %v1051_v27 = vmul.f32 0.03125, %v1049_v26 }
 0x6a8   : > { %v1052_v28 = vsub.f32 %v1046_v24, %v1051_v27 }
 0x6aa   : > { %v1053_v29 = vmul.f32 %v1052_v28, %v1052_v28 }
 0x6ac   : > { %v1054_v23 = vsel %vm392_vm1, %v1053_v29, 0.0 }
 0x6ad   : > { %1055 = vadd.xlane.f32.xlu1 %v1054_v23 }
 0x73a   : > { %v1056_v30 = vpop.xlane.xlu1 %1055 }
 0x73b   : > { %v1057_v31 = vmul.f32 0.03125, %v1056_v30 }
 0x73d   : > { %v1058_v32 = vadd.f32 1e-05, %v1057_v31 }
 0x73f   : > { %1333 = vrsqrt.f32 %v1058_v32 }
 0x749   : > { %v1334_v34 = vpop.eup %1333 }
 0x74a   : > { %v1060_v35 = vmul.f32 %v1334_v34, %v1052_v28 }
 0x74c   : > { %v1068_v37 = vmul.f32 %v1179_v4, %v1060_v35 }
 0x74e   : > { %v1076_v38 = vadd.f32 %v1180_v36, %v1068_v37 }
 0x750   : > { %1077 = vst.msk [vmem:[%s361_s29] sm:$0xff] %vm392_vm1, %v1076_v38 }
 0x751 PF: > { %s19_s30 = sadd.s32 1, %s1341_s30  }
 0x752   : > { %p16_p4 = scmp.ge.s32.totalorder %s19_s30, 4  }
 0x754   :  { %18 = sbr.rel (!%p16_p4) target bundleno = 1 (0x1), region = 92 }

// kernel: decoder_forward.9
= control target key start
LH: loop header
LB: loop body
LE: loop exit
PB: predicated region body
PF: predicated region fallthrough
CT: control target
= control target key end

     0   :  { %s1312_s27 = smov 0   ;;  %s1452_s0 = inlined_call_operand.vmem [shape: f32[2,8,32], index: 0, kind: input, shape index: {}]   ;;  %s1453_s1 = inlined_call_operand.vmem [shape: f32[2,8,8], index: 1, kind: input, shape index: {}]   ;;  %s1454_s2 = inlined_call_operand.vmem [shape: bf16[32,96], index: 2, kind: input, shape index: {}]   ;;  %s1455_s3 = inlined_call_operand.vmem [shape: f32[1,96], index: 3, kind: input, shape index: {}]   ;;  %s1456_s4 = inlined_call_operand.vmem [shape: bf16[32,32], index: 4, kind: input, shape index: {}]   ;;  %s1457_s5 = inlined_call_operand.vmem [shape: f32[1,32], index: 5, kind: input, shape index: {}]   ;;  %s1458_s6 = inlined_call_operand.vmem [shape: f32[1,32], index: 6, kind: input, shape index: {}]   ;;  %s1459_s7 = inlined_call_operand.vmem [shape: f32[1,32], index: 7, kind: input, shape index: {}]   ;;  %s1460_s8 = inlined_call_operand.vmem [shape: f32[2,8,32], index: 8, kind: output, shape index: {}]  }
   0x1 LB: > { %s1085_s28 = sadd.s32 4294967295, %s1256_s27   ;;  %p1089_p0 = scmp.ge.s32.totalorder %s1256_s27, 1  ;;  %s1256_s27 = sphi %s1312_s27, %s18_s27  }
   0x2   : > { %p270_p1 = scmp.lt.s32.totalorder %s1256_s27, 3 }
   0x4   : > { %p271_p2 = pnand %p1089_p0, %p270_p1 }
   0x5   : > { %v1228_v0 = vld [vmem:[%s1454_s2] sm:$0xff] (!%p271_p2)   ;;  %s1258_s9 = smov (!%p271_p2), 96   ;;  %v1229_v1 = vld [vmem:[%s1454_s2 + $0x8] sm:$0xff] (!%p271_p2)   ;;  %v1259_v2 = vmov (!%p271_p2), 0.0   ;;  %p306_p3 = scmp.lt.s32.totalorder (!%p271_p2), %s1085_s28, 1  ;;  %vm1260_vm0 = vmmov (!%p271_p2), 0  }
   0x6   : > { %274 = sbr.rel (%p271_p2) target bundleno = 1867 (0x74b), region = 52  ;;  %389 = vrot.lane.b32.xlu0 (!%p271_p2), %v1228_v0, %s1258_s9  ;;  %1147 = vmatprep.subr.bf16.mxu1 (!%p271_p2), %v1259_v2  ;;  %v1093_v3 = vld [vmem:[%s1455_s3] ss:$0 sm:$0xff] (!%p271_p2)  ;;  %vm345_vm1 = vcmask (!%p271_p2), 261120   ;;  %vm466_vm2 = vcmask (!%p271_p2), 64512   ;;  %s1261_s18 = smov (!%p271_p2), 112  }
   0x7   : > { %1139 = vmatprep.subr.bf16.mxu0 (!%p271_p2), %v1259_v2  ;;  %1151 = vmatprep.mubr.msk.bf16.mxu1 (!%p271_p2), %vm1260_vm0, %v1259_v2  ;;  %s1262_s19 = smov (!%p271_p2), 120   ;;  %s1263_s20 = smov (!%p271_p2), 104   ;;  %vm713_vm3 = vcmask (!%p271_p2), 1043456   ;;  %vm917_vm4 = vcmask (!%p271_p2), 130048   ;;  %vm919_vm5 = vcmask (!%p271_p2), 195584  }
   0x8   : > { %1140 = vmatpush3.bf16.msra.mxu0 (!%p271_p2), %v1228_v0  ;;  %1143 = vmatprep.mubr.msk.bf16.mxu0 (!%p271_p2), %vm1260_vm0, %v1259_v2  ;;  %s1264_s29 = smov (!%p271_p2), 8   ;;  %s1265_s30 = smov (!%p271_p2), 16  }
   0x9   : > { %1141 = vmatprep.subr.bf16.mxu0 (!%p271_p2), %v1259_v2  ;;  %395 = vrot.lane.b32.xlu1 (!%p271_p2), %v1093_v3, %s1258_s9 }
   0xa   : > { %391 = vrot.lane.b32.xlu0 (!%p271_p2), %v1229_v1, %s1258_s9 }
   0xc   : > { %1142 = vmatpush3.bf16.msra.mxu0 (!%p271_p2), %v1229_v1 }
   0xd   : > { %s1462_s28 = smov (!%p306_p3, %s1085_s28), 1  ;;  %1155 = vmatprep.subr.bf16.mxu0 %v1259_v2 }
   0xe   : > { %s1339_s14 = sshll.u32 %s1462_s28, 3 }
   0xf   : > { %s309_s17 = scalar_lea.vmem %s1452_s0, %s1339_s14  ;;  %s313_s23 = scalar_lea.vmem %s1453_s1, %s1339_s14 }
  0x10   : > { %v1345_v4 = vld [vmem:[%s309_s17] sm:$0xff] }
  0x11   : > { %v326_v5 = vpack.c.bf16 %v1345_v4, %v1345_v4  ;;  %v320_v38 = vld [vmem:[%s313_s23] sm:$0xff] }
  0x13   : > { %1144 = vmatmul.mubr.msk.bf16.vlgmr.msra.gmra.mrb[0].mxu0 %vm345_vm1, %v326_v5 }
  0x14   : > { %1157 = vmatprep.mubr.msk.bf16.mxu0 %vm1260_vm0, %v1259_v2 }
  0x78   : > { %v390_v6 = vpop.permute.xlu0 %389 }
  0x79   : > { %1148 = vmatpush3.bf16.msra.mxu1 %v390_v6 }
  0x7a   : > { %1149 = vmatprep.subr.bf16.mxu1 %v1259_v2 }
  0x7b   : > { %v396_v12 = vpop.permute.xlu1 %395 }
  0x7c   : > { %v392_v7 = vpop.permute.xlu0 %391 }
  0x7d   : > { %1150 = vmatpush3.bf16.msra.mxu1 %v392_v7 }
  0x7e   : > { %1161 = vmatprep.subr.bf16.mxu1 %v1259_v2 }
  0x80   : > { %1152 = vmatmul.mubr.msk.bf16.vlgmr.msra.gmra.mrb[0].mxu1 %vm345_vm1, %v326_v5 }
  0x81   : > { %1163 = vmatprep.mubr.msk.bf16.mxu1 %vm1260_vm0, %v1259_v2 }
  0xe6   : > { %v383_v8 = vpop.f32.mrb[0].mxu0 }
  0xe7   : > { %v1145_v9 = vpop.f32.mrb[1].mxu0  ;;  %v384_v18 = vadd.f32 %v1093_v3, %v383_v8 }
  0xe8   : > { %v386_v10 = vpop.f32.mrb[2].mxu0 }
  0xe9   : > { %v1146_v11 = vpop.f32.mrb[3].mxu0  ;;  %v458_v21 = vpack.c.bf16 %v384_v18, %v384_v18 }
 0x153   : > { %v432_v13 = vpop.f32.mrb[0].mxu1 }
 0x154   : > { %v433_v14 = vadd.f32 %v432_v13, %v396_v12  ;;  %v1153_v15 = vpop.f32.mrb[1].mxu1 }
 0x155   : > { %v435_v16 = vpop.f32.mrb[2].mxu1 }
 0x156   : > { %452 = vrot.lane.b32.xlu0 %v433_v14, %s1261_s18  ;;  %449 = vrot.lane.b32.xlu1 %v433_v14, %s1262_s19  ;;  %v1154_v17 = vpop.f32.mrb[3].mxu1  ;;  %v1358_v19 = vpack.c.bf16 %v433_v14, %v433_v14 }
 0x158   : > { %v471_v20 = vsel %vm466_vm2, %v1358_v19, 0 }
 0x159   : > { %1156 = vmatpush3.bf16.xpose.msra.mxu0 %v471_v20 }
 0x15a   : > { %455 = vrot.lane.b32.xlu0 %v433_v14, %s1263_s20  ;;  %439 = vrot.lane.b32.xlu1 %v384_v18, %s1262_s19  ;;  %s317_s19 = scalar_lea.vmem %s1460_s8, %s1339_s14 }
 0x15b   : > { %1167 = vmatprep.subr.bf16.mxu0 %v1259_v2 }
 0x15e   : > { %442 = vrot.lane.b32.xlu1 %v384_v18, %s1261_s18  ;;  %445 = vrot.lane.b32.xlu0 %v384_v18, %s1263_s20 }
 0x160   : > { %1158 = vmatmul.mubr.msk.bf16.vlgmr.msra.gmra.mrb[4].mxu0 %vm466_vm2, %v458_v21 }
 0x161   : > { %1169 = vmatprep.mubr.msk.bf16.mxu0 %vm1260_vm0, %v1259_v2 }
 0x1c8   : > { %v453_v22 = vpop.permute.xlu0 %452  ;;  %v450_v23 = vpop.permute.xlu1 %449 }
 0x1c9   : > { %v1366_v24 = vpack.c.bf16 %v453_v22, %v453_v22  ;;  %v463_v25 = vpack.c.bf16 %v450_v23, %v450_v23 }
 0x1cb   : > { %v563_v26 = vsel %vm466_vm2, %v1366_v24, 0  ;;  %v517_v27 = vsel %vm466_vm2, %v463_v25, 0 }
 0x1cc   : > { %v456_v28 = vpop.permute.xlu0 %455  ;;  %1162 = vmatpush3.bf16.xpose.msra.mxu1 %v517_v27  ;;  %v440_v29 = vpop.permute.xlu1 %439  ;;  %1168 = vmatpush3.bf16.xpose.msra.mxu0 %v563_v26 }
 0x1cd   : > { %1173 = vmatprep.subr.bf16.mxu1 %v1259_v2  ;;  %1179 = vmatprep.subr.bf16.mxu0 %v1259_v2  ;;  %v1373_v30 = vpack.c.bf16 %v456_v28, %v456_v28  ;;  %v459_v31 = vpack.c.bf16 %v440_v29, %v440_v29 }
 0x1cf   : > { %v609_v34 = vsel %vm466_vm2, %v1373_v30, 0 }
 0x1d0   : > { %v443_v32 = vpop.permute.xlu1 %442  ;;  %v446_v35 = vpop.permute.xlu0 %445 }
 0x1d1   : > { %v460_v33 = vpack.c.bf16 %v443_v32, %v443_v32  ;;  %v461_v36 = vpack.c.bf16 %v446_v35, %v446_v35 }
 0x1d3   : > { %1164 = vmatmul.mubr.msk.bf16.vlgmr.msra.gmra.mrb[4].mxu1 %vm466_vm2, %v459_v31  ;;  %1170 = vmatmul.mubr.msk.bf16.vlgmr.msra.gmra.mrb[8].mxu0 %vm466_vm2, %v460_v33 }
 0x1d4   : > { %1174 = vmatpush3.bf16.xpose.msra.mxu1 %v609_v34  ;;  %1175 = vmatprep.mubr.msk.bf16.mxu1 %vm1260_vm0, %v1259_v2 }
 0x1d5   : > { %1185 = vmatprep.subr.bf16.mxu1 %v1259_v2  ;;  %1181 = vmatprep.mubr.msk.bf16.mxu0 %vm1260_vm0, %v1259_v2 }
 0x1db   : > { %1176 = vmatmul.mubr.msk.bf16.vlgmr.msra.gmra.mrb[8].mxu1 %vm466_vm2, %v461_v36 }
 0x1dc   : > { %1187 = vmatprep.mubr.msk.bf16.mxu1 %vm1260_vm0, %v1259_v2 }
 0x233   : > { %v507_v37 = vpop.f32.mrb[4].mxu0 }
 0x234   : > { %v651_v39 = vmul.f32 0.35355338, %v507_v37  ;;  %v1159_v40 = vpop.f32.mrb[5].mxu0 }
 0x235   : > { %v510_v41 = vpop.f32.mrb[6].mxu0 }
 0x236   : > { %v1160_v42 = vpop.f32.mrb[7].mxu0  ;;  %v655_v43 = vadd.f32 %v651_v39, %v320_v38 }
 0x238   : > { %v659_v44 = vsel %vm466_vm2, %v655_v43, -inf }
 0x239   : > { %660 = vmax.xlane.f32.xlu1 %v659_v44 }
 0x2a6   : > { %v553_v45 = vpop.f32.mrb[4].mxu1  ;;  %v599_v46 = vpop.f32.mrb[8].mxu0 }
 0x2a7   : > { %v652_v47 = vmul.f32 0.35355338, %v553_v45  ;;  %v653_v48 = vmul.f32 0.35355338, %v599_v46  ;;  %v1165_v49 = vpop.f32.mrb[5].mxu1  ;;  %v1171_v50 = vpop.f32.mrb[9].mxu0 }
 0x2a8   : > { %v556_v51 = vpop.f32.mrb[6].mxu1  ;;  %v602_v52 = vpop.f32.mrb[10].mxu0 }
 0x2a9   : > { %v1166_v53 = vpop.f32.mrb[7].mxu1  ;;  %v1172_v54 = vpop.f32.mrb[11].mxu0  ;;  %v656_v55 = vadd.f32 %v652_v47, %v320_v38  ;;  %v657_v57 = vadd.f32 %v653_v48, %v320_v38  ;;  %v1230_v52 = vld [vmem:[%s1456_s4] sm:$0xff]  }
 0x2aa   : > { %v1231_v53 = vld [vmem:[%s1456_s4 + $0x8] sm:$0xff]  }
 0x2ab   : > { %v662_v56 = vsel %vm466_vm2, %v656_v55, -inf  ;;  %v665_v61 = vsel %vm466_vm2, %v657_v57, -inf }
 0x2ac   : > { %663 = vmax.xlane.f32.xlu0 %v662_v56 }
 0x2ae   : > { %v645_v58 = vpop.f32.mrb[8].mxu1 }
 0x2af   : > { %v654_v59 = vmul.f32 0.35355338, %v645_v58  ;;  %v1177_v60 = vpop.f32.mrb[9].mxu1 }
 0x2b0   : > { %v648_v62 = vpop.f32.mrb[10].mxu1  ;;  %666 = vmax.xlane.f32.xlu0 %v665_v61 }
 0x2b1   : > { %v1178_v63 = vpop.f32.mrb[11].mxu1  ;;  %v658_v0 = vadd.f32 %v654_v59, %v320_v38 }
 0x2b3   : > { %v668_v1 = vsel %vm466_vm2, %v658_v0, -inf }
 0x2b4   : > { %669 = vmax.xlane.f32.xlu1 %v668_v1 }
 0x2c5   : > { %758 = vrot.lane.b32.xlu1 %v463_v25, %s1258_s9 }
 0x2c6   : > { %708 = vrot.lane.b32.xlu0 %v1358_v19, %s1258_s9  ;;  %v661_v3 = vpop.xlane.xlu1 %660 }
 0x2c7   : > { %v671_v5 = vsub.f32 %v655_v43, %v661_v3 }
 0x2c9   : > { %v675_v6 = vmul.f32 1.442695, %v671_v5 }
 0x2cb   : > { %1232 = vpow2.f32 %v675_v6 }
 0x2d5   : > { %v1233_v7 = vpop.eup %1232 }
 0x2d6   : > { %v683_v8 = vsel %vm466_vm2, %v1233_v7, 0.0 }
 0x2e5   : > { %684 = vadd.xlane.f32.xlu0 %v683_v8 }
 0x339   : > { %v664_v9 = vpop.xlane.xlu0 %663 }
 0x33a   : > { %v672_v10 = vsub.f32 %v656_v55, %v664_v9 }
 0x33c   : > { %v677_v11 = vmul.f32 1.442695, %v672_v10  ;;  %v1106_v10 = vld [vmem:[%s1457_s5] ss:$0 sm:$0xff] }
 0x33d   : > { %v667_v12 = vpop.xlane.xlu0 %666 }
 0x33e   : > { %1234 = vpow2.f32 %v677_v11  ;;  %v673_v13 = vsub.f32 %v657_v57, %v667_v12 }
 0x340   : > { %v679_v14 = vmul.f32 1.442695, %v673_v13 }
 0x341   : > { %v670_v15 = vpop.xlane.xlu1 %669  ;;  %v709_v16 = vpop.permute.xlu0 %708 }
 0x342   : > { %1236 = vpow2.f32 %v679_v14  ;;  %v674_v17 = vsub.f32 %v658_v0, %v670_v15  ;;  %v715_v18 = vsel %vm713_vm3, %v709_v16, 0 }
 0x343   : > { %1180 = vmatpush3.bf16.msra.mxu0 %v715_v18 }
 0x344   : > { %v681_v19 = vmul.f32 1.442695, %v674_v17  ;;  %1191 = vmatprep.subr.bf16.mxu0 %v1259_v2 }
 0x345   : > { %v759_v20 = vpop.permute.xlu1 %758 }
 0x346   : > { %1238 = vpow2.f32 %v681_v19  ;;  %v764_v21 = vsel %vm713_vm3, %v759_v20, 0 }
 0x347   : > { %1186 = vmatpush3.bf16.msra.mxu1 %v764_v21 }
 0x348   : > { %v1235_v22 = vpop.eup %1234  ;;  %1197 = vmatprep.subr.bf16.mxu1 %v1259_v2 }
 0x349   : > { %v686_v23 = vsel %vm466_vm2, %v1235_v22, 0.0 }
 0x34a   : > { %687 = vadd.xlane.f32.xlu1 %v686_v23 }
 0x34c   : > { %v1237_v25 = vpop.eup %1236 }
 0x34d   : > { %v689_v26 = vsel %vm466_vm2, %v1237_v25, 0.0 }
 0x34e   : > { %690 = vadd.xlane.f32.xlu0 %v689_v26 }
 0x350   : > { %v1239_v27 = vpop.eup %1238 }
 0x351   : > { %v692_v28 = vsel %vm466_vm2, %v1239_v27, 0.0 }
 0x352   : > { %693 = vadd.xlane.f32.xlu1 %v692_v28 }
 0x363   : > { %807 = vrot.lane.b32.xlu1 %v1366_v24, %s1258_s9 }
 0x364   : > { %856 = vrot.lane.b32.xlu0 %v1373_v30, %s1258_s9  ;;  %s1266_s9 = smov 24  }
 0x372   : > { %v685_v29 = vpop.xlane.xlu0 %684 }
 0x373   : > { %1240 = vrcp.f32 %v685_v29  ;;  %v1111_v29 = vld [vmem:[%s1459_s7] ss:$0 sm:$0xff] }
 0x37d   : > { %v1241_v31 = vpop.eup %1240 }
 0x37e   : > { %v699_v32 = vmul.f32 %v1241_v31, %v1233_v7 }
 0x380   : > { %v703_v33 = vpack.c.bf16 %v699_v32, %v699_v32 }
 0x382   : > { %1182 = vmatmul.mubr.msk.bf16.vlgmr.msra.gmra.mrb[12].mxu0 %vm466_vm2, %v703_v33 }
 0x383   : > { %1193 = vmatprep.mubr.msk.bf16.mxu0 %vm1260_vm0, %v1259_v2 }
 0x3d7   : > { %v688_v34 = vpop.xlane.xlu1 %687 }
 0x3d8   : > { %1242 = vrcp.f32 %v688_v34 }
 0x3db   : > { %v691_v35 = vpop.xlane.xlu0 %690 }
 0x3dc   : > { %1244 = vrcp.f32 %v691_v35 }
 0x3df   : > { %v694_v36 = vpop.xlane.xlu1 %693  ;;  %v857_v30 = vpop.permute.xlu0 %856 }
 0x3e0   : > { %1246 = vrcp.f32 %v694_v36  ;;  %v862_v43 = vsel %vm713_vm3, %v857_v30, 0 }
 0x3e2   : > { %v1243_v24 = vpop.eup %1242 }
 0x3e3   : > { %v700_v37 = vmul.f32 %v1243_v24, %v1235_v22  ;;  %v808_v38 = vpop.permute.xlu1 %807 }
 0x3e4   : > { %v813_v39 = vsel %vm713_vm3, %v808_v38, 0 }
 0x3e5   : > { %1192 = vmatpush3.bf16.msra.mxu0 %v813_v39  ;;  %v704_v40 = vpack.c.bf16 %v700_v37, %v700_v37 }
 0x3e6   : > { %v1245_v41 = vpop.eup %1244  ;;  %1203 = vmatprep.subr.bf16.mxu0 %v1259_v2 }
 0x3e7   : > { %v701_v42 = vmul.f32 %v1245_v41, %v1237_v25  ;;  %1188 = vmatmul.mubr.msk.bf16.vlgmr.msra.gmra.mrb[12].mxu1 %vm466_vm2, %v704_v40 }
 0x3e8   : > { %1198 = vmatpush3.bf16.msra.mxu1 %v862_v43  ;;  %1199 = vmatprep.mubr.msk.bf16.mxu1 %vm1260_vm0, %v1259_v2 }
 0x3e9   : > { %v705_v44 = vpack.c.bf16 %v701_v42, %v701_v42 }
 0x3ea   : > { %v1247_v45 = vpop.eup %1246 }
 0x3eb   : > { %v702_v46 = vmul.f32 %v1247_v45, %v1239_v27  ;;  %1194 = vmatmul.mubr.msk.bf16.vlgmr.msra.gmra.mrb[16].mxu0 %vm466_vm2, %v705_v44 }
 0x3ec   : > { %1207 = vmatprep.mubr.msk.bf16.mxu0 %vm1260_vm0, %v1259_v2  ;;  %1204 = vmatpush3.bf16.msra.mxu0 %v1230_v52 }
 0x3ed   : > { %v706_v47 = vpack.c.bf16 %v702_v46, %v702_v46  ;;  %1205 = vmatprep.subr.bf16.mxu0 %v1259_v2 }
 0x3ef   : > { %1200 = vmatmul.mubr.msk.bf16.vlgmr.msra.gmra.mrb[16].mxu1 %vm466_vm2, %v706_v47 }
 0x3f0   : > { %1206 = vmatpush3.bf16.msra.mxu0 %v1231_v53 }
 0x455   : > { %v751_v48 = vpop.f32.mrb[12].mxu0 }
 0x456   : > { %v1183_v49 = vpop.f32.mrb[13].mxu0 }
 0x457   : > { %v754_v50 = vpop.f32.mrb[14].mxu0 }
 0x458   : > { %v1184_v51 = vpop.f32.mrb[15].mxu0 }
 0x4ba   : > { %v800_v54 = vpop.f32.mrb[12].mxu1 }
 0x4bb   : > { %905 = vrot.lane.b32.xlu1 %v800_v54, %s1264_s29  ;;  %v1189_v55 = vpop.f32.mrb[13].mxu1 }
 0x4bc   : > { %v803_v56 = vpop.f32.mrb[14].mxu1 }
 0x4bd   : > { %v1190_v57 = vpop.f32.mrb[15].mxu1 }
 0x4be   : > { %v849_v58 = vpop.f32.mrb[16].mxu0 }
 0x4bf   : > { %909 = vrot.lane.b32.xlu0 %v849_v58, %s1265_s30  ;;  %v1195_v59 = vpop.f32.mrb[17].mxu0 }
 0x4c0   : > { %v852_v60 = vpop.f32.mrb[18].mxu0 }
 0x4c1   : > { %v1196_v61 = vpop.f32.mrb[19].mxu0 }
 0x4c2   : > { %v898_v62 = vpop.f32.mrb[16].mxu1 }
 0x4c3   : > { %913 = vrot.lane.b32.xlu1 %v898_v62, %s1266_s9  ;;  %v1201_v2 = vpop.f32.mrb[17].mxu1 }
 0x4c4   : > { %v901_v63 = vpop.f32.mrb[18].mxu1 }
 0x4c5   : > { %v1202_v0 = vpop.f32.mrb[19].mxu1 }
 0x52d   : > { %v906_v1 = vpop.permute.xlu1 %905 }
 0x52e   : > { %v916_v5 = vsel %vm466_vm2, %v751_v48, %v906_v1 }
 0x531   : > { %v910_v3 = vpop.permute.xlu0 %909 }
 0x532   : > { %v918_v6 = vsel %vm917_vm4, %v916_v5, %v910_v3 }
 0x535   : > { %v914_v7 = vpop.permute.xlu1 %913 }
 0x536   : > { %v920_v8 = vsel %vm919_vm5, %v918_v6, %v914_v7 }
 0x537   : > { %v921_v9 = vpack.c.bf16 %v920_v8, %v920_v8 }
 0x539   : > { %1208 = vmatmul.mubr.msk.bf16.vlgmr.msra.gmra.mrb[20].mxu0 %vm345_vm1, %v921_v9 }
 0x60c   : > { %v982_v11 = vpop.f32.mrb[20].mxu0 }
 0x60d   : > { %v983_v12 = vadd.f32 %v1106_v10, %v982_v11  ;;  %v1209_v13 = vpop.f32.mrb[21].mxu0 }
 0x60e   : > { %v985_v14 = vpop.f32.mrb[22].mxu0 }
 0x60f   : > { %v1210_v15 = vpop.f32.mrb[23].mxu0  ;;  %v988_v16 = vadd.f32 %v983_v12, %v1345_v4  ;;  %v1110_v4 = vld [vmem:[%s1458_s6] ss:$0 sm:$0xff] }
 0x611   : > { %v989_v17 = vsel %vm345_vm1, %v988_v16, 0.0 }
 0x612   : > { %990 = vadd.xlane.f32.xlu0 %v989_v17 }
 0x69f   : > { %v991_v18 = vpop.xlane.xlu0 %990 }
 0x6a0   : > { %v993_v19 = vmul.f32 0.03125, %v991_v18 }
 0x6a2   : > { %v994_v20 = vsub.f32 %v988_v16, %v993_v19 }
 0x6a4   : > { %v995_v21 = vmul.f32 %v994_v20, %v994_v20 }
 0x6a6   : > { %v996_v22 = vsel %vm345_vm1, %v995_v21, 0.0 }
 0x6a7   : > { %997 = vadd.xlane.f32.xlu1 %v996_v22 }
 0x734   : > { %v998_v23 = vpop.xlane.xlu1 %997 }
 0x735   : > { %v999_v25 = vmul.f32 0.03125, %v998_v23 }
 0x737   : > { %v1000_v26 = vadd.f32 1e-05, %v999_v25 }
 0x739   : > { %1248 = vrsqrt.f32 %v1000_v26 }
 0x743   : > { %v1249_v27 = vpop.eup %1248 }
 0x744   : > { %v1002_v28 = vmul.f32 %v1249_v27, %v994_v20 }
 0x746   : > { %v1010_v31 = vmul.f32 %v1110_v4, %v1002_v28 }
 0x748   : > { %v1018_v32 = vadd.f32 %v1111_v29, %v1010_v31 }
 0x74a   : > { %1019 = vst.msk [vmem:[%s317_s19] sm:$0xff] %vm345_vm1, %v1018_v32 }
 0x74b PF: > { %s18_s27 = sadd.s32 1, %s1256_s27  }
 0x74c   : > { %p15_p4 = scmp.ge.s32.totalorder %s18_s27, 4  }
 0x74e   :  { %17 = sbr.rel (!%p15_p4) target bundleno = 1 (0x1), region = 85 }

// kernel: decoder_forward.15
= control target key start
LH: loop header
LB: loop body
LE: loop exit
PB: predicated region body
PF: predicated region fallthrough
CT: control target
= control target key end

     0   :  { %v111_v0 = vmov 0.0   ;;  %vm112_vm0 = vmmov 0   ;;  %vm41_vm1 = vcmask 261120   ;;  %s154_s1 = inlined_call_operand.vmem [shape: bf16[32,128], index: 1, kind: input, shape index: {}]   ;;  %s155_s0 = inlined_call_operand.vmem [shape: f32[16,32], index: 0, kind: input, shape index: {}]   ;;  %s156_s2 = inlined_call_operand.vmem [shape: f32[1,128], index: 2, kind: input, shape index: {}]   ;;  %s157_s3 = inlined_call_operand.vmem [shape: f32[16,128], index: 3, kind: output, shape index: {}]  }
   0x1   :  { %99 = vmatprep.subr.bf16.mxu0 %v111_v0  ;;  %v109_v1 = vld [vmem:[%s154_s1] sm:$0xff]   ;;  %103 = vmatprep.mubr.msk.bf16.mxu0 %vm112_vm0, %v111_v0  ;;  %v110_v2 = vld [vmem:[%s154_s1 + $0x8] sm:$0xff]  }
   0x2   :  { %100 = vmatpush3.bf16.msra.mxu0 %v109_v1  ;;  %v15_v3 = vld [vmem:[%s155_s0] sm:$0xff]  ;;  %v16_v4 = vld [vmem:[%s155_s0 + $0x8] sm:$0xff] }
   0x3   :  { %101 = vmatprep.subr.bf16.mxu0 %v111_v0  ;;  %v17_v5 = vpack.c.bf16 %v16_v4, %v15_v3  ;;  %v92_v6 = vld [vmem:[%s156_s2] ss:$0 sm:$0xff] }
   0x6   :  { %102 = vmatpush3.bf16.msra.mxu0 %v110_v2 }
   0x9   :  { %104 = vmatmul.mubr.msk.bf16.vlgmr.msra.gmra.mrb[0].mxu0 %vm41_vm1, %v17_v5 }
  0xdc   :  { %v79_v7 = vpop.f32.mrb[0].mxu0 }
  0xdd   :  { %v80_v8 = vadd.f32 %v92_v6, %v79_v7  ;;  %v105_v9 = vpop.f32.mrb[1].mxu0 }
  0xde   :  { %v82_v10 = vpop.f32.mrb[2].mxu0 }
  0xdf   :  { %86 = vst [vmem:[%s157_s3] sm:$0xff] %v80_v8  ;;  %v83_v11 = vadd.f32 %v92_v6, %v82_v10  ;;  %v106_v12 = vpop.f32.mrb[3].mxu0 }
  0xe1   :  { %87 = vst [vmem:[%s157_s3 + $0x8] sm:$0xff] %v83_v11 }

// kernel: decoder_forward.13
= control target key start
LH: loop header
LB: loop body
LE: loop exit
PB: predicated region body
PF: predicated region fallthrough
CT: control target
= control target key end

     0   :  { %16 = vsyncpa [#allocation3], 0  ;;  %s1847_s0 = inlined_call_operand.vmem [shape: f32[2,8,32], index: 0, kind: input, shape index: {}]   ;;  %s1848_s1 = inlined_call_operand.vmem [shape: f32[2,16,32], index: 1, kind: input, shape index: {}]   ;;  %s1849_s2 = inlined_call_operand.vmem [shape: f32[2,1,16], index: 2, kind: input, shape index: {}]   ;;  %s1850_s3 = inlined_call_operand.vmem [shape: bf16[32,96], index: 3, kind: input, shape index: {}]   ;;  %s1851_s4 = inlined_call_operand.vmem [shape: f32[1,96], index: 4, kind: input, shape index: {}]   ;;  %s1852_s5 = inlined_call_operand.vmem [shape: bf16[32,32], index: 5, kind: input, shape index: {}]   ;;  %s1853_s6 = inlined_call_operand.vmem [shape: f32[1,32], index: 6, kind: input, shape index: {}]   ;;  %s1854_s7 = inlined_call_operand.vmem [shape: f32[1,32], index: 7, kind: input, shape index: {}]   ;;  %s1855_s8 = inlined_call_operand.vmem [shape: f32[1,32], index: 8, kind: input, shape index: {}]   ;;  %s1856_s9 = inlined_call_operand.vmem [shape: f32[2,8,32], index: 9, kind: output, shape index: {0}]   ;;  %s1857_s10 = inlined_call_operand.hbm [shape: f32[2,4,8,16], index: 10, kind: output, shape index: {1}]  }
   0x1   :  { %18 = vsyncpa [#allocation3 + $0x1], 0  ;;  %s1597_s13 = smov 0   ;;  %s1599_s14 = smov 0  }
   0x2   :  { %s1601_s15 = smov 0   ;;  %s1603_s16 = smov 0  }
   0x3 LB: > { %s1618_s17 = sadd.s32 4294967295, %s1529_s16   ;;  %s1248_s18 = sadd.s32 4294967294, %s1529_s16   ;;  %s1529_s16 = sphi %s1603_s16, %s1867_s16   ;;  %s1525_s15 = sphi %s1601_s15, %s1866_s15   ;;  %s1521_s14 = sphi %s1599_s14, %s1865_s14   ;;  %s1517_s13 = sphi %s1597_s13, %s1864_s13  }
   0x4   : > { %s1622_s19 = sadd.s32 1, %s1529_s16   ;;  %s261_s20 = sadd.s32 1, %s1525_s15 }
   0x5   : > { %s258_s21 = ssub.s32 %s1529_s16, %s1622_s19  ;;  %p271_p0 = scmp.ne.s32.totalorder %s1525_s15, %s1521_s14 }
   0x6   : > { %p259_p1 = scmp.eq.s32.totalorder %s258_s21, 0  ;;  %p272_p2 = scmp.eq.s32.totalorder %s1618_s17, 1 }
   0x7   : > { %p277_p3 = scmp.ne.s32.totalorder %s1521_s14, %s1517_s13  ;;  %p278_p4 = scmp.eq.s32.totalorder %s1248_s18, 1 }
   0x8   : > { %s1633_s22 = scalar_select %p259_p1, %s1525_s15, %s261_s20  }
   0x9   : > { %p1635_p5 = por %p272_p2, %p271_p0  ;;  %p1639_p6 = por %p278_p4, %p277_p3 }
   0xa   : > { %p1251_p7 = scmp.ge.s32.totalorder %s1529_s16, 1  ;;  %p335_p8 = scmp.lt.s32.totalorder %s1529_s16, 3 }
   0xc   : > { %p336_p9 = pnand %p1251_p7, %p335_p8 }
   0xd   : > { %v1445_v0 = vld [vmem:[%s1850_s3] sm:$0xff] (!%p336_p9)   ;;  %s1531_s27 = smov (!%p336_p9), 96   ;;  %v1446_v1 = vld [vmem:[%s1850_s3 + $0x8] sm:$0xff] (!%p336_p9)   ;;  %v1532_v2 = vmov (!%p336_p9), 0.0   ;;  %p384_p10 = scmp.lt.s32.totalorder (!%p336_p9), %s1618_s17, 1  ;;  %vm1533_vm0 = vmmov (!%p336_p9), 0  }
   0xe   : > { %339 = sbr.rel (%p336_p9) target bundleno = 1881 (0x759), region = 56  ;;  %474 = vrot.lane.b32.xlu0 (!%p336_p9), %v1445_v0, %s1531_s27  ;;  %1317 = vmatprep.subr.bf16.mxu1 (!%p336_p9), %v1532_v2  ;;  %v1257_v3 = vld [vmem:[%s1851_s4] ss:$0 sm:$0xff] (!%p336_p9)  ;;  %vm430_vm1 = vcmask (!%p336_p9), 261120   ;;  %vm565_vm2 = vcmask (!%p336_p9), 64512   ;;  %s1534_s11 = smov (!%p336_p9), 112  }
   0xf   : > { %1321 = vmatprep.mubr.msk.bf16.mxu1 (!%p336_p9), %vm1533_vm0, %v1532_v2  ;;  %1309 = vmatprep.subr.bf16.mxu0 (!%p336_p9), %v1532_v2  ;;  %s1535_s20 = smov (!%p336_p9), 120   ;;  %s1536_s21 = smov (!%p336_p9), 104   ;;  %vm764_vm3 = vcmask (!%p336_p9), 130048   ;;  %vm1015_vm4 = vcmask (!%p336_p9), 195584  }
  0x10   : > { %1310 = vmatpush3.bf16.msra.mxu0 (!%p336_p9), %v1445_v0  ;;  %1313 = vmatprep.mubr.msk.bf16.mxu0 (!%p336_p9), %vm1533_vm0, %v1532_v2  ;;  %s381_s29 = sand.u32 (!%p336_p9), 1, %s1521_s14  }
  0x11   : > { %1311 = vmatprep.subr.bf16.mxu0 (!%p336_p9), %v1532_v2  ;;  %480 = vrot.lane.b32.xlu1 (!%p336_p9), %v1257_v3, %s1531_s27 }
  0x12   : > { %476 = vrot.lane.b32.xlu0 (!%p336_p9), %v1446_v1, %s1531_s27 }
  0x14   : > { %1312 = vmatpush3.bf16.msra.mxu0 (!%p336_p9), %v1446_v1 }
  0x15   : > { %s1661_s12 = scalar_select %p384_p10, %s1618_s17, 1  ;;  %1325 = vmatprep.subr.bf16.mxu0 %v1532_v2 }
  0x17   : > { %s1858_s18 = sshll.u32 %s1661_s12, 3  ;;  %s1282_s26 = sshll.u32 %s1661_s12, 4 }
  0x18   : > { %s387_s25 = scalar_lea.vmem %s1847_s0, %s1858_s18  ;;  %s392_s30 = scalar_lea.vmem %s1848_s1, %s1282_s26 }
  0x19   : > { %v1674_v4 = vld [vmem:[%s387_s25] sm:$0xff]  ;;  %v403_v8 = vld [vmem:[%s392_s30 + $0x8] sm:$0xff]  ;;  %s395_s28 = scalar_lea.vmem %s1849_s2, %s1661_s12  ;;  %s1859_s26 = smov 8  }
  0x1a   : > { %v410_v5 = vpack.c.bf16 %v1674_v4, %v1674_v4  ;;  %v402_v7 = vld [vmem:[%s392_s30] sm:$0xff]  ;;  %s1252_s30 = sshll.u32 %s381_s29, 5 }
  0x1b   : > { %v411_v10 = vpack.c.bf16 %v403_v8, %v402_v7  ;;  %v1266_v49 = vld [vmem:[%s395_s28] ss:$0 sm:$0xff]  ;;  %s1538_s28 = smov 16  }
  0x1c   : > { %1314 = vmatmul.mubr.msk.bf16.vlgmr.msra.gmra.mrb[0].mxu0 %vm430_vm1, %v410_v5 }
  0x1d   : > { %1327 = vmatprep.mubr.msk.bf16.mxu0 %vm1533_vm0, %v1532_v2 }
  0x80   : > { %v475_v6 = vpop.permute.xlu0 %474 }
  0x81   : > { %1318 = vmatpush3.bf16.msra.mxu1 %v475_v6 }
  0x82   : > { %1319 = vmatprep.subr.bf16.mxu1 %v1532_v2 }
  0x83   : > { %v481_v15 = vpop.permute.xlu1 %480 }
  0x84   : > { %v477_v9 = vpop.permute.xlu0 %476 }
  0x85   : > { %1320 = vmatpush3.bf16.msra.mxu1 %v477_v9 }
  0x86   : > { %1331 = vmatprep.subr.bf16.mxu1 %v1532_v2 }
  0x88   : > { %1322 = vmatmul.mubr.msk.bf16.vlgmr.msra.gmra.mrb[0].mxu1 %vm430_vm1, %v411_v10 }
  0x89   : > { %1333 = vmatprep.mubr.msk.bf16.mxu1 %vm1533_vm0, %v1532_v2 }
  0xef   : > { %v468_v11 = vpop.f32.mrb[0].mxu0 }
  0xf0   : > { %v1315_v12 = vpop.f32.mrb[1].mxu0  ;;  %v469_v25 = vadd.f32 %v1257_v3, %v468_v11 }
  0xf1   : > { %v471_v13 = vpop.f32.mrb[2].mxu0 }
  0xf2   : > { %v1316_v14 = vpop.f32.mrb[3].mxu0  ;;  %v557_v26 = vpack.c.bf16 %v469_v25, %v469_v25 }
 0x15b   : > { %v520_v16 = vpop.f32.mrb[0].mxu1 }
 0x15c   : > { %v1323_v17 = vpop.f32.mrb[1].mxu1  ;;  %v521_v19 = vadd.f32 %v520_v16, %v481_v15 }
 0x15d   : > { %v523_v18 = vpop.f32.mrb[2].mxu1 }
 0x15e   : > { %v524_v20 = vadd.f32 %v523_v18, %v481_v15  ;;  %v1324_v21 = vpop.f32.mrb[3].mxu1 }
 0x160   : > { %v1435_v22 = vpack.i.bf16 %v524_v20, %v521_v19  ;;  %v1691_v23 = vpack.c.bf16 %v524_v20, %v521_v19 }
 0x162   : > { %1436 = vrot.lane.b32.xlu0 %v1435_v22, %s1534_s11  ;;  %1431 = vrot.lane.b32.xlu1 %v1435_v22, %s1535_s20  ;;  %v570_v24 = vsel %vm565_vm2, %v1691_v23, 0 }
 0x163   : > { %1326 = vmatpush3.bf16.xpose.msra.mxu0 %v570_v24 }
 0x164   : > { %1337 = vmatprep.subr.bf16.mxu0 %v1532_v2 }
 0x166   : > { %1441 = vrot.lane.b32.xlu0 %v1435_v22, %s1536_s21  ;;  %528 = vrot.lane.b32.xlu1 %v469_v25, %s1535_s20  ;;  %s1793_s20 = scalar_lea.sflag [#allocation3], %s381_s29 }
 0x16a   : > { %1328 = vmatmul.mubr.msk.bf16.vlgmr.msra.gmra.mrb[4].mxu0 %vm565_vm2, %v557_v26  ;;  %531 = vrot.lane.b32.xlu1 %v469_v25, %s1534_s11  ;;  %s1744_s11 = scalar_lea.vmem [#allocation2], %s1252_s30  ;;  %s1539_s30 = smov 24  }
 0x16b   : > { %534 = vrot.lane.b32.xlu0 %v469_v25, %s1536_s21  ;;  %1339 = vmatprep.mubr.msk.bf16.mxu0 %vm1533_vm0, %v1532_v2  ;;  %s1283_s21 = sshll.u32 %s1618_s17, 9  ;;  %s1141_s25 = sshll.u32 %s1744_s11, 4  ;;  %s1789_s25 = int_to_ptr.vmem [resolvable:$true] %s1141_s25 }
 0x16c   : > { %s1467_s18 = scalar_lea.vmem %s1789_s25, 512  ;;  %s1540_s17 = smov [#allocation2]  }
 0x16d   : > { %p1468_p11 = scmp.ne.s32.totalorder %s1789_s25, %s1467_s18 }
 0x16f   : > { %p1469_p12 = pnand %p1468_p11, %p1635_p5 }
 0x171   : > { %p1470_p13 = pneg %p1469_p12 }
 0x1d4   : > { %v1437_v27 = vpop.permute.xlu0 %1436  ;;  %v1432_v28 = vpop.permute.xlu1 %1431 }
 0x1d5   : > { %v1439_v29 = vunpack.i.h.bf16 %v1437_v27  ;;  %v1438_v30 = vunpack.i.l.bf16 %v1437_v27  ;;  %v1434_v31 = vunpack.i.h.bf16 %v1432_v28  ;;  %v1433_v32 = vunpack.i.l.bf16 %v1432_v28 }
 0x1d7   : > { %v1699_v33 = vpack.c.bf16 %v1439_v29, %v1438_v30  ;;  %v562_v34 = vpack.c.bf16 %v1434_v31, %v1433_v32 }
 0x1d8   : > { %v1442_v35 = vpop.permute.xlu0 %1441  ;;  %v529_v36 = vpop.permute.xlu1 %528 }
 0x1d9   : > { %v1444_v37 = vunpack.i.h.bf16 %v1442_v35  ;;  %v1443_v38 = vunpack.i.l.bf16 %v1442_v35  ;;  %v616_v39 = vsel %vm565_vm2, %v562_v34, 0  ;;  %v662_v40 = vsel %vm565_vm2, %v1699_v33, 0 }
 0x1da   : > { %1332 = vmatpush3.bf16.xpose.msra.mxu1 %v616_v39  ;;  %1338 = vmatpush3.bf16.xpose.msra.mxu0 %v662_v40  ;;  %v558_v43 = vpack.c.bf16 %v529_v36, %v529_v36 }
 0x1db   : > { %1343 = vmatprep.subr.bf16.mxu1 %v1532_v2  ;;  %1349 = vmatprep.subr.bf16.mxu0 %v1532_v2  ;;  %v1706_v42 = vpack.c.bf16 %v1444_v37, %v1443_v38 }
 0x1dc   : > { %v532_v41 = vpop.permute.xlu1 %531 }
 0x1dd   : > { %v559_v44 = vpack.c.bf16 %v532_v41, %v532_v41  ;;  %v708_v45 = vsel %vm565_vm2, %v1706_v42, 0  ;;  %v535_v46 = vpop.permute.xlu0 %534 }
 0x1de   : > { %v560_v47 = vpack.c.bf16 %v535_v46, %v535_v46 }
 0x1e1   : > { %1334 = vmatmul.mubr.msk.bf16.vlgmr.msra.gmra.mrb[4].mxu1 %vm565_vm2, %v558_v43  ;;  %1340 = vmatmul.mubr.msk.bf16.vlgmr.msra.gmra.mrb[8].mxu0 %vm565_vm2, %v559_v44 }
 0x1e2   : > { %1344 = vmatpush3.bf16.xpose.msra.mxu1 %v708_v45  ;;  %1345 = vmatprep.mubr.msk.bf16.mxu1 %vm1533_vm0, %v1532_v2 }
 0x1e3   : > { %1355 = vmatprep.subr.bf16.mxu1 %v1532_v2  ;;  %1351 = vmatprep.mubr.msk.bf16.mxu0 %vm1533_vm0, %v1532_v2 }
 0x1e9   : > { %1346 = vmatmul.mubr.msk.bf16.vlgmr.msra.gmra.mrb[8].mxu1 %vm565_vm2, %v560_v47 }
 0x1ea   : > { %1357 = vmatprep.mubr.msk.bf16.mxu1 %vm1533_vm0, %v1532_v2 }
 0x23d   : > { %v606_v48 = vpop.f32.mrb[4].mxu0 }
 0x23e   : > { %v750_v50 = vmul.f32 0.35355338, %v606_v48  ;;  %v1329_v51 = vpop.f32.mrb[5].mxu0 }
 0x23f   : > { %v609_v52 = vpop.f32.mrb[6].mxu0 }
 0x240   : > { %v1330_v53 = vpop.f32.mrb[7].mxu0  ;;  %v760_v54 = vadd.f32 %v1266_v49, %v750_v50 }
 0x242   : > { %v765_v55 = vsel %vm764_vm3, %v760_v54, -inf }
 0x243   : > { %766 = vmax.xlane.f32.xlu1 %v765_v55 }
 0x2b4   : > { %v652_v56 = vpop.f32.mrb[4].mxu1  ;;  %v698_v58 = vpop.f32.mrb[8].mxu0 }
 0x2b5   : > { %v751_v57 = vmul.f32 0.35355338, %v652_v56  ;;  %v1335_v59 = vpop.f32.mrb[5].mxu1  ;;  %v752_v60 = vmul.f32 0.35355338, %v698_v58  ;;  %v1341_v61 = vpop.f32.mrb[9].mxu0 }
 0x2b6   : > { %v655_v62 = vpop.f32.mrb[6].mxu1  ;;  %v701_v63 = vpop.f32.mrb[10].mxu0  ;;  %v1447_v59 = vld [vmem:[%s1852_s5] sm:$0xff]  }
 0x2b7   : > { %v1336_v0 = vpop.f32.mrb[7].mxu1  ;;  %v761_v1 = vadd.f32 %v1266_v49, %v751_v57  ;;  %v1342_v3 = vpop.f32.mrb[11].mxu0  ;;  %v762_v6 = vadd.f32 %v1266_v49, %v752_v60  ;;  %v1448_v60 = vld [vmem:[%s1852_s5 + $0x8] sm:$0xff]  }
 0x2b9   : > { %v768_v5 = vsel %vm764_vm3, %v761_v1, -inf  ;;  %v771_v10 = vsel %vm764_vm3, %v762_v6, -inf }
 0x2ba   : > { %769 = vmax.xlane.f32.xlu0 %v768_v5 }
 0x2bc   : > { %v744_v7 = vpop.f32.mrb[8].mxu1 }
 0x2bd   : > { %v753_v8 = vmul.f32 0.35355338, %v744_v7  ;;  %v1347_v9 = vpop.f32.mrb[9].mxu1 }
 0x2be   : > { %v747_v11 = vpop.f32.mrb[10].mxu1  ;;  %772 = vmax.xlane.f32.xlu0 %v771_v10 }
 0x2bf   : > { %v1348_v12 = vpop.f32.mrb[11].mxu1  ;;  %v763_v13 = vadd.f32 %v1266_v49, %v753_v8 }
 0x2c1   : > { %v774_v14 = vsel %vm764_vm3, %v763_v13, -inf }
 0x2c2   : > { %775 = vmax.xlane.f32.xlu1 %v774_v14 }
 0x2d0   : > { %v767_v15 = vpop.xlane.xlu1 %766 }
 0x2d1   : > { %v777_v16 = vsub.f32 %v760_v54, %v767_v15 }
 0x2d3   : > { %861 = vrot.lane.b32.xlu1 %v562_v34, %s1531_s27  ;;  %v781_v17 = vmul.f32 1.442695, %v777_v16 }
 0x2d4   : > { %814 = vrot.lane.b32.xlu0 %v1691_v23, %s1531_s27 }
 0x2d5   : > { %1449 = vpow2.f32 %v781_v17  ;;  %v1271_v17 = vld [vmem:[%s1853_s6] ss:$0 sm:$0xff] }
 0x2df   : > { %v1450_v18 = vpop.eup %1449 }
 0x2e0   : > { %v789_v19 = vsel %vm764_vm3, %v1450_v18, 0.0 }
 0x2f3   : > { %790 = vadd.xlane.f32.xlu0 %v789_v19 }
 0x347   : > { %v770_v20 = vpop.xlane.xlu0 %769 }
 0x348   : > { %v778_v21 = vsub.f32 %v761_v1, %v770_v20 }
 0x34a   : > { %v783_v22 = vmul.f32 1.442695, %v778_v21 }
 0x34b   : > { %v773_v24 = vpop.xlane.xlu0 %772 }
 0x34c   : > { %1451 = vpow2.f32 %v783_v22  ;;  %v779_v25 = vsub.f32 %v762_v6, %v773_v24 }
 0x34e   : > { %v785_v26 = vmul.f32 1.442695, %v779_v25 }
 0x34f   : > { %v776_v27 = vpop.xlane.xlu1 %775  ;;  %v815_v28 = vpop.permute.xlu0 %814 }
 0x350   : > { %1453 = vpow2.f32 %v785_v26  ;;  %v780_v29 = vsub.f32 %v763_v13, %v776_v27  ;;  %1350 = vmatpush3.bf16.msra.mxu0 %v815_v28 }
 0x351   : > { %1361 = vmatprep.subr.bf16.mxu0 %v1532_v2 }
 0x352   : > { %v787_v23 = vmul.f32 1.442695, %v780_v29 }
 0x353   : > { %v862_v30 = vpop.permute.xlu1 %861 }
 0x354   : > { %1455 = vpow2.f32 %v787_v23  ;;  %1356 = vmatpush3.bf16.msra.mxu1 %v862_v30 }
 0x355   : > { %1367 = vmatprep.subr.bf16.mxu1 %v1532_v2 }
 0x356   : > { %v1452_v31 = vpop.eup %1451 }
 0x357   : > { %v792_v32 = vsel %vm764_vm3, %v1452_v31, 0.0 }
 0x358   : > { %793 = vadd.xlane.f32.xlu1 %v792_v32 }
 0x35a   : > { %v1454_v34 = vpop.eup %1453 }
 0x35b   : > { %v795_v35 = vsel %vm764_vm3, %v1454_v34, 0.0 }
 0x35c   : > { %796 = vadd.xlane.f32.xlu0 %v795_v35 }
 0x35e   : > { %v1456_v36 = vpop.eup %1455 }
 0x35f   : > { %v798_v37 = vsel %vm764_vm3, %v1456_v36, 0.0 }
 0x360   : > { %799 = vadd.xlane.f32.xlu1 %v798_v37 }
 0x371   : > { %908 = vrot.lane.b32.xlu1 %v1699_v33, %s1531_s27 }
 0x372   : > { %955 = vrot.lane.b32.xlu0 %v1706_v42, %s1531_s27  ;;  %s1787_s27 = scalar_lea.hbm %s1857_s10, %s1283_s21 }
 0x380   : > { %v791_v38 = vpop.xlane.xlu0 %790 }
 0x381   : > { %1457 = vrcp.f32 %v791_v38 }
 0x38b   : > { %v1458_v39 = vpop.eup %1457 }
 0x38c   : > { %v805_v40 = vmul.f32 %v1458_v39, %v1450_v18 }
 0x38e   : > { %1116 = vst.msk [vmem:[%s1744_s11] sm:$0xff] %vm764_vm3, %v805_v40  ;;  %v809_v41 = vpack.c.bf16 %v805_v40, %v805_v40 }
 0x390   : > { %1352 = vmatmul.mubr.msk.bf16.vlgmr.msra.gmra.mrb[12].mxu0 %vm764_vm3, %v809_v41 }
 0x391   : > { %1363 = vmatprep.mubr.msk.bf16.mxu0 %vm1533_vm0, %v1532_v2 }
 0x3e5   : > { %v794_v33 = vpop.xlane.xlu1 %793 }
 0x3e6   : > { %1459 = vrcp.f32 %v794_v33 }
 0x3e9   : > { %v797_v42 = vpop.xlane.xlu0 %796 }
 0x3ea   : > { %1461 = vrcp.f32 %v797_v42 }
 0x3ed   : > { %v800_v43 = vpop.xlane.xlu1 %799  ;;  %v956_v50 = vpop.permute.xlu0 %955 }
 0x3ee   : > { %1463 = vrcp.f32 %v800_v43 }
 0x3f0   : > { %v1460_v44 = vpop.eup %1459 }
 0x3f1   : > { %v806_v45 = vmul.f32 %v1460_v44, %v1452_v31  ;;  %v909_v46 = vpop.permute.xlu1 %908 }
 0x3f2   : > { %1362 = vmatpush3.bf16.msra.mxu0 %v909_v46 }
 0x3f3   : > { %1117 = vst.msk [vmem:[%s1744_s11 + $0x8] sm:$0xff] %vm764_vm3, %v806_v45  ;;  %v810_v47 = vpack.c.bf16 %v806_v45, %v806_v45  ;;  %1373 = vmatprep.subr.bf16.mxu0 %v1532_v2 }
 0x3f4   : > { %v1462_v48 = vpop.eup %1461 }
 0x3f5   : > { %v807_v49 = vmul.f32 %v1462_v48, %v1454_v34  ;;  %1358 = vmatmul.mubr.msk.bf16.vlgmr.msra.gmra.mrb[12].mxu1 %vm764_vm3, %v810_v47 }
 0x3f6   : > { %1368 = vmatpush3.bf16.msra.mxu1 %v956_v50  ;;  %1369 = vmatprep.mubr.msk.bf16.mxu1 %vm1533_vm0, %v1532_v2 }
 0x3f7   : > { %1118 = vst.msk [vmem:[%s1744_s11 + $0x10] sm:$0xff] %vm764_vm3, %v807_v49  ;;  %v811_v51 = vpack.c.bf16 %v807_v49, %v807_v49 }
 0x3f8   : > { %v1464_v52 = vpop.eup %1463 }
 0x3f9   : > { %v808_v53 = vmul.f32 %v1464_v52, %v1456_v36  ;;  %1364 = vmatmul.mubr.msk.bf16.vlgmr.msra.gmra.mrb[16].mxu0 %vm764_vm3, %v811_v51 }
 0x3fa   : > { %1377 = vmatprep.mubr.msk.bf16.mxu0 %vm1533_vm0, %v1532_v2  ;;  %1374 = vmatpush3.bf16.msra.mxu0 %v1447_v59 }
 0x3fb   : > { %1119 = vst.msk [vmem:[%s1744_s11 + $0x18] sm:$0xff] %vm764_vm3, %v808_v53  ;;  %v812_v54 = vpack.c.bf16 %v808_v53, %v808_v53  ;;  %1375 = vmatprep.subr.bf16.mxu0 %v1532_v2  ;;  %s1471_s11 = sshll.u32 %s1540_s17, 4  ;;  %s1472_s11 = int_to_ptr.vmem [resolvable:$false] %s1471_s11 }
 0x3fc   : > { %p1474_p0 = scmp.lt.s32.totalorder %s1789_s25, %s1472_s11 }
 0x3fd   : > { %1370 = vmatmul.mubr.msk.bf16.vlgmr.msra.gmra.mrb[16].mxu1 %vm764_vm3, %v812_v54 }
 0x3fe   : > { %1376 = vmatpush3.bf16.msra.mxu0 %v1448_v60 }
 0x463   : > { %v854_v55 = vpop.f32.mrb[12].mxu0 }
 0x464   : > { %v1353_v56 = vpop.f32.mrb[13].mxu0 }
 0x465   : > { %v857_v57 = vpop.f32.mrb[14].mxu0 }
 0x466   : > { %v1354_v58 = vpop.f32.mrb[15].mxu0 }
 0x4c8   : > { %v901_v61 = vpop.f32.mrb[12].mxu1 }
 0x4c9   : > { %1002 = vrot.lane.b32.xlu1 %v901_v61, %s1859_s26  ;;  %v1359_v62 = vpop.f32.mrb[13].mxu1  ;;  %s1473_s26 = scalar_lea.vmem %s1472_s11, 1024 }
 0x4ca   : > { %v904_v63 = vpop.f32.mrb[14].mxu1  ;;  %p1475_p1 = scmp.lt.s32.totalorder %s1473_s26, %s1467_s18 }
 0x4cb   : > { %v1360_v0 = vpop.f32.mrb[15].mxu1 }
 0x4cc   : > { %v948_v1 = vpop.f32.mrb[16].mxu0  ;;  %p1476_p2 = por %p1475_p1, %p1474_p0 }
 0x4cd   : > { %1006 = vrot.lane.b32.xlu0 %v948_v1, %s1538_s28  ;;  %v1365_v3 = vpop.f32.mrb[17].mxu0 }
 0x4ce   : > { %v951_v5 = vpop.f32.mrb[18].mxu0  ;;  %p1477_p3 = pnand %p1476_p2, %p1470_p13 }
 0x4cf   : > { %v1366_v6 = vpop.f32.mrb[19].mxu0 }
 0x4d0   : > { %v995_v7 = vpop.f32.mrb[16].mxu1 }
 0x4d1   : > { %1010 = vrot.lane.b32.xlu1 %v995_v7, %s1539_s30  ;;  %v1371_v2 = vpop.f32.mrb[17].mxu1 }
 0x4d2   : > { %v998_v8 = vpop.f32.mrb[18].mxu1 }
 0x4d3   : > { %v1372_v9 = vpop.f32.mrb[19].mxu1 }
 0x53b   : > { %v1003_v10 = vpop.permute.xlu1 %1002 }
 0x53c   : > { %v1013_v12 = vsel %vm565_vm2, %v854_v55, %v1003_v10 }
 0x53f   : > { %v1007_v11 = vpop.permute.xlu0 %1006 }
 0x540   : > { %v1014_v13 = vsel %vm764_vm3, %v1013_v12, %v1007_v11 }
 0x543   : > { %v1011_v14 = vpop.permute.xlu1 %1010 }
 0x544   : > { %v1016_v15 = vsel %vm1015_vm4, %v1014_v13, %v1011_v14 }
 0x545   : > { %v1017_v16 = vpack.c.bf16 %v1016_v15, %v1016_v15 }
 0x547   : > { %1378 = vmatmul.mubr.msk.bf16.vlgmr.msra.gmra.mrb[20].mxu0 %vm430_vm1, %v1017_v16 }
 0x61a   : > { %v1078_v18 = vpop.f32.mrb[20].mxu0 }
 0x61b   : > { %v1079_v19 = vadd.f32 %v1271_v17, %v1078_v18  ;;  %v1379_v20 = vpop.f32.mrb[21].mxu0 }
 0x61c   : > { %v1081_v21 = vpop.f32.mrb[22].mxu0 }
 0x61d   : > { %v1380_v22 = vpop.f32.mrb[23].mxu0  ;;  %v1084_v24 = vadd.f32 %v1079_v19, %v1674_v4 }
 0x61f   : > { %v1085_v25 = vsel %vm430_vm1, %v1084_v24, 0.0 }
 0x620   : > { %1086 = vadd.xlane.f32.xlu0 %v1085_v25 }
 0x6ad   : > { %v1087_v26 = vpop.xlane.xlu0 %1086 }
 0x6ae   : > { %v1089_v27 = vmul.f32 0.03125, %v1087_v26 }
 0x6b0   : > { %v1090_v28 = vsub.f32 %v1084_v24, %v1089_v27 }
 0x6b2   : > { %v1091_v29 = vmul.f32 %v1090_v28, %v1090_v28 }
 0x6b4   : > { %v1092_v23 = vsel %vm430_vm1, %v1091_v29, 0.0 }
 0x6b5   : > { %1093 = vadd.xlane.f32.xlu1 %v1092_v23 }
 0x6b6   : > { %1480 = shalt.err (!%p1477_p3)
}
 0x6b7   : > { %s1481_s29 = scalar_lea.hbm %s1787_s27, 512  ;;  %s1485_s30 = scalar_lea.hbm %s1857_s10, 1024 }
 0x6b8   : > { %p1482_p4 = scmp.ne.s32.totalorder %s1787_s27, %s1481_s29  ;;  %p1486_p9 = scmp.lt.u32.totalorder %s1787_s27, %s1857_s10 }
 0x6b9   : > { %p1487_p10 = scmp.lt.u32.totalorder %s1485_s30, %s1481_s29  ;;  %p1489_p12 = scmp.lt.u32.totalorder %s1481_s29, %s1787_s27 }
 0x6ba   : > { %p1483_p7 = pnand %p1482_p4, %p1635_p5 }
 0x6bb   : > { %p1488_p11 = por %p1487_p10, %p1486_p9 }
 0x6bc   : > { %p1484_p8 = pneg %p1483_p7 }
 0x6bd   : > { %p1490_p13 = por %p1489_p12, %p1488_p11 }
 0x6bf   : > { %p1491_p0 = pnand %p1490_p13, %p1484_p8 }
 0x6c1   : > { %1494 = shalt.err (!%p1491_p0)
}
 0x6c2   : > { %s1541_s18 = smov 128   ;;  %s1862_s26 = smov 8   ;;  %v1275_v34 = vld [vmem:[%s1854_s7] ss:$0 sm:$0xff] }
 0x6c3   : > { %1381 = dma.vmem_to_hbm [thread:$0]  (%p1635_p5), %s1789_s25, 512, %s1787_s27, %s1793_s20, %s1541_s18, %s1541_s18, %s1862_s26  }
 0x6c4   : > { %v1276_v36 = vld [vmem:[%s1855_s8] ss:$0 sm:$0xff]  ;;  %s1863_s23 = sshll.u32 %s1661_s12, 3 }
 0x6c5   : > { %s399_s25 = scalar_lea.vmem %s1856_s9, %s1863_s23 }
 0x742   : > { %v1094_v4 = vpop.xlane.xlu1 %1093 }
 0x743   : > { %v1095_v30 = vmul.f32 0.03125, %v1094_v4 }
 0x745   : > { %v1096_v31 = vadd.f32 1e-05, %v1095_v30 }
 0x747   : > { %1465 = vrsqrt.f32 %v1096_v31 }
 0x751   : > { %v1466_v32 = vpop.eup %1465 }
 0x752   : > { %v1098_v35 = vmul.f32 %v1466_v32, %v1090_v28 }
 0x754   : > { %v1106_v37 = vmul.f32 %v1275_v34, %v1098_v35 }
 0x756   : > { %v1114_v38 = vadd.f32 %v1276_v36, %v1106_v37 }
 0x758   : > { %1115 = vst.msk [vmem:[%s399_s25] sm:$0xff] %vm430_vm1, %v1114_v38 }
 0x759 PF: > { %p1387_p5 = scmp.ge.s32.totalorder %s1529_s16, 2  ;;  %s1163_s27 = sand.u32 1, %s1517_s13  }
 0x75a   : > { %s1164_s20 = scalar_lea.sflag [#allocation3], %s1163_s27 }
 0x75b   : > { %p1384_p1 = pnand %p1387_p5, %p1639_p6 }
 0x75d   : > { %1512 = dma.done.wait (!%p1384_p1), %s1164_s20, 512  }
 0x75e   : > { %1514 = vsyncadd (!%p1384_p1), %s1164_s20, 4294966784  ;;  %p21_p2 = scmp.ge.s32.totalorder %s1622_s19, 4   ;;  %s1864_s13 = smov %s1521_s14 }
 0x75f   : > { %s1865_s14 = smov %s1525_s15  ;;  %s1866_s15 = smov %s1633_s22 }
 0x760   : > { %s1867_s16 = smov %s1622_s19  ;;  %23 = sbr.rel (!%p21_p2) target bundleno = 3 (0x3), region = 109 }
 0x767   :  { %1169 = vsyncpa [#allocation3], 1 }
 0x768   :  { %1171 = vsyncpa [#allocation3 + $0x1], 1 }

</bundles_post_ra>
